<compile_context>
chip_gen: v6e
topology: v6e:2x2x1
jax: 0.10.0
libtpu: 0.0.40
codegen_flags: <defaults>
</compile_context>

<pallas_src>
import math

import jax
import jax.numpy as jnp
import numpy as np
from jax.experimental import pallas as pl
from jax.experimental.pallas import tpu as pltpu

_EPS = 1e-5                 # nn.BatchNorm2d default eps
_MXU_DTYPE = jnp.bfloat16   # MXU operand dtype (f32 accumulation, f32 epilogue)
_SUBLANE = 8                # f32 sublane tile; input channels are padded to this


def log2_diff(a, b):
    return int(round(math.log2(a) - math.log2(b)))


# ----------------------------------------------------------------------------
# Constant resampling operators, applied on the RIGHT of the (C, M) slab:
#   y_resampled = y @ OP.   Built once per (N, level) at trace time.
# ----------------------------------------------------------------------------
def _pool_matrix_t(N, H, W, dtype):
    """(N*H*W, N*H/2*W/2) operator: 2x2 average pooling, right-multiply form."""
    H2, W2 = H // 2, W // 2
    P = np.zeros((N * H * W, N * H2 * W2), np.float32)
    for n in range(N):
        for i in range(H):
            for j in range(W):
                P[(n * H + i) * W + j, (n * H2 + i // 2) * W2 + j // 2] = 0.25
    return jnp.asarray(P, dtype=dtype)


def _upsample_matrix_t(N, H, W, dtype):
    """(N*H*W, N*2H*2W) operator: 2x nearest-neighbour upsampling."""
    H2, W2 = 2 * H, 2 * W
    U = np.zeros((N * H * W, N * H2 * W2), np.float32)
    for n in range(N):
        for i in range(H2):
            for j in range(W2):
                U[(n * H + i // 2) * W + j // 2, (n * H2 + i) * W2 + j] = 1.0
    return jnp.asarray(U, dtype=dtype)


# ----------------------------------------------------------------------------
# Single fused kernel for the whole forward pass.
# ----------------------------------------------------------------------------
def _make_iit_kernel(imsize, nc, n_levels, mxu_dtype):

    def kernel(*refs):
        it = iter(refs)
        x_ref = next(it)                                  # (cin_pad, N*imsize^2) f32
        pool_refs = [next(it) for _ in range(n_levels)]   # level l -> l+1
        up_refs = [next(it) for _ in range(n_levels)]     # deepest-first
        stem_w, stem_b = next(it), next(it)
        enc = [dict(w1=next(it), skip_b=next(it), g1=next(it), b1=next(it),
                    w2=next(it), g2=next(it), b2=next(it)) for _ in range(n_levels)]
        dec = [dict(w1=next(it), skip_b=next(it), g1=next(it), b1=next(it))
               for _ in range(n_levels)]
        fin_w, fin_g, fin_b = next(it), next(it), next(it)
        out_w, out_b = next(it), next(it)
        o_ref = next(it)

        # -------- trace-time memo caches (masks / permutations built once) -----
        mask_cache = {}
        perm_cache = {}

        def border_masks(H, W, M):
            # 3x3 'same'-conv validity masks, built once per resolution level
            # (JAX does not CSE iota chains).  Center tap has no mask.
            key = (H, W)
            if key not in mask_cache:
                lane = jax.lax.broadcasted_iota(jnp.int32, (1, M), 1)
                col = lane & (W - 1)             # j     (W power of two)
                pos = lane & (H * W - 1)         # i*W+j within one image
                col_ok = {-1: col >= 1, 0: None, 1: col < (W - 1)}
                row_ok = {-1: pos >= W, 0: None, 1: pos < (H * W - W)}
                masks = {}
                for di in (-1, 0, 1):
                    for dj in (-1, 0, 1):
                        r, c = row_ok[di], col_ok[dj]
                        if r is None and c is None:
                            masks[(di, dj)] = None
                        elif r is None:
                            masks[(di, dj)] = c
                        elif c is None:
                            masks[(di, dj)] = r
                        else:
                            masks[(di, dj)] = r & c
                mask_cache[key] = masks
            return mask_cache[key]

        def shift_lanes(a, s, M):
            # result[:, m] = a[:, (m + s) mod M]; wrapped lanes are masked by
            # the caller (wrap only ever happens at masked image borders).
            k = s % M
            if k == 0:
                return a
            if M % 128 == 0:
                # XLU lane rotate (np.roll semantics: out[m] = in[(m-shift) mod M])
                return pltpu.roll(a, M - k, 1)
            # deepest level (lane dim < 128): tiny MXU permutation instead of a
            # sub-vreg rotate.  Exact: permutation of already-bf16-bound values.
            if (M, k) not in perm_cache:
                r = jax.lax.broadcasted_iota(jnp.int32, (M, M), 0)
                c = jax.lax.broadcasted_iota(jnp.int32, (M, M), 1)
                perm_cache[(M, k)] = (((c + k) & (M - 1)) == r).astype(mxu_dtype)
            return jnp.dot(a.astype(mxu_dtype), perm_cache[(M, k)],
                           preferred_element_type=jnp.float32)

        def conv3x3(a, w_ref, H, W):
            # 'same' 3x3 conv on a (cin, M) channels-first slab as ONE MXU
            # matmul with K = 9*cin (implicit im2col).  Masking in f32, one
            # f32->bf16 cast of the assembled block, f32 accumulation.
            M = a.shape[1]
            masks = border_masks(H, W, M)
            taps = []
            for di in (-1, 0, 1):
                for dj in (-1, 0, 1):
                    t = shift_lanes(a, di * W + dj, M)
                    m = masks[(di, dj)]
                    if m is not None:
                        t = jnp.where(m, t, 0.0)
                    taps.append(t)
            cols = jnp.concatenate(taps, axis=0).astype(mxu_dtype)   # (9*cin, M)
            return jnp.dot(w_ref[...], cols, preferred_element_type=jnp.float32)

        def batchnorm(v, g_ref, b_ref):
            # training-mode BatchNorm2d, single pass (E[x^2]-E[x]^2), folded
            # into one per-channel scale + offset.  Exact stats: gridless kernel.
            inv_m = 1.0 / v.shape[1]
            mean = jnp.sum(v, axis=1, keepdims=True) * inv_m
            ex2 = jnp.sum(v * v, axis=1, keepdims=True) * inv_m
            var = ex2 - mean * mean
            scale = g_ref[...] * jax.lax.rsqrt(var + _EPS)
            offset = b_ref[...] - mean * scale
            return v * scale + offset

        def mish(v):
            # mish(x) = x*tanh(softplus(x)) = x*(t^2-1)/(t^2+1), t = 1+exp(x).
            # One exp + one approx reciprocal; clamp keeps t^2 finite (ratio==1
            # to f32 precision beyond the clamp, matching tanh(softplus)).
            t = 1.0 + jnp.exp(jnp.minimum(v, 20.0))
            t2 = t * t
            return v * (t2 - 1.0) * pl.reciprocal(t2 + 1.0, approx=True)

        def resample(v, mat_ref):
            # avg-pool / nearest-upsample as a right-multiply on the idle MXU.
            return jnp.dot(v.astype(mxu_dtype), mat_ref[...],
                           preferred_element_type=jnp.float32)

        # -------- encoder stem: ConvBlock(nc_in, nc0, norm='none') --------------
        H = W = imsize
        y = mish(conv3x3(x_ref[...], stem_w, H, W) + stem_b[...])

        # -------- encoder: FancyMultiLayerDownBlock x n --------------------------
        for i in range(n_levels):
            cout = nc[i + 1]
            p = resample(y, pool_refs[i])            # 2x2 avg pool
            H //= 2
            W //= 2
            acc = conv3x3(p, enc[i]["w1"], H, W)     # merged [3x3 c1 | 1x1 skip]
            c1 = mish(batchnorm(acc[:cout, :], enc[i]["g1"], enc[i]["b1"]))
            skip = acc[cout:, :] + enc[i]["skip_b"][...]
            c2 = mish(batchnorm(conv3x3(c1, enc[i]["w2"], H, W),
                                enc[i]["g2"], enc[i]["b2"]))
            y = c2 + skip

        # -------- decoder: ResUpConvBlock x n (deepest first) --------------------
        for j in range(n_levels):
            cout = nc[n_levels - 1 - j]
            u = resample(y, up_refs[j])              # 2x nearest upsample
            H *= 2
            W *= 2
            acc = conv3x3(u, dec[j]["w1"], H, W)     # merged [3x3 c1 | 1x1 skip]
            c1 = mish(batchnorm(acc[:cout, :], dec[j]["g1"], dec[j]["b1"]))
            skip = acc[cout:, :] + dec[j]["skip_b"][...]
            y = c1 + skip

        # -------- final head: ConvBlock(nc0, nc0) + 1x1 conv to nc_in ------------
        y = mish(batchnorm(conv3x3(y, fin_w, H, W), fin_g, fin_b))
        y = jnp.dot(out_w[...], y.astype(mxu_dtype),
                    preferred_element_type=jnp.float32) + out_b[...]

        # -------- lane-dense output: (nc_in, N*H*W) channels-first slab ----------
        o_ref[...] = y.astype(o_ref.dtype)

    return kernel


# ----------------------------------------------------------------------------
# Module wrapper with deterministic parameter construction.
# ----------------------------------------------------------------------------
class IITPallas:
    def __init__(self, imsize=16, smallest_imsize=4, nc_base=8, nc_max=32,
                 nc_in=3, seed=0):
        assert imsize & (imsize - 1) == 0 and smallest_imsize & (smallest_imsize - 1) == 0
        self.imsize = imsize
        self.nc_in = nc_in
        self.cin_pad = max(_SUBLANE, ((nc_in + _SUBLANE - 1) // _SUBLANE) * _SUBLANE)
        n = log2_diff(imsize, smallest_imsize)
        nc = [min(nc_max, nc_base * 2 ** i) for i in range(n + 1)]
        self.n_down_up = n
        self.nc = nc

        key = jax.random.PRNGKey(seed)
        cnt = [0]

        def nk():
            cnt[0] += 1
            return jax.random.fold_in(key, cnt[0])

        def he(k, kh, kw, cin, cout):
            fan = kh * kw * cin
            return jax.random.normal(k, (kh, kw, cin, cout), jnp.float32) * math.sqrt(2.0 / fan)

        def mxu_layout(w):
            # (3,3,cin,cout) -> (cout, 9*cin) bf16, tap-major / channel-minor,
            # matching the in-kernel cols ordering (di, dj, c).
            kh, kw, cin, cout = w.shape
            return jnp.transpose(w, (3, 0, 1, 2)).reshape(cout, kh * kw * cin).astype(_MXU_DTYPE)

        def merged_w(k3, k1, cin, cout):
            # [3x3 main conv | 1x1 skip embedded at the center tap].
            w3 = he(k3, 3, 3, cin, cout)
            w1 = he(k1, 1, 1, cin, cout)
            m = jnp.zeros((3, 3, cin, 2 * cout), jnp.float32)
            m = m.at[:, :, :, :cout].set(w3)
            m = m.at[1, 1, :, cout:].set(w1[0, 0])
            return mxu_layout(m)

        # stem: ConvBlock(nc_in, nc0, norm='none'): conv + bias + Mish.
        # Input channels are zero-padded to cin_pad; weight columns for padded
        # channels are zero (He fan uses the true nc_in).
        w_stem = he(nk(), 3, 3, nc_in, nc[0])
        w_stem = jnp.zeros((3, 3, self.cin_pad, nc[0]), jnp.float32).at[:, :, :nc_in, :].set(w_stem)
        self.stem_w = mxu_layout(w_stem)
        self.stem_b = jnp.zeros((nc[0], 1), jnp.float32)

        # encoder down blocks (conv biases feeding BN dropped: exactly cancelled)
        self.enc = []
        for i in range(n):
            cin, cout = nc[i], nc[i + 1]
            self.enc.append(dict(
                w1=merged_w(nk(), nk(), cin, cout),
                skip_b=jnp.zeros((cout, 1), jnp.float32),
                g1=jnp.ones((cout, 1), jnp.float32),
                b1=jnp.zeros((cout, 1), jnp.float32),
                w2=mxu_layout(he(nk(), 3, 3, cout, cout)),
                g2=jnp.ones((cout, 1), jnp.float32),
                b2=jnp.zeros((cout, 1), jnp.float32),
            ))

        # decoder up blocks, deepest first
        self.dec = []
        for i in reversed(range(n)):
            cin, cout = nc[i + 1], nc[i]
            self.dec.append(dict(
                w1=merged_w(nk(), nk(), cin, cout),
                skip_b=jnp.zeros((cout, 1), jnp.float32),
                g1=jnp.ones((cout, 1), jnp.float32),
                b1=jnp.zeros((cout, 1), jnp.float32),
            ))

        # final: ConvBlock(nc0, nc0) + 1x1 Conv2d(nc0, nc_in)
        self.final_w = mxu_layout(he(nk(), 3, 3, nc[0], nc[0]))
        self.final_g = jnp.ones((nc[0], 1), jnp.float32)
        self.final_b = jnp.zeros((nc[0], 1), jnp.float32)
        self.out_w = jnp.transpose(he(nk(), 1, 1, nc[0], nc_in)[0, 0]).astype(_MXU_DTYPE)
        self.out_b = jnp.zeros((nc_in, 1), jnp.float32)

        self._resample_cache = {}

    def _resample_mats(self, N):
        if N not in self._resample_cache:
            n = self.n_down_up
            pools = [_pool_matrix_t(N, self.imsize >> i, self.imsize >> i, _MXU_DTYPE)
                     for i in range(n)]
            ups = [_upsample_matrix_t(N, self.imsize >> (n - j), self.imsize >> (n - j),
                                      _MXU_DTYPE) for j in range(n)]
            self._resample_cache[N] = (pools, ups)
        return self._resample_cache[N]

    def __call__(self, x_nchw):
        N, C, h, w = x_nchw.shape
        assert h == w and C == self.nc_in
        x = x_nchw.astype(jnp.float32)
        if h != self.imsize:
            # TODO(synk): resize_imgs uses F.interpolate; the bilinear resize (and
            # the reference's resize-back *before* the final head) stay outside the
            # fused kernel — not exercised at h == imsize.
            x = jax.image.resize(x, (N, C, self.imsize, self.imsize), method="bilinear")
        H = self.imsize
        M = N * H * H

        # channels-first lane-dense slab (C on sublanes, N*H*W on lanes),
        # channel-padded to the f32 sublane tile so every in-kernel sublane
        # concat / slice is tile-aligned.  These wrapper ops are a few KB.
        x_slab = jnp.transpose(x, (1, 0, 2, 3)).reshape(C, M)
        if self.cin_pad > C:
            x_slab = jnp.concatenate(
                [x_slab, jnp.zeros((self.cin_pad - C, M), jnp.float32)], axis=0)

        pools, ups = self._resample_mats(N)
        args = [x_slab]
        args += pools
        args += ups
        args += [self.stem_w, self.stem_b]
        for blk in self.enc:
            args += [blk["w1"], blk["skip_b"], blk["g1"], blk["b1"],
                     blk["w2"], blk["g2"], blk["b2"]]
        for blk in self.dec:
            args += [blk["w1"], blk["skip_b"], blk["g1"], blk["b1"]]
        args += [self.final_w, self.final_g, self.final_b, self.out_w, self.out_b]

        kernel = _make_iit_kernel(self.imsize, tuple(self.nc), self.n_down_up, _MXU_DTYPE)
        # Whole network in one gridless pallas_call; all operands and
        # intermediates stay VMEM-resident (< ~2 MB at this configuration).
        out = pl.pallas_call(
            kernel,
            out_shape=jax.ShapeDtypeStruct((self.nc_in, M), jnp.float32),
            in_specs=[pl.BlockSpec(memory_space=pltpu.MemorySpace.VMEM)] * len(args),
            out_specs=pl.BlockSpec(memory_space=pltpu.MemorySpace.VMEM),
            compiler_params=pltpu.CompilerParams(vmem_limit_bytes=32 * 1024 * 1024),
        )(*args)

        out = out.reshape(self.nc_in, N, H, H).transpose(1, 0, 2, 3)   # tiny NCHW fixup
        if h != self.imsize:
            out = jax.image.resize(out, (N, self.nc_in, h, w), method="bilinear")
        return out


if __name__ == "__main__":
    key = jax.random.PRNGKey(0)
    x = jax.random.normal(key, (2, 3, 16, 16), jnp.float32)  # NCHW like the PyTorch module

    model = IITPallas(imsize=16, smallest_imsize=4, nc_base=8, nc_max=32, nc_in=3, seed=0)
    fwd = jax.jit(model.__call__)

    out = fwd(x)
    jax.block_until_ready(out)
    assert out.shape == (2, 3, 16, 16), out.shape
    assert bool(jnp.all(jnp.isfinite(out)))
    print("KERNEL_OK")
</pallas_src>

<mosaic_0001>
module attributes {stable_mosaic.version = 11 : i64} {
  func.func @kernel(%arg0: memref<8x512xf32, #tpu.memory_space<vmem>>, %arg1: memref<512x128xbf16, #tpu.memory_space<vmem>>, %arg2: memref<128x32xbf16, #tpu.memory_space<vmem>>, %arg3: memref<32x128xbf16, #tpu.memory_space<vmem>>, %arg4: memref<128x512xbf16, #tpu.memory_space<vmem>>, %arg5: memref<8x72xbf16, #tpu.memory_space<vmem>>, %arg6: memref<8x1xf32, #tpu.memory_space<vmem>>, %arg7: memref<32x72xbf16, #tpu.memory_space<vmem>>, %arg8: memref<16x1xf32, #tpu.memory_space<vmem>>, %arg9: memref<16x1xf32, #tpu.memory_space<vmem>>, %arg10: memref<16x1xf32, #tpu.memory_space<vmem>>, %arg11: memref<16x144xbf16, #tpu.memory_space<vmem>>, %arg12: memref<16x1xf32, #tpu.memory_space<vmem>>, %arg13: memref<16x1xf32, #tpu.memory_space<vmem>>, %arg14: memref<64x144xbf16, #tpu.memory_space<vmem>>, %arg15: memref<32x1xf32, #tpu.memory_space<vmem>>, %arg16: memref<32x1xf32, #tpu.memory_space<vmem>>, %arg17: memref<32x1xf32, #tpu.memory_space<vmem>>, %arg18: memref<32x288xbf16, #tpu.memory_space<vmem>>, %arg19: memref<32x1xf32, #tpu.memory_space<vmem>>, %arg20: memref<32x1xf32, #tpu.memory_space<vmem>>, %arg21: memref<32x288xbf16, #tpu.memory_space<vmem>>, %arg22: memref<16x1xf32, #tpu.memory_space<vmem>>, %arg23: memref<16x1xf32, #tpu.memory_space<vmem>>, %arg24: memref<16x1xf32, #tpu.memory_space<vmem>>, %arg25: memref<16x144xbf16, #tpu.memory_space<vmem>>, %arg26: memref<8x1xf32, #tpu.memory_space<vmem>>, %arg27: memref<8x1xf32, #tpu.memory_space<vmem>>, %arg28: memref<8x1xf32, #tpu.memory_space<vmem>>, %arg29: memref<8x72xbf16, #tpu.memory_space<vmem>>, %arg30: memref<8x1xf32, #tpu.memory_space<vmem>>, %arg31: memref<8x1xf32, #tpu.memory_space<vmem>>, %arg32: memref<3x8xbf16, #tpu.memory_space<vmem>>, %arg33: memref<3x1xf32, #tpu.memory_space<vmem>>, %arg34: memref<3x512xf32, #tpu.memory_space<vmem>>) attributes {dimension_semantics = [], scalar_prefetch = 0 : i64, scratch_operands = 0 : i64, tpu.core_type = #tpu.core_type<tc>} {
    %c0 = arith.constant 0 : index
    %c0_0 = arith.constant 0 : index
    %0 = vector.load %arg0[%c0, %c0_0] : memref<8x512xf32, #tpu.memory_space<vmem>>, vector<8x512xf32>
    %1 = tpu.iota {dimensions = array<i32: 1>} : vector<1x512xi32>
    %c15_i32 = arith.constant 15 : i32
    %2 = vector.broadcast %c15_i32 : i32 to vector<1x512xi32>
    %3 = arith.andi %1, %2 : vector<1x512xi32>
    %c255_i32 = arith.constant 255 : i32
    %4 = vector.broadcast %c255_i32 : i32 to vector<1x512xi32>
    %5 = arith.andi %1, %4 : vector<1x512xi32>
    %c1_i32 = arith.constant 1 : i32
    %6 = vector.broadcast %c1_i32 : i32 to vector<1x512xi32>
    %7 = arith.cmpi sge, %3, %6 : vector<1x512xi32>
    %c15_i32_1 = arith.constant 15 : i32
    %8 = vector.broadcast %c15_i32_1 : i32 to vector<1x512xi32>
    %9 = arith.cmpi slt, %3, %8 : vector<1x512xi32>
    %c16_i32 = arith.constant 16 : i32
    %10 = vector.broadcast %c16_i32 : i32 to vector<1x512xi32>
    %11 = arith.cmpi sge, %5, %10 : vector<1x512xi32>
    %c240_i32 = arith.constant 240 : i32
    %12 = vector.broadcast %c240_i32 : i32 to vector<1x512xi32>
    %13 = arith.cmpi slt, %5, %12 : vector<1x512xi32>
    %14 = arith.andi %11, %7 : vector<1x512xi1>
    %15 = arith.andi %11, %9 : vector<1x512xi1>
    %16 = arith.andi %13, %7 : vector<1x512xi1>
    %17 = arith.andi %13, %9 : vector<1x512xi1>
    %c17_i32 = arith.constant 17 : i32
    %18 = tpu.dynamic_rotate %0 by %c17_i32 dim 1 : vector<8x512xf32>, i32 -> vector<8x512xf32>
    %cst = arith.constant 0.000000e+00 : f32
    %19 = vector.shape_cast %14 : vector<1x512xi1> to vector<1x512xi1>
    %20 = vector.broadcast %19 : vector<1x512xi1> to vector<8x512xi1>
    %21 = vector.broadcast %cst : f32 to vector<8x512xf32>
    %22 = arith.select %20, %18, %21 : vector<8x512xi1>, vector<8x512xf32>
    %c16_i32_2 = arith.constant 16 : i32
    %23 = tpu.dynamic_rotate %0 by %c16_i32_2 dim 1 : vector<8x512xf32>, i32 -> vector<8x512xf32>
    %cst_3 = arith.constant 0.000000e+00 : f32
    %24 = vector.shape_cast %11 : vector<1x512xi1> to vector<1x512xi1>
    %25 = vector.broadcast %24 : vector<1x512xi1> to vector<8x512xi1>
    %26 = vector.broadcast %cst_3 : f32 to vector<8x512xf32>
    %27 = arith.select %25, %23, %26 : vector<8x512xi1>, vector<8x512xf32>
    %c15_i32_4 = arith.constant 15 : i32
    %28 = tpu.dynamic_rotate %0 by %c15_i32_4 dim 1 : vector<8x512xf32>, i32 -> vector<8x512xf32>
    %cst_5 = arith.constant 0.000000e+00 : f32
    %29 = vector.shape_cast %15 : vector<1x512xi1> to vector<1x512xi1>
    %30 = vector.broadcast %29 : vector<1x512xi1> to vector<8x512xi1>
    %31 = vector.broadcast %cst_5 : f32 to vector<8x512xf32>
    %32 = arith.select %30, %28, %31 : vector<8x512xi1>, vector<8x512xf32>
    %c1_i32_6 = arith.constant 1 : i32
    %33 = tpu.dynamic_rotate %0 by %c1_i32_6 dim 1 : vector<8x512xf32>, i32 -> vector<8x512xf32>
    %cst_7 = arith.constant 0.000000e+00 : f32
    %34 = vector.shape_cast %7 : vector<1x512xi1> to vector<1x512xi1>
    %35 = vector.broadcast %34 : vector<1x512xi1> to vector<8x512xi1>
    %36 = vector.broadcast %cst_7 : f32 to vector<8x512xf32>
    %37 = arith.select %35, %33, %36 : vector<8x512xi1>, vector<8x512xf32>
    %c511_i32 = arith.constant 511 : i32
    %38 = tpu.dynamic_rotate %0 by %c511_i32 dim 1 : vector<8x512xf32>, i32 -> vector<8x512xf32>
    %cst_8 = arith.constant 0.000000e+00 : f32
    %39 = vector.shape_cast %9 : vector<1x512xi1> to vector<1x512xi1>
    %40 = vector.broadcast %39 : vector<1x512xi1> to vector<8x512xi1>
    %41 = vector.broadcast %cst_8 : f32 to vector<8x512xf32>
    %42 = arith.select %40, %38, %41 : vector<8x512xi1>, vector<8x512xf32>
    %c497_i32 = arith.constant 497 : i32
    %43 = tpu.dynamic_rotate %0 by %c497_i32 dim 1 : vector<8x512xf32>, i32 -> vector<8x512xf32>
    %cst_9 = arith.constant 0.000000e+00 : f32
    %44 = vector.shape_cast %16 : vector<1x512xi1> to vector<1x512xi1>
    %45 = vector.broadcast %44 : vector<1x512xi1> to vector<8x512xi1>
    %46 = vector.broadcast %cst_9 : f32 to vector<8x512xf32>
    %47 = arith.select %45, %43, %46 : vector<8x512xi1>, vector<8x512xf32>
    %c496_i32 = arith.constant 496 : i32
    %48 = tpu.dynamic_rotate %0 by %c496_i32 dim 1 : vector<8x512xf32>, i32 -> vector<8x512xf32>
    %cst_10 = arith.constant 0.000000e+00 : f32
    %49 = vector.shape_cast %13 : vector<1x512xi1> to vector<1x512xi1>
    %50 = vector.broadcast %49 : vector<1x512xi1> to vector<8x512xi1>
    %51 = vector.broadcast %cst_10 : f32 to vector<8x512xf32>
    %52 = arith.select %50, %48, %51 : vector<8x512xi1>, vector<8x512xf32>
    %c495_i32 = arith.constant 495 : i32
    %53 = tpu.dynamic_rotate %0 by %c495_i32 dim 1 : vector<8x512xf32>, i32 -> vector<8x512xf32>
    %cst_11 = arith.constant 0.000000e+00 : f32
    %54 = vector.shape_cast %17 : vector<1x512xi1> to vector<1x512xi1>
    %55 = vector.broadcast %54 : vector<1x512xi1> to vector<8x512xi1>
    %56 = vector.broadcast %cst_11 : f32 to vector<8x512xf32>
    %57 = arith.select %55, %53, %56 : vector<8x512xi1>, vector<8x512xf32>
    %58 = tpu.concatenate %22, %27, %32, %37, %0, %42, %47, %52, %57 in 0 : vector<8x512xf32>, vector<8x512xf32>, vector<8x512xf32>, vector<8x512xf32>, vector<8x512xf32>, vector<8x512xf32>, vector<8x512xf32>, vector<8x512xf32>, vector<8x512xf32> -> vector<72x512xf32>
    %59 = arith.truncf %58 : vector<72x512xf32> to vector<72x512xbf16>
    %c0_12 = arith.constant 0 : index
    %c0_13 = arith.constant 0 : index
    %60 = vector.load %arg5[%c0_12, %c0_13] : memref<8x72xbf16, #tpu.memory_space<vmem>>, vector<8x72xbf16>
    %cst_14 = arith.constant dense<0.000000e+00> : vector<8x512xf32>
    %61 = tpu.matmul %60, %59, %cst_14 {dimension_numbers = #tpu.dot_dimension_numbers<[1], [0], [0], [1], [0, 0, 1, 1], [], []>} : vector<8x72xbf16>, vector<72x512xbf16>, vector<8x512xf32> -> vector<8x512xf32>
    %c0_15 = arith.constant 0 : index
    %c0_16 = arith.constant 0 : index
    %62 = vector.load %arg6[%c0_15, %c0_16] : memref<8x1xf32, #tpu.memory_space<vmem>>, vector<8x1xf32>
    %63 = vector.broadcast %62 : vector<8x1xf32> to vector<8x512xf32>
    %64 = arith.addf %61, %63 : vector<8x512xf32>
    %cst_17 = arith.constant 2.000000e+01 : f32
    %65 = vector.broadcast %cst_17 : f32 to vector<8x512xf32>
    %66 = arith.minimumf %64, %65 : vector<8x512xf32>
    %67 = math.exp %66 : vector<8x512xf32>
    %cst_18 = arith.constant 1.000000e+00 : f32
    %68 = vector.broadcast %cst_18 : f32 to vector<8x512xf32>
    %69 = arith.addf %68, %67 : vector<8x512xf32>
    %70 = arith.mulf %69, %69 : vector<8x512xf32>
    %cst_19 = arith.constant 1.000000e+00 : f32
    %71 = vector.broadcast %cst_19 : f32 to vector<8x512xf32>
    %72 = arith.subf %70, %71 : vector<8x512xf32>
    %73 = arith.mulf %64, %72 : vector<8x512xf32>
    %cst_20 = arith.constant 1.000000e+00 : f32
    %74 = vector.broadcast %cst_20 : f32 to vector<8x512xf32>
    %75 = arith.addf %70, %74 : vector<8x512xf32>
    %76 = tpu.reciprocal %75 {approx = true} : vector<8x512xf32> -> vector<8x512xf32>
    %77 = arith.mulf %73, %76 : vector<8x512xf32>
    %78 = arith.truncf %77 : vector<8x512xf32> to vector<8x512xbf16>
    %c0_21 = arith.constant 0 : index
    %c0_22 = arith.constant 0 : index
    %79 = vector.load %arg1[%c0_21, %c0_22] : memref<512x128xbf16, #tpu.memory_space<vmem>>, vector<512x128xbf16>
    %cst_23 = arith.constant dense<0.000000e+00> : vector<8x128xf32>
    %80 = tpu.matmul %78, %79, %cst_23 {dimension_numbers = #tpu.dot_dimension_numbers<[1], [0], [0], [1], [0, 0, 1, 1], [], []>} : vector<8x512xbf16>, vector<512x128xbf16>, vector<8x128xf32> -> vector<8x128xf32>
    %81 = tpu.iota {dimensions = array<i32: 1>} : vector<1x128xi32>
    %c7_i32 = arith.constant 7 : i32
    %82 = vector.broadcast %c7_i32 : i32 to vector<1x128xi32>
    %83 = arith.andi %81, %82 : vector<1x128xi32>
    %c63_i32 = arith.constant 63 : i32
    %84 = vector.broadcast %c63_i32 : i32 to vector<1x128xi32>
    %85 = arith.andi %81, %84 : vector<1x128xi32>
    %c1_i32_24 = arith.constant 1 : i32
    %86 = vector.broadcast %c1_i32_24 : i32 to vector<1x128xi32>
    %87 = arith.cmpi sge, %83, %86 : vector<1x128xi32>
    %c7_i32_25 = arith.constant 7 : i32
    %88 = vector.broadcast %c7_i32_25 : i32 to vector<1x128xi32>
    %89 = arith.cmpi slt, %83, %88 : vector<1x128xi32>
    %c8_i32 = arith.constant 8 : i32
    %90 = vector.broadcast %c8_i32 : i32 to vector<1x128xi32>
    %91 = arith.cmpi sge, %85, %90 : vector<1x128xi32>
    %c56_i32 = arith.constant 56 : i32
    %92 = vector.broadcast %c56_i32 : i32 to vector<1x128xi32>
    %93 = arith.cmpi slt, %85, %92 : vector<1x128xi32>
    %94 = arith.andi %91, %87 : vector<1x128xi1>
    %95 = arith.andi %91, %89 : vector<1x128xi1>
    %96 = arith.andi %93, %87 : vector<1x128xi1>
    %97 = arith.andi %93, %89 : vector<1x128xi1>
    %c9_i32 = arith.constant 9 : i32
    %98 = tpu.dynamic_rotate %80 by %c9_i32 dim 1 : vector<8x128xf32>, i32 -> vector<8x128xf32>
    %cst_26 = arith.constant 0.000000e+00 : f32
    %99 = vector.shape_cast %94 : vector<1x128xi1> to vector<1x128xi1>
    %100 = vector.broadcast %99 : vector<1x128xi1> to vector<8x128xi1>
    %101 = vector.broadcast %cst_26 : f32 to vector<8x128xf32>
    %102 = arith.select %100, %98, %101 : vector<8x128xi1>, vector<8x128xf32>
    %c8_i32_27 = arith.constant 8 : i32
    %103 = tpu.dynamic_rotate %80 by %c8_i32_27 dim 1 : vector<8x128xf32>, i32 -> vector<8x128xf32>
    %cst_28 = arith.constant 0.000000e+00 : f32
    %104 = vector.shape_cast %91 : vector<1x128xi1> to vector<1x128xi1>
    %105 = vector.broadcast %104 : vector<1x128xi1> to vector<8x128xi1>
    %106 = vector.broadcast %cst_28 : f32 to vector<8x128xf32>
    %107 = arith.select %105, %103, %106 : vector<8x128xi1>, vector<8x128xf32>
    %c7_i32_29 = arith.constant 7 : i32
    %108 = tpu.dynamic_rotate %80 by %c7_i32_29 dim 1 : vector<8x128xf32>, i32 -> vector<8x128xf32>
    %cst_30 = arith.constant 0.000000e+00 : f32
    %109 = vector.shape_cast %95 : vector<1x128xi1> to vector<1x128xi1>
    %110 = vector.broadcast %109 : vector<1x128xi1> to vector<8x128xi1>
    %111 = vector.broadcast %cst_30 : f32 to vector<8x128xf32>
    %112 = arith.select %110, %108, %111 : vector<8x128xi1>, vector<8x128xf32>
    %c1_i32_31 = arith.constant 1 : i32
    %113 = tpu.dynamic_rotate %80 by %c1_i32_31 dim 1 : vector<8x128xf32>, i32 -> vector<8x128xf32>
    %cst_32 = arith.constant 0.000000e+00 : f32
    %114 = vector.shape_cast %87 : vector<1x128xi1> to vector<1x128xi1>
    %115 = vector.broadcast %114 : vector<1x128xi1> to vector<8x128xi1>
    %116 = vector.broadcast %cst_32 : f32 to vector<8x128xf32>
    %117 = arith.select %115, %113, %116 : vector<8x128xi1>, vector<8x128xf32>
    %c127_i32 = arith.constant 127 : i32
    %118 = tpu.dynamic_rotate %80 by %c127_i32 dim 1 : vector<8x128xf32>, i32 -> vector<8x128xf32>
    %cst_33 = arith.constant 0.000000e+00 : f32
    %119 = vector.shape_cast %89 : vector<1x128xi1> to vector<1x128xi1>
    %120 = vector.broadcast %119 : vector<1x128xi1> to vector<8x128xi1>
    %121 = vector.broadcast %cst_33 : f32 to vector<8x128xf32>
    %122 = arith.select %120, %118, %121 : vector<8x128xi1>, vector<8x128xf32>
    %c121_i32 = arith.constant 121 : i32
    %123 = tpu.dynamic_rotate %80 by %c121_i32 dim 1 : vector<8x128xf32>, i32 -> vector<8x128xf32>
    %cst_34 = arith.constant 0.000000e+00 : f32
    %124 = vector.shape_cast %96 : vector<1x128xi1> to vector<1x128xi1>
    %125 = vector.broadcast %124 : vector<1x128xi1> to vector<8x128xi1>
    %126 = vector.broadcast %cst_34 : f32 to vector<8x128xf32>
    %127 = arith.select %125, %123, %126 : vector<8x128xi1>, vector<8x128xf32>
    %c120_i32 = arith.constant 120 : i32
    %128 = tpu.dynamic_rotate %80 by %c120_i32 dim 1 : vector<8x128xf32>, i32 -> vector<8x128xf32>
    %cst_35 = arith.constant 0.000000e+00 : f32
    %129 = vector.shape_cast %93 : vector<1x128xi1> to vector<1x128xi1>
    %130 = vector.broadcast %129 : vector<1x128xi1> to vector<8x128xi1>
    %131 = vector.broadcast %cst_35 : f32 to vector<8x128xf32>
    %132 = arith.select %130, %128, %131 : vector<8x128xi1>, vector<8x128xf32>
    %c119_i32 = arith.constant 119 : i32
    %133 = tpu.dynamic_rotate %80 by %c119_i32 dim 1 : vector<8x128xf32>, i32 -> vector<8x128xf32>
    %cst_36 = arith.constant 0.000000e+00 : f32
    %134 = vector.shape_cast %97 : vector<1x128xi1> to vector<1x128xi1>
    %135 = vector.broadcast %134 : vector<1x128xi1> to vector<8x128xi1>
    %136 = vector.broadcast %cst_36 : f32 to vector<8x128xf32>
    %137 = arith.select %135, %133, %136 : vector<8x128xi1>, vector<8x128xf32>
    %138 = tpu.concatenate %102, %107, %112, %117, %80, %122, %127, %132, %137 in 0 : vector<8x128xf32>, vector<8x128xf32>, vector<8x128xf32>, vector<8x128xf32>, vector<8x128xf32>, vector<8x128xf32>, vector<8x128xf32>, vector<8x128xf32>, vector<8x128xf32> -> vector<72x128xf32>
    %139 = arith.truncf %138 : vector<72x128xf32> to vector<72x128xbf16>
    %c0_37 = arith.constant 0 : index
    %c0_38 = arith.constant 0 : index
    %140 = vector.load %arg7[%c0_37, %c0_38] : memref<32x72xbf16, #tpu.memory_space<vmem>>, vector<32x72xbf16>
    %cst_39 = arith.constant dense<0.000000e+00> : vector<32x128xf32>
    %141 = tpu.matmul %140, %139, %cst_39 {dimension_numbers = #tpu.dot_dimension_numbers<[1], [0], [0], [1], [0, 0, 1, 1], [], []>} : vector<32x72xbf16>, vector<72x128xbf16>, vector<32x128xf32> -> vector<32x128xf32>
    %142 = vector.extract_strided_slice %141 {offsets = [0, 0], sizes = [16, 128], strides = [1, 1]} : vector<32x128xf32> to vector<16x128xf32>
    %cst_40 = arith.constant dense<0.000000e+00> : vector<16xf32>
    %143 = vector.multi_reduction <add>, %142, %cst_40 [1] : vector<16x128xf32> to vector<16xf32>
    %144 = vector.shape_cast %143 : vector<16xf32> to vector<16x1xf32>
    %cst_41 = arith.constant 7.812500e-03 : f32
    %145 = vector.broadcast %cst_41 : f32 to vector<16x1xf32>
    %146 = arith.mulf %144, %145 : vector<16x1xf32>
    %147 = arith.mulf %142, %142 : vector<16x128xf32>
    %cst_42 = arith.constant dense<0.000000e+00> : vector<16xf32>
    %148 = vector.multi_reduction <add>, %147, %cst_42 [1] : vector<16x128xf32> to vector<16xf32>
    %149 = vector.shape_cast %148 : vector<16xf32> to vector<16x1xf32>
    %cst_43 = arith.constant 7.812500e-03 : f32
    %150 = vector.broadcast %cst_43 : f32 to vector<16x1xf32>
    %151 = arith.mulf %149, %150 : vector<16x1xf32>
    %152 = arith.mulf %146, %146 : vector<16x1xf32>
    %153 = arith.subf %151, %152 : vector<16x1xf32>
    %c0_44 = arith.constant 0 : index
    %c0_45 = arith.constant 0 : index
    %154 = vector.load %arg9[%c0_44, %c0_45] : memref<16x1xf32, #tpu.memory_space<vmem>>, vector<16x1xf32>
    %cst_46 = arith.constant 9.99999974E-6 : f32
    %155 = vector.broadcast %cst_46 : f32 to vector<16x1xf32>
    %156 = arith.addf %153, %155 : vector<16x1xf32>
    %157 = math.rsqrt %156 : vector<16x1xf32>
    %158 = arith.mulf %154, %157 : vector<16x1xf32>
    %c0_47 = arith.constant 0 : index
    %c0_48 = arith.constant 0 : index
    %159 = vector.load %arg10[%c0_47, %c0_48] : memref<16x1xf32, #tpu.memory_space<vmem>>, vector<16x1xf32>
    %160 = arith.mulf %146, %158 : vector<16x1xf32>
    %161 = arith.subf %159, %160 : vector<16x1xf32>
    %162 = vector.broadcast %158 : vector<16x1xf32> to vector<16x128xf32>
    %163 = arith.mulf %142, %162 : vector<16x128xf32>
    %164 = vector.broadcast %161 : vector<16x1xf32> to vector<16x128xf32>
    %165 = arith.addf %163, %164 : vector<16x128xf32>
    %cst_49 = arith.constant 2.000000e+01 : f32
    %166 = vector.broadcast %cst_49 : f32 to vector<16x128xf32>
    %167 = arith.minimumf %165, %166 : vector<16x128xf32>
    %168 = math.exp %167 : vector<16x128xf32>
    %cst_50 = arith.constant 1.000000e+00 : f32
    %169 = vector.broadcast %cst_50 : f32 to vector<16x128xf32>
    %170 = arith.addf %169, %168 : vector<16x128xf32>
    %171 = arith.mulf %170, %170 : vector<16x128xf32>
    %cst_51 = arith.constant 1.000000e+00 : f32
    %172 = vector.broadcast %cst_51 : f32 to vector<16x128xf32>
    %173 = arith.subf %171, %172 : vector<16x128xf32>
    %174 = arith.mulf %165, %173 : vector<16x128xf32>
    %cst_52 = arith.constant 1.000000e+00 : f32
    %175 = vector.broadcast %cst_52 : f32 to vector<16x128xf32>
    %176 = arith.addf %171, %175 : vector<16x128xf32>
    %177 = tpu.reciprocal %176 {approx = true} : vector<16x128xf32> -> vector<16x128xf32>
    %178 = arith.mulf %174, %177 : vector<16x128xf32>
    %179 = vector.extract_strided_slice %141 {offsets = [16, 0], sizes = [16, 128], strides = [1, 1]} : vector<32x128xf32> to vector<16x128xf32>
    %c0_53 = arith.constant 0 : index
    %c0_54 = arith.constant 0 : index
    %180 = vector.load %arg8[%c0_53, %c0_54] : memref<16x1xf32, #tpu.memory_space<vmem>>, vector<16x1xf32>
    %181 = vector.broadcast %180 : vector<16x1xf32> to vector<16x128xf32>
    %182 = arith.addf %179, %181 : vector<16x128xf32>
    %c9_i32_55 = arith.constant 9 : i32
    %183 = tpu.dynamic_rotate %178 by %c9_i32_55 dim 1 : vector<16x128xf32>, i32 -> vector<16x128xf32>
    %cst_56 = arith.constant 0.000000e+00 : f32
    %184 = vector.shape_cast %94 : vector<1x128xi1> to vector<1x128xi1>
    %185 = vector.broadcast %184 : vector<1x128xi1> to vector<16x128xi1>
    %186 = vector.broadcast %cst_56 : f32 to vector<16x128xf32>
    %187 = arith.select %185, %183, %186 : vector<16x128xi1>, vector<16x128xf32>
    %c8_i32_57 = arith.constant 8 : i32
    %188 = tpu.dynamic_rotate %178 by %c8_i32_57 dim 1 : vector<16x128xf32>, i32 -> vector<16x128xf32>
    %cst_58 = arith.constant 0.000000e+00 : f32
    %189 = vector.shape_cast %91 : vector<1x128xi1> to vector<1x128xi1>
    %190 = vector.broadcast %189 : vector<1x128xi1> to vector<16x128xi1>
    %191 = vector.broadcast %cst_58 : f32 to vector<16x128xf32>
    %192 = arith.select %190, %188, %191 : vector<16x128xi1>, vector<16x128xf32>
    %c7_i32_59 = arith.constant 7 : i32
    %193 = tpu.dynamic_rotate %178 by %c7_i32_59 dim 1 : vector<16x128xf32>, i32 -> vector<16x128xf32>
    %cst_60 = arith.constant 0.000000e+00 : f32
    %194 = vector.shape_cast %95 : vector<1x128xi1> to vector<1x128xi1>
    %195 = vector.broadcast %194 : vector<1x128xi1> to vector<16x128xi1>
    %196 = vector.broadcast %cst_60 : f32 to vector<16x128xf32>
    %197 = arith.select %195, %193, %196 : vector<16x128xi1>, vector<16x128xf32>
    %c1_i32_61 = arith.constant 1 : i32
    %198 = tpu.dynamic_rotate %178 by %c1_i32_61 dim 1 : vector<16x128xf32>, i32 -> vector<16x128xf32>
    %cst_62 = arith.constant 0.000000e+00 : f32
    %199 = vector.shape_cast %87 : vector<1x128xi1> to vector<1x128xi1>
    %200 = vector.broadcast %199 : vector<1x128xi1> to vector<16x128xi1>
    %201 = vector.broadcast %cst_62 : f32 to vector<16x128xf32>
    %202 = arith.select %200, %198, %201 : vector<16x128xi1>, vector<16x128xf32>
    %c127_i32_63 = arith.constant 127 : i32
    %203 = tpu.dynamic_rotate %178 by %c127_i32_63 dim 1 : vector<16x128xf32>, i32 -> vector<16x128xf32>
    %cst_64 = arith.constant 0.000000e+00 : f32
    %204 = vector.shape_cast %89 : vector<1x128xi1> to vector<1x128xi1>
    %205 = vector.broadcast %204 : vector<1x128xi1> to vector<16x128xi1>
    %206 = vector.broadcast %cst_64 : f32 to vector<16x128xf32>
    %207 = arith.select %205, %203, %206 : vector<16x128xi1>, vector<16x128xf32>
    %c121_i32_65 = arith.constant 121 : i32
    %208 = tpu.dynamic_rotate %178 by %c121_i32_65 dim 1 : vector<16x128xf32>, i32 -> vector<16x128xf32>
    %cst_66 = arith.constant 0.000000e+00 : f32
    %209 = vector.shape_cast %96 : vector<1x128xi1> to vector<1x128xi1>
    %210 = vector.broadcast %209 : vector<1x128xi1> to vector<16x128xi1>
    %211 = vector.broadcast %cst_66 : f32 to vector<16x128xf32>
    %212 = arith.select %210, %208, %211 : vector<16x128xi1>, vector<16x128xf32>
    %c120_i32_67 = arith.constant 120 : i32
    %213 = tpu.dynamic_rotate %178 by %c120_i32_67 dim 1 : vector<16x128xf32>, i32 -> vector<16x128xf32>
    %cst_68 = arith.constant 0.000000e+00 : f32
    %214 = vector.shape_cast %93 : vector<1x128xi1> to vector<1x128xi1>
    %215 = vector.broadcast %214 : vector<1x128xi1> to vector<16x128xi1>
    %216 = vector.broadcast %cst_68 : f32 to vector<16x128xf32>
    %217 = arith.select %215, %213, %216 : vector<16x128xi1>, vector<16x128xf32>
    %c119_i32_69 = arith.constant 119 : i32
    %218 = tpu.dynamic_rotate %178 by %c119_i32_69 dim 1 : vector<16x128xf32>, i32 -> vector<16x128xf32>
    %cst_70 = arith.constant 0.000000e+00 : f32
    %219 = vector.shape_cast %97 : vector<1x128xi1> to vector<1x128xi1>
    %220 = vector.broadcast %219 : vector<1x128xi1> to vector<16x128xi1>
    %221 = vector.broadcast %cst_70 : f32 to vector<16x128xf32>
    %222 = arith.select %220, %218, %221 : vector<16x128xi1>, vector<16x128xf32>
    %223 = tpu.concatenate %187, %192, %197, %202, %178, %207, %212, %217, %222 in 0 : vector<16x128xf32>, vector<16x128xf32>, vector<16x128xf32>, vector<16x128xf32>, vector<16x128xf32>, vector<16x128xf32>, vector<16x128xf32>, vector<16x128xf32>, vector<16x128xf32> -> vector<144x128xf32>
    %224 = arith.truncf %223 : vector<144x128xf32> to vector<144x128xbf16>
    %c0_71 = arith.constant 0 : index
    %c0_72 = arith.constant 0 : index
    %225 = vector.load %arg11[%c0_71, %c0_72] : memref<16x144xbf16, #tpu.memory_space<vmem>>, vector<16x144xbf16>
    %cst_73 = arith.constant dense<0.000000e+00> : vector<16x128xf32>
    %226 = tpu.matmul %225, %224, %cst_73 {dimension_numbers = #tpu.dot_dimension_numbers<[1], [0], [0], [1], [0, 0, 1, 1], [], []>} : vector<16x144xbf16>, vector<144x128xbf16>, vector<16x128xf32> -> vector<16x128xf32>
    %cst_74 = arith.constant dense<0.000000e+00> : vector<16xf32>
    %227 = vector.multi_reduction <add>, %226, %cst_74 [1] : vector<16x128xf32> to vector<16xf32>
    %228 = vector.shape_cast %227 : vector<16xf32> to vector<16x1xf32>
    %cst_75 = arith.constant 7.812500e-03 : f32
    %229 = vector.broadcast %cst_75 : f32 to vector<16x1xf32>
    %230 = arith.mulf %228, %229 : vector<16x1xf32>
    %231 = arith.mulf %226, %226 : vector<16x128xf32>
    %cst_76 = arith.constant dense<0.000000e+00> : vector<16xf32>
    %232 = vector.multi_reduction <add>, %231, %cst_76 [1] : vector<16x128xf32> to vector<16xf32>
    %233 = vector.shape_cast %232 : vector<16xf32> to vector<16x1xf32>
    %cst_77 = arith.constant 7.812500e-03 : f32
    %234 = vector.broadcast %cst_77 : f32 to vector<16x1xf32>
    %235 = arith.mulf %233, %234 : vector<16x1xf32>
    %236 = arith.mulf %230, %230 : vector<16x1xf32>
    %237 = arith.subf %235, %236 : vector<16x1xf32>
    %c0_78 = arith.constant 0 : index
    %c0_79 = arith.constant 0 : index
    %238 = vector.load %arg12[%c0_78, %c0_79] : memref<16x1xf32, #tpu.memory_space<vmem>>, vector<16x1xf32>
    %cst_80 = arith.constant 9.99999974E-6 : f32
    %239 = vector.broadcast %cst_80 : f32 to vector<16x1xf32>
    %240 = arith.addf %237, %239 : vector<16x1xf32>
    %241 = math.rsqrt %240 : vector<16x1xf32>
    %242 = arith.mulf %238, %241 : vector<16x1xf32>
    %c0_81 = arith.constant 0 : index
    %c0_82 = arith.constant 0 : index
    %243 = vector.load %arg13[%c0_81, %c0_82] : memref<16x1xf32, #tpu.memory_space<vmem>>, vector<16x1xf32>
    %244 = arith.mulf %230, %242 : vector<16x1xf32>
    %245 = arith.subf %243, %244 : vector<16x1xf32>
    %246 = vector.broadcast %242 : vector<16x1xf32> to vector<16x128xf32>
    %247 = arith.mulf %226, %246 : vector<16x128xf32>
    %248 = vector.broadcast %245 : vector<16x1xf32> to vector<16x128xf32>
    %249 = arith.addf %247, %248 : vector<16x128xf32>
    %cst_83 = arith.constant 2.000000e+01 : f32
    %250 = vector.broadcast %cst_83 : f32 to vector<16x128xf32>
    %251 = arith.minimumf %249, %250 : vector<16x128xf32>
    %252 = math.exp %251 : vector<16x128xf32>
    %cst_84 = arith.constant 1.000000e+00 : f32
    %253 = vector.broadcast %cst_84 : f32 to vector<16x128xf32>
    %254 = arith.addf %253, %252 : vector<16x128xf32>
    %255 = arith.mulf %254, %254 : vector<16x128xf32>
    %cst_85 = arith.constant 1.000000e+00 : f32
    %256 = vector.broadcast %cst_85 : f32 to vector<16x128xf32>
    %257 = arith.subf %255, %256 : vector<16x128xf32>
    %258 = arith.mulf %249, %257 : vector<16x128xf32>
    %cst_86 = arith.constant 1.000000e+00 : f32
    %259 = vector.broadcast %cst_86 : f32 to vector<16x128xf32>
    %260 = arith.addf %255, %259 : vector<16x128xf32>
    %261 = tpu.reciprocal %260 {approx = true} : vector<16x128xf32> -> vector<16x128xf32>
    %262 = arith.mulf %258, %261 : vector<16x128xf32>
    %263 = arith.addf %262, %182 : vector<16x128xf32>
    %264 = arith.truncf %263 : vector<16x128xf32> to vector<16x128xbf16>
    %c0_87 = arith.constant 0 : index
    %c0_88 = arith.constant 0 : index
    %265 = vector.load %arg2[%c0_87, %c0_88] : memref<128x32xbf16, #tpu.memory_space<vmem>>, vector<128x32xbf16>
    %cst_89 = arith.constant dense<0.000000e+00> : vector<16x32xf32>
    %266 = tpu.matmul %264, %265, %cst_89 {dimension_numbers = #tpu.dot_dimension_numbers<[1], [0], [0], [1], [0, 0, 1, 1], [], []>} : vector<16x128xbf16>, vector<128x32xbf16>, vector<16x32xf32> -> vector<16x32xf32>
    %267 = tpu.iota {dimensions = array<i32: 1>} : vector<1x32xi32>
    %c3_i32 = arith.constant 3 : i32
    %268 = vector.broadcast %c3_i32 : i32 to vector<1x32xi32>
    %269 = arith.andi %267, %268 : vector<1x32xi32>
    %c15_i32_90 = arith.constant 15 : i32
    %270 = vector.broadcast %c15_i32_90 : i32 to vector<1x32xi32>
    %271 = arith.andi %267, %270 : vector<1x32xi32>
    %c1_i32_91 = arith.constant 1 : i32
    %272 = vector.broadcast %c1_i32_91 : i32 to vector<1x32xi32>
    %273 = arith.cmpi sge, %269, %272 : vector<1x32xi32>
    %c3_i32_92 = arith.constant 3 : i32
    %274 = vector.broadcast %c3_i32_92 : i32 to vector<1x32xi32>
    %275 = arith.cmpi slt, %269, %274 : vector<1x32xi32>
    %c4_i32 = arith.constant 4 : i32
    %276 = vector.broadcast %c4_i32 : i32 to vector<1x32xi32>
    %277 = arith.cmpi sge, %271, %276 : vector<1x32xi32>
    %c12_i32 = arith.constant 12 : i32
    %278 = vector.broadcast %c12_i32 : i32 to vector<1x32xi32>
    %279 = arith.cmpi slt, %271, %278 : vector<1x32xi32>
    %280 = arith.andi %277, %273 : vector<1x32xi1>
    %281 = arith.andi %277, %275 : vector<1x32xi1>
    %282 = arith.andi %279, %273 : vector<1x32xi1>
    %283 = arith.andi %279, %275 : vector<1x32xi1>
    %284 = tpu.iota {dimensions = array<i32: 0>} : vector<32x32xi32>
    %285 = tpu.iota {dimensions = array<i32: 1>} : vector<32x32xi32>
    %c27_i32 = arith.constant 27 : i32
    %286 = vector.broadcast %c27_i32 : i32 to vector<32x32xi32>
    %287 = arith.addi %285, %286 : vector<32x32xi32>
    %c31_i32 = arith.constant 31 : i32
    %288 = vector.broadcast %c31_i32 : i32 to vector<32x32xi32>
    %289 = arith.andi %287, %288 : vector<32x32xi32>
    %290 = arith.cmpi eq, %289, %284 : vector<32x32xi32>
    %291 = arith.extui %290 : vector<32x32xi1> to vector<32x32xi32>
    %292 = arith.sitofp %291 : vector<32x32xi32> to vector<32x32xf32>
    %293 = arith.truncf %292 : vector<32x32xf32> to vector<32x32xbf16>
    %294 = arith.truncf %266 : vector<16x32xf32> to vector<16x32xbf16>
    %cst_93 = arith.constant dense<0.000000e+00> : vector<16x32xf32>
    %295 = tpu.matmul %294, %293, %cst_93 {dimension_numbers = #tpu.dot_dimension_numbers<[1], [0], [0], [1], [0, 0, 1, 1], [], []>} : vector<16x32xbf16>, vector<32x32xbf16>, vector<16x32xf32> -> vector<16x32xf32>
    %cst_94 = arith.constant 0.000000e+00 : f32
    %296 = vector.shape_cast %280 : vector<1x32xi1> to vector<1x32xi1>
    %297 = vector.broadcast %296 : vector<1x32xi1> to vector<16x32xi1>
    %298 = vector.broadcast %cst_94 : f32 to vector<16x32xf32>
    %299 = arith.select %297, %295, %298 : vector<16x32xi1>, vector<16x32xf32>
    %300 = tpu.iota {dimensions = array<i32: 0>} : vector<32x32xi32>
    %301 = tpu.iota {dimensions = array<i32: 1>} : vector<32x32xi32>
    %c28_i32 = arith.constant 28 : i32
    %302 = vector.broadcast %c28_i32 : i32 to vector<32x32xi32>
    %303 = arith.addi %301, %302 : vector<32x32xi32>
    %c31_i32_95 = arith.constant 31 : i32
    %304 = vector.broadcast %c31_i32_95 : i32 to vector<32x32xi32>
    %305 = arith.andi %303, %304 : vector<32x32xi32>
    %306 = arith.cmpi eq, %305, %300 : vector<32x32xi32>
    %307 = arith.extui %306 : vector<32x32xi1> to vector<32x32xi32>
    %308 = arith.sitofp %307 : vector<32x32xi32> to vector<32x32xf32>
    %309 = arith.truncf %308 : vector<32x32xf32> to vector<32x32xbf16>
    %310 = arith.truncf %266 : vector<16x32xf32> to vector<16x32xbf16>
    %cst_96 = arith.constant dense<0.000000e+00> : vector<16x32xf32>
    %311 = tpu.matmul %310, %309, %cst_96 {dimension_numbers = #tpu.dot_dimension_numbers<[1], [0], [0], [1], [0, 0, 1, 1], [], []>} : vector<16x32xbf16>, vector<32x32xbf16>, vector<16x32xf32> -> vector<16x32xf32>
    %cst_97 = arith.constant 0.000000e+00 : f32
    %312 = vector.shape_cast %277 : vector<1x32xi1> to vector<1x32xi1>
    %313 = vector.broadcast %312 : vector<1x32xi1> to vector<16x32xi1>
    %314 = vector.broadcast %cst_97 : f32 to vector<16x32xf32>
    %315 = arith.select %313, %311, %314 : vector<16x32xi1>, vector<16x32xf32>
    %316 = tpu.iota {dimensions = array<i32: 0>} : vector<32x32xi32>
    %317 = tpu.iota {dimensions = array<i32: 1>} : vector<32x32xi32>
    %c29_i32 = arith.constant 29 : i32
    %318 = vector.broadcast %c29_i32 : i32 to vector<32x32xi32>
    %319 = arith.addi %317, %318 : vector<32x32xi32>
    %c31_i32_98 = arith.constant 31 : i32
    %320 = vector.broadcast %c31_i32_98 : i32 to vector<32x32xi32>
    %321 = arith.andi %319, %320 : vector<32x32xi32>
    %322 = arith.cmpi eq, %321, %316 : vector<32x32xi32>
    %323 = arith.extui %322 : vector<32x32xi1> to vector<32x32xi32>
    %324 = arith.sitofp %323 : vector<32x32xi32> to vector<32x32xf32>
    %325 = arith.truncf %324 : vector<32x32xf32> to vector<32x32xbf16>
    %326 = arith.truncf %266 : vector<16x32xf32> to vector<16x32xbf16>
    %cst_99 = arith.constant dense<0.000000e+00> : vector<16x32xf32>
    %327 = tpu.matmul %326, %325, %cst_99 {dimension_numbers = #tpu.dot_dimension_numbers<[1], [0], [0], [1], [0, 0, 1, 1], [], []>} : vector<16x32xbf16>, vector<32x32xbf16>, vector<16x32xf32> -> vector<16x32xf32>
    %cst_100 = arith.constant 0.000000e+00 : f32
    %328 = vector.shape_cast %281 : vector<1x32xi1> to vector<1x32xi1>
    %329 = vector.broadcast %328 : vector<1x32xi1> to vector<16x32xi1>
    %330 = vector.broadcast %cst_100 : f32 to vector<16x32xf32>
    %331 = arith.select %329, %327, %330 : vector<16x32xi1>, vector<16x32xf32>
    %332 = tpu.iota {dimensions = array<i32: 0>} : vector<32x32xi32>
    %333 = tpu.iota {dimensions = array<i32: 1>} : vector<32x32xi32>
    %c31_i32_101 = arith.constant 31 : i32
    %334 = vector.broadcast %c31_i32_101 : i32 to vector<32x32xi32>
    %335 = arith.addi %333, %334 : vector<32x32xi32>
    %c31_i32_102 = arith.constant 31 : i32
    %336 = vector.broadcast %c31_i32_102 : i32 to vector<32x32xi32>
    %337 = arith.andi %335, %336 : vector<32x32xi32>
    %338 = arith.cmpi eq, %337, %332 : vector<32x32xi32>
    %339 = arith.extui %338 : vector<32x32xi1> to vector<32x32xi32>
    %340 = arith.sitofp %339 : vector<32x32xi32> to vector<32x32xf32>
    %341 = arith.truncf %340 : vector<32x32xf32> to vector<32x32xbf16>
    %342 = arith.truncf %266 : vector<16x32xf32> to vector<16x32xbf16>
    %cst_103 = arith.constant dense<0.000000e+00> : vector<16x32xf32>
    %343 = tpu.matmul %342, %341, %cst_103 {dimension_numbers = #tpu.dot_dimension_numbers<[1], [0], [0], [1], [0, 0, 1, 1], [], []>} : vector<16x32xbf16>, vector<32x32xbf16>, vector<16x32xf32> -> vector<16x32xf32>
    %cst_104 = arith.constant 0.000000e+00 : f32
    %344 = vector.shape_cast %273 : vector<1x32xi1> to vector<1x32xi1>
    %345 = vector.broadcast %344 : vector<1x32xi1> to vector<16x32xi1>
    %346 = vector.broadcast %cst_104 : f32 to vector<16x32xf32>
    %347 = arith.select %345, %343, %346 : vector<16x32xi1>, vector<16x32xf32>
    %348 = tpu.iota {dimensions = array<i32: 0>} : vector<32x32xi32>
    %349 = tpu.iota {dimensions = array<i32: 1>} : vector<32x32xi32>
    %c1_i32_105 = arith.constant 1 : i32
    %350 = vector.broadcast %c1_i32_105 : i32 to vector<32x32xi32>
    %351 = arith.addi %349, %350 : vector<32x32xi32>
    %c31_i32_106 = arith.constant 31 : i32
    %352 = vector.broadcast %c31_i32_106 : i32 to vector<32x32xi32>
    %353 = arith.andi %351, %352 : vector<32x32xi32>
    %354 = arith.cmpi eq, %353, %348 : vector<32x32xi32>
    %355 = arith.extui %354 : vector<32x32xi1> to vector<32x32xi32>
    %356 = arith.sitofp %355 : vector<32x32xi32> to vector<32x32xf32>
    %357 = arith.truncf %356 : vector<32x32xf32> to vector<32x32xbf16>
    %358 = arith.truncf %266 : vector<16x32xf32> to vector<16x32xbf16>
    %cst_107 = arith.constant dense<0.000000e+00> : vector<16x32xf32>
    %359 = tpu.matmul %358, %357, %cst_107 {dimension_numbers = #tpu.dot_dimension_numbers<[1], [0], [0], [1], [0, 0, 1, 1], [], []>} : vector<16x32xbf16>, vector<32x32xbf16>, vector<16x32xf32> -> vector<16x32xf32>
    %cst_108 = arith.constant 0.000000e+00 : f32
    %360 = vector.shape_cast %275 : vector<1x32xi1> to vector<1x32xi1>
    %361 = vector.broadcast %360 : vector<1x32xi1> to vector<16x32xi1>
    %362 = vector.broadcast %cst_108 : f32 to vector<16x32xf32>
    %363 = arith.select %361, %359, %362 : vector<16x32xi1>, vector<16x32xf32>
    %364 = tpu.iota {dimensions = array<i32: 0>} : vector<32x32xi32>
    %365 = tpu.iota {dimensions = array<i32: 1>} : vector<32x32xi32>
    %c3_i32_109 = arith.constant 3 : i32
    %366 = vector.broadcast %c3_i32_109 : i32 to vector<32x32xi32>
    %367 = arith.addi %365, %366 : vector<32x32xi32>
    %c31_i32_110 = arith.constant 31 : i32
    %368 = vector.broadcast %c31_i32_110 : i32 to vector<32x32xi32>
    %369 = arith.andi %367, %368 : vector<32x32xi32>
    %370 = arith.cmpi eq, %369, %364 : vector<32x32xi32>
    %371 = arith.extui %370 : vector<32x32xi1> to vector<32x32xi32>
    %372 = arith.sitofp %371 : vector<32x32xi32> to vector<32x32xf32>
    %373 = arith.truncf %372 : vector<32x32xf32> to vector<32x32xbf16>
    %374 = arith.truncf %266 : vector<16x32xf32> to vector<16x32xbf16>
    %cst_111 = arith.constant dense<0.000000e+00> : vector<16x32xf32>
    %375 = tpu.matmul %374, %373, %cst_111 {dimension_numbers = #tpu.dot_dimension_numbers<[1], [0], [0], [1], [0, 0, 1, 1], [], []>} : vector<16x32xbf16>, vector<32x32xbf16>, vector<16x32xf32> -> vector<16x32xf32>
    %cst_112 = arith.constant 0.000000e+00 : f32
    %376 = vector.shape_cast %282 : vector<1x32xi1> to vector<1x32xi1>
    %377 = vector.broadcast %376 : vector<1x32xi1> to vector<16x32xi1>
    %378 = vector.broadcast %cst_112 : f32 to vector<16x32xf32>
    %379 = arith.select %377, %375, %378 : vector<16x32xi1>, vector<16x32xf32>
    %380 = tpu.iota {dimensions = array<i32: 0>} : vector<32x32xi32>
    %381 = tpu.iota {dimensions = array<i32: 1>} : vector<32x32xi32>
    %c4_i32_113 = arith.constant 4 : i32
    %382 = vector.broadcast %c4_i32_113 : i32 to vector<32x32xi32>
    %383 = arith.addi %381, %382 : vector<32x32xi32>
    %c31_i32_114 = arith.constant 31 : i32
    %384 = vector.broadcast %c31_i32_114 : i32 to vector<32x32xi32>
    %385 = arith.andi %383, %384 : vector<32x32xi32>
    %386 = arith.cmpi eq, %385, %380 : vector<32x32xi32>
    %387 = arith.extui %386 : vector<32x32xi1> to vector<32x32xi32>
    %388 = arith.sitofp %387 : vector<32x32xi32> to vector<32x32xf32>
    %389 = arith.truncf %388 : vector<32x32xf32> to vector<32x32xbf16>
    %390 = arith.truncf %266 : vector<16x32xf32> to vector<16x32xbf16>
    %cst_115 = arith.constant dense<0.000000e+00> : vector<16x32xf32>
    %391 = tpu.matmul %390, %389, %cst_115 {dimension_numbers = #tpu.dot_dimension_numbers<[1], [0], [0], [1], [0, 0, 1, 1], [], []>} : vector<16x32xbf16>, vector<32x32xbf16>, vector<16x32xf32> -> vector<16x32xf32>
    %cst_116 = arith.constant 0.000000e+00 : f32
    %392 = vector.shape_cast %279 : vector<1x32xi1> to vector<1x32xi1>
    %393 = vector.broadcast %392 : vector<1x32xi1> to vector<16x32xi1>
    %394 = vector.broadcast %cst_116 : f32 to vector<16x32xf32>
    %395 = arith.select %393, %391, %394 : vector<16x32xi1>, vector<16x32xf32>
    %396 = tpu.iota {dimensions = array<i32: 0>} : vector<32x32xi32>
    %397 = tpu.iota {dimensions = array<i32: 1>} : vector<32x32xi32>
    %c5_i32 = arith.constant 5 : i32
    %398 = vector.broadcast %c5_i32 : i32 to vector<32x32xi32>
    %399 = arith.addi %397, %398 : vector<32x32xi32>
    %c31_i32_117 = arith.constant 31 : i32
    %400 = vector.broadcast %c31_i32_117 : i32 to vector<32x32xi32>
    %401 = arith.andi %399, %400 : vector<32x32xi32>
    %402 = arith.cmpi eq, %401, %396 : vector<32x32xi32>
    %403 = arith.extui %402 : vector<32x32xi1> to vector<32x32xi32>
    %404 = arith.sitofp %403 : vector<32x32xi32> to vector<32x32xf32>
    %405 = arith.truncf %404 : vector<32x32xf32> to vector<32x32xbf16>
    %406 = arith.truncf %266 : vector<16x32xf32> to vector<16x32xbf16>
    %cst_118 = arith.constant dense<0.000000e+00> : vector<16x32xf32>
    %407 = tpu.matmul %406, %405, %cst_118 {dimension_numbers = #tpu.dot_dimension_numbers<[1], [0], [0], [1], [0, 0, 1, 1], [], []>} : vector<16x32xbf16>, vector<32x32xbf16>, vector<16x32xf32> -> vector<16x32xf32>
    %cst_119 = arith.constant 0.000000e+00 : f32
    %408 = vector.shape_cast %283 : vector<1x32xi1> to vector<1x32xi1>
    %409 = vector.broadcast %408 : vector<1x32xi1> to vector<16x32xi1>
    %410 = vector.broadcast %cst_119 : f32 to vector<16x32xf32>
    %411 = arith.select %409, %407, %410 : vector<16x32xi1>, vector<16x32xf32>
    %412 = tpu.concatenate %299, %315, %331, %347, %266, %363, %379, %395, %411 in 0 : vector<16x32xf32>, vector<16x32xf32>, vector<16x32xf32>, vector<16x32xf32>, vector<16x32xf32>, vector<16x32xf32>, vector<16x32xf32>, vector<16x32xf32>, vector<16x32xf32> -> vector<144x32xf32>
    %413 = arith.truncf %412 : vector<144x32xf32> to vector<144x32xbf16>
    %c0_120 = arith.constant 0 : index
    %c0_121 = arith.constant 0 : index
    %414 = vector.load %arg14[%c0_120, %c0_121] : memref<64x144xbf16, #tpu.memory_space<vmem>>, vector<64x144xbf16>
    %cst_122 = arith.constant dense<0.000000e+00> : vector<64x32xf32>
    %415 = tpu.matmul %414, %413, %cst_122 {dimension_numbers = #tpu.dot_dimension_numbers<[1], [0], [0], [1], [0, 0, 1, 1], [], []>} : vector<64x144xbf16>, vector<144x32xbf16>, vector<64x32xf32> -> vector<64x32xf32>
    %416 = vector.extract_strided_slice %415 {offsets = [0, 0], sizes = [32, 32], strides = [1, 1]} : vector<64x32xf32> to vector<32x32xf32>
    %cst_123 = arith.constant dense<0.000000e+00> : vector<32xf32>
    %417 = vector.multi_reduction <add>, %416, %cst_123 [1] : vector<32x32xf32> to vector<32xf32>
    %418 = vector.shape_cast %417 : vector<32xf32> to vector<32x1xf32>
    %cst_124 = arith.constant 3.125000e-02 : f32
    %419 = vector.broadcast %cst_124 : f32 to vector<32x1xf32>
    %420 = arith.mulf %418, %419 : vector<32x1xf32>
    %421 = arith.mulf %416, %416 : vector<32x32xf32>
    %cst_125 = arith.constant dense<0.000000e+00> : vector<32xf32>
    %422 = vector.multi_reduction <add>, %421, %cst_125 [1] : vector<32x32xf32> to vector<32xf32>
    %423 = vector.shape_cast %422 : vector<32xf32> to vector<32x1xf32>
    %cst_126 = arith.constant 3.125000e-02 : f32
    %424 = vector.broadcast %cst_126 : f32 to vector<32x1xf32>
    %425 = arith.mulf %423, %424 : vector<32x1xf32>
    %426 = arith.mulf %420, %420 : vector<32x1xf32>
    %427 = arith.subf %425, %426 : vector<32x1xf32>
    %c0_127 = arith.constant 0 : index
    %c0_128 = arith.constant 0 : index
    %428 = vector.load %arg16[%c0_127, %c0_128] : memref<32x1xf32, #tpu.memory_space<vmem>>, vector<32x1xf32>
    %cst_129 = arith.constant 9.99999974E-6 : f32
    %429 = vector.broadcast %cst_129 : f32 to vector<32x1xf32>
    %430 = arith.addf %427, %429 : vector<32x1xf32>
    %431 = math.rsqrt %430 : vector<32x1xf32>
    %432 = arith.mulf %428, %431 : vector<32x1xf32>
    %c0_130 = arith.constant 0 : index
    %c0_131 = arith.constant 0 : index
    %433 = vector.load %arg17[%c0_130, %c0_131] : memref<32x1xf32, #tpu.memory_space<vmem>>, vector<32x1xf32>
    %434 = arith.mulf %420, %432 : vector<32x1xf32>
    %435 = arith.subf %433, %434 : vector<32x1xf32>
    %436 = vector.broadcast %432 : vector<32x1xf32> to vector<32x32xf32>
    %437 = arith.mulf %416, %436 : vector<32x32xf32>
    %438 = vector.broadcast %435 : vector<32x1xf32> to vector<32x32xf32>
    %439 = arith.addf %437, %438 : vector<32x32xf32>
    %cst_132 = arith.constant 2.000000e+01 : f32
    %440 = vector.broadcast %cst_132 : f32 to vector<32x32xf32>
    %441 = arith.minimumf %439, %440 : vector<32x32xf32>
    %442 = math.exp %441 : vector<32x32xf32>
    %cst_133 = arith.constant 1.000000e+00 : f32
    %443 = vector.broadcast %cst_133 : f32 to vector<32x32xf32>
    %444 = arith.addf %443, %442 : vector<32x32xf32>
    %445 = arith.mulf %444, %444 : vector<32x32xf32>
    %cst_134 = arith.constant 1.000000e+00 : f32
    %446 = vector.broadcast %cst_134 : f32 to vector<32x32xf32>
    %447 = arith.subf %445, %446 : vector<32x32xf32>
    %448 = arith.mulf %439, %447 : vector<32x32xf32>
    %cst_135 = arith.constant 1.000000e+00 : f32
    %449 = vector.broadcast %cst_135 : f32 to vector<32x32xf32>
    %450 = arith.addf %445, %449 : vector<32x32xf32>
    %451 = tpu.reciprocal %450 {approx = true} : vector<32x32xf32> -> vector<32x32xf32>
    %452 = arith.mulf %448, %451 : vector<32x32xf32>
    %453 = vector.extract_strided_slice %415 {offsets = [32, 0], sizes = [32, 32], strides = [1, 1]} : vector<64x32xf32> to vector<32x32xf32>
    %c0_136 = arith.constant 0 : index
    %c0_137 = arith.constant 0 : index
    %454 = vector.load %arg15[%c0_136, %c0_137] : memref<32x1xf32, #tpu.memory_space<vmem>>, vector<32x1xf32>
    %455 = vector.broadcast %454 : vector<32x1xf32> to vector<32x32xf32>
    %456 = arith.addf %453, %455 : vector<32x32xf32>
    %457 = arith.truncf %452 : vector<32x32xf32> to vector<32x32xbf16>
    %cst_138 = arith.constant dense<0.000000e+00> : vector<32x32xf32>
    %458 = tpu.matmul %457, %293, %cst_138 {dimension_numbers = #tpu.dot_dimension_numbers<[1], [0], [0], [1], [0, 0, 1, 1], [], []>} : vector<32x32xbf16>, vector<32x32xbf16>, vector<32x32xf32> -> vector<32x32xf32>
    %cst_139 = arith.constant 0.000000e+00 : f32
    %459 = vector.shape_cast %280 : vector<1x32xi1> to vector<1x32xi1>
    %460 = vector.broadcast %459 : vector<1x32xi1> to vector<32x32xi1>
    %461 = vector.broadcast %cst_139 : f32 to vector<32x32xf32>
    %462 = arith.select %460, %458, %461 : vector<32x32xi1>, vector<32x32xf32>
    %463 = arith.truncf %452 : vector<32x32xf32> to vector<32x32xbf16>
    %cst_140 = arith.constant dense<0.000000e+00> : vector<32x32xf32>
    %464 = tpu.matmul %463, %309, %cst_140 {dimension_numbers = #tpu.dot_dimension_numbers<[1], [0], [0], [1], [0, 0, 1, 1], [], []>} : vector<32x32xbf16>, vector<32x32xbf16>, vector<32x32xf32> -> vector<32x32xf32>
    %cst_141 = arith.constant 0.000000e+00 : f32
    %465 = vector.shape_cast %277 : vector<1x32xi1> to vector<1x32xi1>
    %466 = vector.broadcast %465 : vector<1x32xi1> to vector<32x32xi1>
    %467 = vector.broadcast %cst_141 : f32 to vector<32x32xf32>
    %468 = arith.select %466, %464, %467 : vector<32x32xi1>, vector<32x32xf32>
    %469 = arith.truncf %452 : vector<32x32xf32> to vector<32x32xbf16>
    %cst_142 = arith.constant dense<0.000000e+00> : vector<32x32xf32>
    %470 = tpu.matmul %469, %325, %cst_142 {dimension_numbers = #tpu.dot_dimension_numbers<[1], [0], [0], [1], [0, 0, 1, 1], [], []>} : vector<32x32xbf16>, vector<32x32xbf16>, vector<32x32xf32> -> vector<32x32xf32>
    %cst_143 = arith.constant 0.000000e+00 : f32
    %471 = vector.shape_cast %281 : vector<1x32xi1> to vector<1x32xi1>
    %472 = vector.broadcast %471 : vector<1x32xi1> to vector<32x32xi1>
    %473 = vector.broadcast %cst_143 : f32 to vector<32x32xf32>
    %474 = arith.select %472, %470, %473 : vector<32x32xi1>, vector<32x32xf32>
    %475 = arith.truncf %452 : vector<32x32xf32> to vector<32x32xbf16>
    %cst_144 = arith.constant dense<0.000000e+00> : vector<32x32xf32>
    %476 = tpu.matmul %475, %341, %cst_144 {dimension_numbers = #tpu.dot_dimension_numbers<[1], [0], [0], [1], [0, 0, 1, 1], [], []>} : vector<32x32xbf16>, vector<32x32xbf16>, vector<32x32xf32> -> vector<32x32xf32>
    %cst_145 = arith.constant 0.000000e+00 : f32
    %477 = vector.shape_cast %273 : vector<1x32xi1> to vector<1x32xi1>
    %478 = vector.broadcast %477 : vector<1x32xi1> to vector<32x32xi1>
    %479 = vector.broadcast %cst_145 : f32 to vector<32x32xf32>
    %480 = arith.select %478, %476, %479 : vector<32x32xi1>, vector<32x32xf32>
    %481 = arith.truncf %452 : vector<32x32xf32> to vector<32x32xbf16>
    %cst_146 = arith.constant dense<0.000000e+00> : vector<32x32xf32>
    %482 = tpu.matmul %481, %357, %cst_146 {dimension_numbers = #tpu.dot_dimension_numbers<[1], [0], [0], [1], [0, 0, 1, 1], [], []>} : vector<32x32xbf16>, vector<32x32xbf16>, vector<32x32xf32> -> vector<32x32xf32>
    %cst_147 = arith.constant 0.000000e+00 : f32
    %483 = vector.shape_cast %275 : vector<1x32xi1> to vector<1x32xi1>
    %484 = vector.broadcast %483 : vector<1x32xi1> to vector<32x32xi1>
    %485 = vector.broadcast %cst_147 : f32 to vector<32x32xf32>
    %486 = arith.select %484, %482, %485 : vector<32x32xi1>, vector<32x32xf32>
    %487 = arith.truncf %452 : vector<32x32xf32> to vector<32x32xbf16>
    %cst_148 = arith.constant dense<0.000000e+00> : vector<32x32xf32>
    %488 = tpu.matmul %487, %373, %cst_148 {dimension_numbers = #tpu.dot_dimension_numbers<[1], [0], [0], [1], [0, 0, 1, 1], [], []>} : vector<32x32xbf16>, vector<32x32xbf16>, vector<32x32xf32> -> vector<32x32xf32>
    %cst_149 = arith.constant 0.000000e+00 : f32
    %489 = vector.shape_cast %282 : vector<1x32xi1> to vector<1x32xi1>
    %490 = vector.broadcast %489 : vector<1x32xi1> to vector<32x32xi1>
    %491 = vector.broadcast %cst_149 : f32 to vector<32x32xf32>
    %492 = arith.select %490, %488, %491 : vector<32x32xi1>, vector<32x32xf32>
    %493 = arith.truncf %452 : vector<32x32xf32> to vector<32x32xbf16>
    %cst_150 = arith.constant dense<0.000000e+00> : vector<32x32xf32>
    %494 = tpu.matmul %493, %389, %cst_150 {dimension_numbers = #tpu.dot_dimension_numbers<[1], [0], [0], [1], [0, 0, 1, 1], [], []>} : vector<32x32xbf16>, vector<32x32xbf16>, vector<32x32xf32> -> vector<32x32xf32>
    %cst_151 = arith.constant 0.000000e+00 : f32
    %495 = vector.shape_cast %279 : vector<1x32xi1> to vector<1x32xi1>
    %496 = vector.broadcast %495 : vector<1x32xi1> to vector<32x32xi1>
    %497 = vector.broadcast %cst_151 : f32 to vector<32x32xf32>
    %498 = arith.select %496, %494, %497 : vector<32x32xi1>, vector<32x32xf32>
    %499 = arith.truncf %452 : vector<32x32xf32> to vector<32x32xbf16>
    %cst_152 = arith.constant dense<0.000000e+00> : vector<32x32xf32>
    %500 = tpu.matmul %499, %405, %cst_152 {dimension_numbers = #tpu.dot_dimension_numbers<[1], [0], [0], [1], [0, 0, 1, 1], [], []>} : vector<32x32xbf16>, vector<32x32xbf16>, vector<32x32xf32> -> vector<32x32xf32>
    %cst_153 = arith.constant 0.000000e+00 : f32
    %501 = vector.shape_cast %283 : vector<1x32xi1> to vector<1x32xi1>
    %502 = vector.broadcast %501 : vector<1x32xi1> to vector<32x32xi1>
    %503 = vector.broadcast %cst_153 : f32 to vector<32x32xf32>
    %504 = arith.select %502, %500, %503 : vector<32x32xi1>, vector<32x32xf32>
    %505 = tpu.concatenate %462, %468, %474, %480, %452, %486, %492, %498, %504 in 0 : vector<32x32xf32>, vector<32x32xf32>, vector<32x32xf32>, vector<32x32xf32>, vector<32x32xf32>, vector<32x32xf32>, vector<32x32xf32>, vector<32x32xf32>, vector<32x32xf32> -> vector<288x32xf32>
    %506 = arith.truncf %505 : vector<288x32xf32> to vector<288x32xbf16>
    %c0_154 = arith.constant 0 : index
    %c0_155 = arith.constant 0 : index
    %507 = vector.load %arg18[%c0_154, %c0_155] : memref<32x288xbf16, #tpu.memory_space<vmem>>, vector<32x288xbf16>
    %cst_156 = arith.constant dense<0.000000e+00> : vector<32x32xf32>
    %508 = tpu.matmul %507, %506, %cst_156 {dimension_numbers = #tpu.dot_dimension_numbers<[1], [0], [0], [1], [0, 0, 1, 1], [], []>} : vector<32x288xbf16>, vector<288x32xbf16>, vector<32x32xf32> -> vector<32x32xf32>
    %cst_157 = arith.constant dense<0.000000e+00> : vector<32xf32>
    %509 = vector.multi_reduction <add>, %508, %cst_157 [1] : vector<32x32xf32> to vector<32xf32>
    %510 = vector.shape_cast %509 : vector<32xf32> to vector<32x1xf32>
    %cst_158 = arith.constant 3.125000e-02 : f32
    %511 = vector.broadcast %cst_158 : f32 to vector<32x1xf32>
    %512 = arith.mulf %510, %511 : vector<32x1xf32>
    %513 = arith.mulf %508, %508 : vector<32x32xf32>
    %cst_159 = arith.constant dense<0.000000e+00> : vector<32xf32>
    %514 = vector.multi_reduction <add>, %513, %cst_159 [1] : vector<32x32xf32> to vector<32xf32>
    %515 = vector.shape_cast %514 : vector<32xf32> to vector<32x1xf32>
    %cst_160 = arith.constant 3.125000e-02 : f32
    %516 = vector.broadcast %cst_160 : f32 to vector<32x1xf32>
    %517 = arith.mulf %515, %516 : vector<32x1xf32>
    %518 = arith.mulf %512, %512 : vector<32x1xf32>
    %519 = arith.subf %517, %518 : vector<32x1xf32>
    %c0_161 = arith.constant 0 : index
    %c0_162 = arith.constant 0 : index
    %520 = vector.load %arg19[%c0_161, %c0_162] : memref<32x1xf32, #tpu.memory_space<vmem>>, vector<32x1xf32>
    %cst_163 = arith.constant 9.99999974E-6 : f32
    %521 = vector.broadcast %cst_163 : f32 to vector<32x1xf32>
    %522 = arith.addf %519, %521 : vector<32x1xf32>
    %523 = math.rsqrt %522 : vector<32x1xf32>
    %524 = arith.mulf %520, %523 : vector<32x1xf32>
    %c0_164 = arith.constant 0 : index
    %c0_165 = arith.constant 0 : index
    %525 = vector.load %arg20[%c0_164, %c0_165] : memref<32x1xf32, #tpu.memory_space<vmem>>, vector<32x1xf32>
    %526 = arith.mulf %512, %524 : vector<32x1xf32>
    %527 = arith.subf %525, %526 : vector<32x1xf32>
    %528 = vector.broadcast %524 : vector<32x1xf32> to vector<32x32xf32>
    %529 = arith.mulf %508, %528 : vector<32x32xf32>
    %530 = vector.broadcast %527 : vector<32x1xf32> to vector<32x32xf32>
    %531 = arith.addf %529, %530 : vector<32x32xf32>
    %cst_166 = arith.constant 2.000000e+01 : f32
    %532 = vector.broadcast %cst_166 : f32 to vector<32x32xf32>
    %533 = arith.minimumf %531, %532 : vector<32x32xf32>
    %534 = math.exp %533 : vector<32x32xf32>
    %cst_167 = arith.constant 1.000000e+00 : f32
    %535 = vector.broadcast %cst_167 : f32 to vector<32x32xf32>
    %536 = arith.addf %535, %534 : vector<32x32xf32>
    %537 = arith.mulf %536, %536 : vector<32x32xf32>
    %cst_168 = arith.constant 1.000000e+00 : f32
    %538 = vector.broadcast %cst_168 : f32 to vector<32x32xf32>
    %539 = arith.subf %537, %538 : vector<32x32xf32>
    %540 = arith.mulf %531, %539 : vector<32x32xf32>
    %cst_169 = arith.constant 1.000000e+00 : f32
    %541 = vector.broadcast %cst_169 : f32 to vector<32x32xf32>
    %542 = arith.addf %537, %541 : vector<32x32xf32>
    %543 = tpu.reciprocal %542 {approx = true} : vector<32x32xf32> -> vector<32x32xf32>
    %544 = arith.mulf %540, %543 : vector<32x32xf32>
    %545 = arith.addf %544, %456 : vector<32x32xf32>
    %546 = arith.truncf %545 : vector<32x32xf32> to vector<32x32xbf16>
    %c0_170 = arith.constant 0 : index
    %c0_171 = arith.constant 0 : index
    %547 = vector.load %arg3[%c0_170, %c0_171] : memref<32x128xbf16, #tpu.memory_space<vmem>>, vector<32x128xbf16>
    %cst_172 = arith.constant dense<0.000000e+00> : vector<32x128xf32>
    %548 = tpu.matmul %546, %547, %cst_172 {dimension_numbers = #tpu.dot_dimension_numbers<[1], [0], [0], [1], [0, 0, 1, 1], [], []>} : vector<32x32xbf16>, vector<32x128xbf16>, vector<32x128xf32> -> vector<32x128xf32>
    %c9_i32_173 = arith.constant 9 : i32
    %549 = tpu.dynamic_rotate %548 by %c9_i32_173 dim 1 : vector<32x128xf32>, i32 -> vector<32x128xf32>
    %cst_174 = arith.constant 0.000000e+00 : f32
    %550 = vector.shape_cast %94 : vector<1x128xi1> to vector<1x128xi1>
    %551 = vector.broadcast %550 : vector<1x128xi1> to vector<32x128xi1>
    %552 = vector.broadcast %cst_174 : f32 to vector<32x128xf32>
    %553 = arith.select %551, %549, %552 : vector<32x128xi1>, vector<32x128xf32>
    %c8_i32_175 = arith.constant 8 : i32
    %554 = tpu.dynamic_rotate %548 by %c8_i32_175 dim 1 : vector<32x128xf32>, i32 -> vector<32x128xf32>
    %cst_176 = arith.constant 0.000000e+00 : f32
    %555 = vector.shape_cast %91 : vector<1x128xi1> to vector<1x128xi1>
    %556 = vector.broadcast %555 : vector<1x128xi1> to vector<32x128xi1>
    %557 = vector.broadcast %cst_176 : f32 to vector<32x128xf32>
    %558 = arith.select %556, %554, %557 : vector<32x128xi1>, vector<32x128xf32>
    %c7_i32_177 = arith.constant 7 : i32
    %559 = tpu.dynamic_rotate %548 by %c7_i32_177 dim 1 : vector<32x128xf32>, i32 -> vector<32x128xf32>
    %cst_178 = arith.constant 0.000000e+00 : f32
    %560 = vector.shape_cast %95 : vector<1x128xi1> to vector<1x128xi1>
    %561 = vector.broadcast %560 : vector<1x128xi1> to vector<32x128xi1>
    %562 = vector.broadcast %cst_178 : f32 to vector<32x128xf32>
    %563 = arith.select %561, %559, %562 : vector<32x128xi1>, vector<32x128xf32>
    %c1_i32_179 = arith.constant 1 : i32
    %564 = tpu.dynamic_rotate %548 by %c1_i32_179 dim 1 : vector<32x128xf32>, i32 -> vector<32x128xf32>
    %cst_180 = arith.constant 0.000000e+00 : f32
    %565 = vector.shape_cast %87 : vector<1x128xi1> to vector<1x128xi1>
    %566 = vector.broadcast %565 : vector<1x128xi1> to vector<32x128xi1>
    %567 = vector.broadcast %cst_180 : f32 to vector<32x128xf32>
    %568 = arith.select %566, %564, %567 : vector<32x128xi1>, vector<32x128xf32>
    %c127_i32_181 = arith.constant 127 : i32
    %569 = tpu.dynamic_rotate %548 by %c127_i32_181 dim 1 : vector<32x128xf32>, i32 -> vector<32x128xf32>
    %cst_182 = arith.constant 0.000000e+00 : f32
    %570 = vector.shape_cast %89 : vector<1x128xi1> to vector<1x128xi1>
    %571 = vector.broadcast %570 : vector<1x128xi1> to vector<32x128xi1>
    %572 = vector.broadcast %cst_182 : f32 to vector<32x128xf32>
    %573 = arith.select %571, %569, %572 : vector<32x128xi1>, vector<32x128xf32>
    %c121_i32_183 = arith.constant 121 : i32
    %574 = tpu.dynamic_rotate %548 by %c121_i32_183 dim 1 : vector<32x128xf32>, i32 -> vector<32x128xf32>
    %cst_184 = arith.constant 0.000000e+00 : f32
    %575 = vector.shape_cast %96 : vector<1x128xi1> to vector<1x128xi1>
    %576 = vector.broadcast %575 : vector<1x128xi1> to vector<32x128xi1>
    %577 = vector.broadcast %cst_184 : f32 to vector<32x128xf32>
    %578 = arith.select %576, %574, %577 : vector<32x128xi1>, vector<32x128xf32>
    %c120_i32_185 = arith.constant 120 : i32
    %579 = tpu.dynamic_rotate %548 by %c120_i32_185 dim 1 : vector<32x128xf32>, i32 -> vector<32x128xf32>
    %cst_186 = arith.constant 0.000000e+00 : f32
    %580 = vector.shape_cast %93 : vector<1x128xi1> to vector<1x128xi1>
    %581 = vector.broadcast %580 : vector<1x128xi1> to vector<32x128xi1>
    %582 = vector.broadcast %cst_186 : f32 to vector<32x128xf32>
    %583 = arith.select %581, %579, %582 : vector<32x128xi1>, vector<32x128xf32>
    %c119_i32_187 = arith.constant 119 : i32
    %584 = tpu.dynamic_rotate %548 by %c119_i32_187 dim 1 : vector<32x128xf32>, i32 -> vector<32x128xf32>
    %cst_188 = arith.constant 0.000000e+00 : f32
    %585 = vector.shape_cast %97 : vector<1x128xi1> to vector<1x128xi1>
    %586 = vector.broadcast %585 : vector<1x128xi1> to vector<32x128xi1>
    %587 = vector.broadcast %cst_188 : f32 to vector<32x128xf32>
    %588 = arith.select %586, %584, %587 : vector<32x128xi1>, vector<32x128xf32>
    %589 = tpu.concatenate %553, %558, %563, %568, %548, %573, %578, %583, %588 in 0 : vector<32x128xf32>, vector<32x128xf32>, vector<32x128xf32>, vector<32x128xf32>, vector<32x128xf32>, vector<32x128xf32>, vector<32x128xf32>, vector<32x128xf32>, vector<32x128xf32> -> vector<288x128xf32>
    %590 = arith.truncf %589 : vector<288x128xf32> to vector<288x128xbf16>
    %c0_189 = arith.constant 0 : index
    %c0_190 = arith.constant 0 : index
    %591 = vector.load %arg21[%c0_189, %c0_190] : memref<32x288xbf16, #tpu.memory_space<vmem>>, vector<32x288xbf16>
    %cst_191 = arith.constant dense<0.000000e+00> : vector<32x128xf32>
    %592 = tpu.matmul %591, %590, %cst_191 {dimension_numbers = #tpu.dot_dimension_numbers<[1], [0], [0], [1], [0, 0, 1, 1], [], []>} : vector<32x288xbf16>, vector<288x128xbf16>, vector<32x128xf32> -> vector<32x128xf32>
    %593 = vector.extract_strided_slice %592 {offsets = [0, 0], sizes = [16, 128], strides = [1, 1]} : vector<32x128xf32> to vector<16x128xf32>
    %cst_192 = arith.constant dense<0.000000e+00> : vector<16xf32>
    %594 = vector.multi_reduction <add>, %593, %cst_192 [1] : vector<16x128xf32> to vector<16xf32>
    %595 = vector.shape_cast %594 : vector<16xf32> to vector<16x1xf32>
    %cst_193 = arith.constant 7.812500e-03 : f32
    %596 = vector.broadcast %cst_193 : f32 to vector<16x1xf32>
    %597 = arith.mulf %595, %596 : vector<16x1xf32>
    %598 = arith.mulf %593, %593 : vector<16x128xf32>
    %cst_194 = arith.constant dense<0.000000e+00> : vector<16xf32>
    %599 = vector.multi_reduction <add>, %598, %cst_194 [1] : vector<16x128xf32> to vector<16xf32>
    %600 = vector.shape_cast %599 : vector<16xf32> to vector<16x1xf32>
    %cst_195 = arith.constant 7.812500e-03 : f32
    %601 = vector.broadcast %cst_195 : f32 to vector<16x1xf32>
    %602 = arith.mulf %600, %601 : vector<16x1xf32>
    %603 = arith.mulf %597, %597 : vector<16x1xf32>
    %604 = arith.subf %602, %603 : vector<16x1xf32>
    %c0_196 = arith.constant 0 : index
    %c0_197 = arith.constant 0 : index
    %605 = vector.load %arg23[%c0_196, %c0_197] : memref<16x1xf32, #tpu.memory_space<vmem>>, vector<16x1xf32>
    %cst_198 = arith.constant 9.99999974E-6 : f32
    %606 = vector.broadcast %cst_198 : f32 to vector<16x1xf32>
    %607 = arith.addf %604, %606 : vector<16x1xf32>
    %608 = math.rsqrt %607 : vector<16x1xf32>
    %609 = arith.mulf %605, %608 : vector<16x1xf32>
    %c0_199 = arith.constant 0 : index
    %c0_200 = arith.constant 0 : index
    %610 = vector.load %arg24[%c0_199, %c0_200] : memref<16x1xf32, #tpu.memory_space<vmem>>, vector<16x1xf32>
    %611 = arith.mulf %597, %609 : vector<16x1xf32>
    %612 = arith.subf %610, %611 : vector<16x1xf32>
    %613 = vector.broadcast %609 : vector<16x1xf32> to vector<16x128xf32>
    %614 = arith.mulf %593, %613 : vector<16x128xf32>
    %615 = vector.broadcast %612 : vector<16x1xf32> to vector<16x128xf32>
    %616 = arith.addf %614, %615 : vector<16x128xf32>
    %cst_201 = arith.constant 2.000000e+01 : f32
    %617 = vector.broadcast %cst_201 : f32 to vector<16x128xf32>
    %618 = arith.minimumf %616, %617 : vector<16x128xf32>
    %619 = math.exp %618 : vector<16x128xf32>
    %cst_202 = arith.constant 1.000000e+00 : f32
    %620 = vector.broadcast %cst_202 : f32 to vector<16x128xf32>
    %621 = arith.addf %620, %619 : vector<16x128xf32>
    %622 = arith.mulf %621, %621 : vector<16x128xf32>
    %cst_203 = arith.constant 1.000000e+00 : f32
    %623 = vector.broadcast %cst_203 : f32 to vector<16x128xf32>
    %624 = arith.subf %622, %623 : vector<16x128xf32>
    %625 = arith.mulf %616, %624 : vector<16x128xf32>
    %cst_204 = arith.constant 1.000000e+00 : f32
    %626 = vector.broadcast %cst_204 : f32 to vector<16x128xf32>
    %627 = arith.addf %622, %626 : vector<16x128xf32>
    %628 = tpu.reciprocal %627 {approx = true} : vector<16x128xf32> -> vector<16x128xf32>
    %629 = arith.mulf %625, %628 : vector<16x128xf32>
    %630 = vector.extract_strided_slice %592 {offsets = [16, 0], sizes = [16, 128], strides = [1, 1]} : vector<32x128xf32> to vector<16x128xf32>
    %c0_205 = arith.constant 0 : index
    %c0_206 = arith.constant 0 : index
    %631 = vector.load %arg22[%c0_205, %c0_206] : memref<16x1xf32, #tpu.memory_space<vmem>>, vector<16x1xf32>
    %632 = vector.broadcast %631 : vector<16x1xf32> to vector<16x128xf32>
    %633 = arith.addf %630, %632 : vector<16x128xf32>
    %634 = arith.addf %629, %633 : vector<16x128xf32>
    %635 = arith.truncf %634 : vector<16x128xf32> to vector<16x128xbf16>
    %c0_207 = arith.constant 0 : index
    %c0_208 = arith.constant 0 : index
    %636 = vector.load %arg4[%c0_207, %c0_208] : memref<128x512xbf16, #tpu.memory_space<vmem>>, vector<128x512xbf16>
    %cst_209 = arith.constant dense<0.000000e+00> : vector<16x512xf32>
    %637 = tpu.matmul %635, %636, %cst_209 {dimension_numbers = #tpu.dot_dimension_numbers<[1], [0], [0], [1], [0, 0, 1, 1], [], []>} : vector<16x128xbf16>, vector<128x512xbf16>, vector<16x512xf32> -> vector<16x512xf32>
    %c17_i32_210 = arith.constant 17 : i32
    %638 = tpu.dynamic_rotate %637 by %c17_i32_210 dim 1 : vector<16x512xf32>, i32 -> vector<16x512xf32>
    %cst_211 = arith.constant 0.000000e+00 : f32
    %639 = vector.shape_cast %14 : vector<1x512xi1> to vector<1x512xi1>
    %640 = vector.broadcast %639 : vector<1x512xi1> to vector<16x512xi1>
    %641 = vector.broadcast %cst_211 : f32 to vector<16x512xf32>
    %642 = arith.select %640, %638, %641 : vector<16x512xi1>, vector<16x512xf32>
    %c16_i32_212 = arith.constant 16 : i32
    %643 = tpu.dynamic_rotate %637 by %c16_i32_212 dim 1 : vector<16x512xf32>, i32 -> vector<16x512xf32>
    %cst_213 = arith.constant 0.000000e+00 : f32
    %644 = vector.shape_cast %11 : vector<1x512xi1> to vector<1x512xi1>
    %645 = vector.broadcast %644 : vector<1x512xi1> to vector<16x512xi1>
    %646 = vector.broadcast %cst_213 : f32 to vector<16x512xf32>
    %647 = arith.select %645, %643, %646 : vector<16x512xi1>, vector<16x512xf32>
    %c15_i32_214 = arith.constant 15 : i32
    %648 = tpu.dynamic_rotate %637 by %c15_i32_214 dim 1 : vector<16x512xf32>, i32 -> vector<16x512xf32>
    %cst_215 = arith.constant 0.000000e+00 : f32
    %649 = vector.shape_cast %15 : vector<1x512xi1> to vector<1x512xi1>
    %650 = vector.broadcast %649 : vector<1x512xi1> to vector<16x512xi1>
    %651 = vector.broadcast %cst_215 : f32 to vector<16x512xf32>
    %652 = arith.select %650, %648, %651 : vector<16x512xi1>, vector<16x512xf32>
    %c1_i32_216 = arith.constant 1 : i32
    %653 = tpu.dynamic_rotate %637 by %c1_i32_216 dim 1 : vector<16x512xf32>, i32 -> vector<16x512xf32>
    %cst_217 = arith.constant 0.000000e+00 : f32
    %654 = vector.shape_cast %7 : vector<1x512xi1> to vector<1x512xi1>
    %655 = vector.broadcast %654 : vector<1x512xi1> to vector<16x512xi1>
    %656 = vector.broadcast %cst_217 : f32 to vector<16x512xf32>
    %657 = arith.select %655, %653, %656 : vector<16x512xi1>, vector<16x512xf32>
    %c511_i32_218 = arith.constant 511 : i32
    %658 = tpu.dynamic_rotate %637 by %c511_i32_218 dim 1 : vector<16x512xf32>, i32 -> vector<16x512xf32>
    %cst_219 = arith.constant 0.000000e+00 : f32
    %659 = vector.shape_cast %9 : vector<1x512xi1> to vector<1x512xi1>
    %660 = vector.broadcast %659 : vector<1x512xi1> to vector<16x512xi1>
    %661 = vector.broadcast %cst_219 : f32 to vector<16x512xf32>
    %662 = arith.select %660, %658, %661 : vector<16x512xi1>, vector<16x512xf32>
    %c497_i32_220 = arith.constant 497 : i32
    %663 = tpu.dynamic_rotate %637 by %c497_i32_220 dim 1 : vector<16x512xf32>, i32 -> vector<16x512xf32>
    %cst_221 = arith.constant 0.000000e+00 : f32
    %664 = vector.shape_cast %16 : vector<1x512xi1> to vector<1x512xi1>
    %665 = vector.broadcast %664 : vector<1x512xi1> to vector<16x512xi1>
    %666 = vector.broadcast %cst_221 : f32 to vector<16x512xf32>
    %667 = arith.select %665, %663, %666 : vector<16x512xi1>, vector<16x512xf32>
    %c496_i32_222 = arith.constant 496 : i32
    %668 = tpu.dynamic_rotate %637 by %c496_i32_222 dim 1 : vector<16x512xf32>, i32 -> vector<16x512xf32>
    %cst_223 = arith.constant 0.000000e+00 : f32
    %669 = vector.shape_cast %13 : vector<1x512xi1> to vector<1x512xi1>
    %670 = vector.broadcast %669 : vector<1x512xi1> to vector<16x512xi1>
    %671 = vector.broadcast %cst_223 : f32 to vector<16x512xf32>
    %672 = arith.select %670, %668, %671 : vector<16x512xi1>, vector<16x512xf32>
    %c495_i32_224 = arith.constant 495 : i32
    %673 = tpu.dynamic_rotate %637 by %c495_i32_224 dim 1 : vector<16x512xf32>, i32 -> vector<16x512xf32>
    %cst_225 = arith.constant 0.000000e+00 : f32
    %674 = vector.shape_cast %17 : vector<1x512xi1> to vector<1x512xi1>
    %675 = vector.broadcast %674 : vector<1x512xi1> to vector<16x512xi1>
    %676 = vector.broadcast %cst_225 : f32 to vector<16x512xf32>
    %677 = arith.select %675, %673, %676 : vector<16x512xi1>, vector<16x512xf32>
    %678 = tpu.concatenate %642, %647, %652, %657, %637, %662, %667, %672, %677 in 0 : vector<16x512xf32>, vector<16x512xf32>, vector<16x512xf32>, vector<16x512xf32>, vector<16x512xf32>, vector<16x512xf32>, vector<16x512xf32>, vector<16x512xf32>, vector<16x512xf32> -> vector<144x512xf32>
    %679 = arith.truncf %678 : vector<144x512xf32> to vector<144x512xbf16>
    %c0_226 = arith.constant 0 : index
    %c0_227 = arith.constant 0 : index
    %680 = vector.load %arg25[%c0_226, %c0_227] : memref<16x144xbf16, #tpu.memory_space<vmem>>, vector<16x144xbf16>
    %cst_228 = arith.constant dense<0.000000e+00> : vector<16x512xf32>
    %681 = tpu.matmul %680, %679, %cst_228 {dimension_numbers = #tpu.dot_dimension_numbers<[1], [0], [0], [1], [0, 0, 1, 1], [], []>} : vector<16x144xbf16>, vector<144x512xbf16>, vector<16x512xf32> -> vector<16x512xf32>
    %682 = vector.extract_strided_slice %681 {offsets = [0, 0], sizes = [8, 512], strides = [1, 1]} : vector<16x512xf32> to vector<8x512xf32>
    %cst_229 = arith.constant dense<0.000000e+00> : vector<8xf32>
    %683 = vector.multi_reduction <add>, %682, %cst_229 [1] : vector<8x512xf32> to vector<8xf32>
    %684 = vector.shape_cast %683 : vector<8xf32> to vector<8x1xf32>
    %cst_230 = arith.constant 0.001953125 : f32
    %685 = vector.broadcast %cst_230 : f32 to vector<8x1xf32>
    %686 = arith.mulf %684, %685 : vector<8x1xf32>
    %687 = arith.mulf %682, %682 : vector<8x512xf32>
    %cst_231 = arith.constant dense<0.000000e+00> : vector<8xf32>
    %688 = vector.multi_reduction <add>, %687, %cst_231 [1] : vector<8x512xf32> to vector<8xf32>
    %689 = vector.shape_cast %688 : vector<8xf32> to vector<8x1xf32>
    %cst_232 = arith.constant 0.001953125 : f32
    %690 = vector.broadcast %cst_232 : f32 to vector<8x1xf32>
    %691 = arith.mulf %689, %690 : vector<8x1xf32>
    %692 = arith.mulf %686, %686 : vector<8x1xf32>
    %693 = arith.subf %691, %692 : vector<8x1xf32>
    %c0_233 = arith.constant 0 : index
    %c0_234 = arith.constant 0 : index
    %694 = vector.load %arg27[%c0_233, %c0_234] : memref<8x1xf32, #tpu.memory_space<vmem>>, vector<8x1xf32>
    %cst_235 = arith.constant 9.99999974E-6 : f32
    %695 = vector.broadcast %cst_235 : f32 to vector<8x1xf32>
    %696 = arith.addf %693, %695 : vector<8x1xf32>
    %697 = math.rsqrt %696 : vector<8x1xf32>
    %698 = arith.mulf %694, %697 : vector<8x1xf32>
    %c0_236 = arith.constant 0 : index
    %c0_237 = arith.constant 0 : index
    %699 = vector.load %arg28[%c0_236, %c0_237] : memref<8x1xf32, #tpu.memory_space<vmem>>, vector<8x1xf32>
    %700 = arith.mulf %686, %698 : vector<8x1xf32>
    %701 = arith.subf %699, %700 : vector<8x1xf32>
    %702 = vector.broadcast %698 : vector<8x1xf32> to vector<8x512xf32>
    %703 = arith.mulf %682, %702 : vector<8x512xf32>
    %704 = vector.broadcast %701 : vector<8x1xf32> to vector<8x512xf32>
    %705 = arith.addf %703, %704 : vector<8x512xf32>
    %cst_238 = arith.constant 2.000000e+01 : f32
    %706 = vector.broadcast %cst_238 : f32 to vector<8x512xf32>
    %707 = arith.minimumf %705, %706 : vector<8x512xf32>
    %708 = math.exp %707 : vector<8x512xf32>
    %cst_239 = arith.constant 1.000000e+00 : f32
    %709 = vector.broadcast %cst_239 : f32 to vector<8x512xf32>
    %710 = arith.addf %709, %708 : vector<8x512xf32>
    %711 = arith.mulf %710, %710 : vector<8x512xf32>
    %cst_240 = arith.constant 1.000000e+00 : f32
    %712 = vector.broadcast %cst_240 : f32 to vector<8x512xf32>
    %713 = arith.subf %711, %712 : vector<8x512xf32>
    %714 = arith.mulf %705, %713 : vector<8x512xf32>
    %cst_241 = arith.constant 1.000000e+00 : f32
    %715 = vector.broadcast %cst_241 : f32 to vector<8x512xf32>
    %716 = arith.addf %711, %715 : vector<8x512xf32>
    %717 = tpu.reciprocal %716 {approx = true} : vector<8x512xf32> -> vector<8x512xf32>
    %718 = arith.mulf %714, %717 : vector<8x512xf32>
    %719 = vector.extract_strided_slice %681 {offsets = [8, 0], sizes = [8, 512], strides = [1, 1]} : vector<16x512xf32> to vector<8x512xf32>
    %c0_242 = arith.constant 0 : index
    %c0_243 = arith.constant 0 : index
    %720 = vector.load %arg26[%c0_242, %c0_243] : memref<8x1xf32, #tpu.memory_space<vmem>>, vector<8x1xf32>
    %721 = vector.broadcast %720 : vector<8x1xf32> to vector<8x512xf32>
    %722 = arith.addf %719, %721 : vector<8x512xf32>
    %723 = arith.addf %718, %722 : vector<8x512xf32>
    %c17_i32_244 = arith.constant 17 : i32
    %724 = tpu.dynamic_rotate %723 by %c17_i32_244 dim 1 : vector<8x512xf32>, i32 -> vector<8x512xf32>
    %cst_245 = arith.constant 0.000000e+00 : f32
    %725 = vector.shape_cast %14 : vector<1x512xi1> to vector<1x512xi1>
    %726 = vector.broadcast %725 : vector<1x512xi1> to vector<8x512xi1>
    %727 = vector.broadcast %cst_245 : f32 to vector<8x512xf32>
    %728 = arith.select %726, %724, %727 : vector<8x512xi1>, vector<8x512xf32>
    %c16_i32_246 = arith.constant 16 : i32
    %729 = tpu.dynamic_rotate %723 by %c16_i32_246 dim 1 : vector<8x512xf32>, i32 -> vector<8x512xf32>
    %cst_247 = arith.constant 0.000000e+00 : f32
    %730 = vector.shape_cast %11 : vector<1x512xi1> to vector<1x512xi1>
    %731 = vector.broadcast %730 : vector<1x512xi1> to vector<8x512xi1>
    %732 = vector.broadcast %cst_247 : f32 to vector<8x512xf32>
    %733 = arith.select %731, %729, %732 : vector<8x512xi1>, vector<8x512xf32>
    %c15_i32_248 = arith.constant 15 : i32
    %734 = tpu.dynamic_rotate %723 by %c15_i32_248 dim 1 : vector<8x512xf32>, i32 -> vector<8x512xf32>
    %cst_249 = arith.constant 0.000000e+00 : f32
    %735 = vector.shape_cast %15 : vector<1x512xi1> to vector<1x512xi1>
    %736 = vector.broadcast %735 : vector<1x512xi1> to vector<8x512xi1>
    %737 = vector.broadcast %cst_249 : f32 to vector<8x512xf32>
    %738 = arith.select %736, %734, %737 : vector<8x512xi1>, vector<8x512xf32>
    %c1_i32_250 = arith.constant 1 : i32
    %739 = tpu.dynamic_rotate %723 by %c1_i32_250 dim 1 : vector<8x512xf32>, i32 -> vector<8x512xf32>
    %cst_251 = arith.constant 0.000000e+00 : f32
    %740 = vector.shape_cast %7 : vector<1x512xi1> to vector<1x512xi1>
    %741 = vector.broadcast %740 : vector<1x512xi1> to vector<8x512xi1>
    %742 = vector.broadcast %cst_251 : f32 to vector<8x512xf32>
    %743 = arith.select %741, %739, %742 : vector<8x512xi1>, vector<8x512xf32>
    %c511_i32_252 = arith.constant 511 : i32
    %744 = tpu.dynamic_rotate %723 by %c511_i32_252 dim 1 : vector<8x512xf32>, i32 -> vector<8x512xf32>
    %cst_253 = arith.constant 0.000000e+00 : f32
    %745 = vector.shape_cast %9 : vector<1x512xi1> to vector<1x512xi1>
    %746 = vector.broadcast %745 : vector<1x512xi1> to vector<8x512xi1>
    %747 = vector.broadcast %cst_253 : f32 to vector<8x512xf32>
    %748 = arith.select %746, %744, %747 : vector<8x512xi1>, vector<8x512xf32>
    %c497_i32_254 = arith.constant 497 : i32
    %749 = tpu.dynamic_rotate %723 by %c497_i32_254 dim 1 : vector<8x512xf32>, i32 -> vector<8x512xf32>
    %cst_255 = arith.constant 0.000000e+00 : f32
    %750 = vector.shape_cast %16 : vector<1x512xi1> to vector<1x512xi1>
    %751 = vector.broadcast %750 : vector<1x512xi1> to vector<8x512xi1>
    %752 = vector.broadcast %cst_255 : f32 to vector<8x512xf32>
    %753 = arith.select %751, %749, %752 : vector<8x512xi1>, vector<8x512xf32>
    %c496_i32_256 = arith.constant 496 : i32
    %754 = tpu.dynamic_rotate %723 by %c496_i32_256 dim 1 : vector<8x512xf32>, i32 -> vector<8x512xf32>
    %cst_257 = arith.constant 0.000000e+00 : f32
    %755 = vector.shape_cast %13 : vector<1x512xi1> to vector<1x512xi1>
    %756 = vector.broadcast %755 : vector<1x512xi1> to vector<8x512xi1>
    %757 = vector.broadcast %cst_257 : f32 to vector<8x512xf32>
    %758 = arith.select %756, %754, %757 : vector<8x512xi1>, vector<8x512xf32>
    %c495_i32_258 = arith.constant 495 : i32
    %759 = tpu.dynamic_rotate %723 by %c495_i32_258 dim 1 : vector<8x512xf32>, i32 -> vector<8x512xf32>
    %cst_259 = arith.constant 0.000000e+00 : f32
    %760 = vector.shape_cast %17 : vector<1x512xi1> to vector<1x512xi1>
    %761 = vector.broadcast %760 : vector<1x512xi1> to vector<8x512xi1>
    %762 = vector.broadcast %cst_259 : f32 to vector<8x512xf32>
    %763 = arith.select %761, %759, %762 : vector<8x512xi1>, vector<8x512xf32>
    %764 = tpu.concatenate %728, %733, %738, %743, %723, %748, %753, %758, %763 in 0 : vector<8x512xf32>, vector<8x512xf32>, vector<8x512xf32>, vector<8x512xf32>, vector<8x512xf32>, vector<8x512xf32>, vector<8x512xf32>, vector<8x512xf32>, vector<8x512xf32> -> vector<72x512xf32>
    %765 = arith.truncf %764 : vector<72x512xf32> to vector<72x512xbf16>
    %c0_260 = arith.constant 0 : index
    %c0_261 = arith.constant 0 : index
    %766 = vector.load %arg29[%c0_260, %c0_261] : memref<8x72xbf16, #tpu.memory_space<vmem>>, vector<8x72xbf16>
    %cst_262 = arith.constant dense<0.000000e+00> : vector<8x512xf32>
    %767 = tpu.matmul %766, %765, %cst_262 {dimension_numbers = #tpu.dot_dimension_numbers<[1], [0], [0], [1], [0, 0, 1, 1], [], []>} : vector<8x72xbf16>, vector<72x512xbf16>, vector<8x512xf32> -> vector<8x512xf32>
    %cst_263 = arith.constant dense<0.000000e+00> : vector<8xf32>
    %768 = vector.multi_reduction <add>, %767, %cst_263 [1] : vector<8x512xf32> to vector<8xf32>
    %769 = vector.shape_cast %768 : vector<8xf32> to vector<8x1xf32>
    %cst_264 = arith.constant 0.001953125 : f32
    %770 = vector.broadcast %cst_264 : f32 to vector<8x1xf32>
    %771 = arith.mulf %769, %770 : vector<8x1xf32>
    %772 = arith.mulf %767, %767 : vector<8x512xf32>
    %cst_265 = arith.constant dense<0.000000e+00> : vector<8xf32>
    %773 = vector.multi_reduction <add>, %772, %cst_265 [1] : vector<8x512xf32> to vector<8xf32>
    %774 = vector.shape_cast %773 : vector<8xf32> to vector<8x1xf32>
    %cst_266 = arith.constant 0.001953125 : f32
    %775 = vector.broadcast %cst_266 : f32 to vector<8x1xf32>
    %776 = arith.mulf %774, %775 : vector<8x1xf32>
    %777 = arith.mulf %771, %771 : vector<8x1xf32>
    %778 = arith.subf %776, %777 : vector<8x1xf32>
    %c0_267 = arith.constant 0 : index
    %c0_268 = arith.constant 0 : index
    %779 = vector.load %arg30[%c0_267, %c0_268] : memref<8x1xf32, #tpu.memory_space<vmem>>, vector<8x1xf32>
    %cst_269 = arith.constant 9.99999974E-6 : f32
    %780 = vector.broadcast %cst_269 : f32 to vector<8x1xf32>
    %781 = arith.addf %778, %780 : vector<8x1xf32>
    %782 = math.rsqrt %781 : vector<8x1xf32>
    %783 = arith.mulf %779, %782 : vector<8x1xf32>
    %c0_270 = arith.constant 0 : index
    %c0_271 = arith.constant 0 : index
    %784 = vector.load %arg31[%c0_270, %c0_271] : memref<8x1xf32, #tpu.memory_space<vmem>>, vector<8x1xf32>
    %785 = arith.mulf %771, %783 : vector<8x1xf32>
    %786 = arith.subf %784, %785 : vector<8x1xf32>
    %787 = vector.broadcast %783 : vector<8x1xf32> to vector<8x512xf32>
    %788 = arith.mulf %767, %787 : vector<8x512xf32>
    %789 = vector.broadcast %786 : vector<8x1xf32> to vector<8x512xf32>
    %790 = arith.addf %788, %789 : vector<8x512xf32>
    %cst_272 = arith.constant 2.000000e+01 : f32
    %791 = vector.broadcast %cst_272 : f32 to vector<8x512xf32>
    %792 = arith.minimumf %790, %791 : vector<8x512xf32>
    %793 = math.exp %792 : vector<8x512xf32>
    %cst_273 = arith.constant 1.000000e+00 : f32
    %794 = vector.broadcast %cst_273 : f32 to vector<8x512xf32>
    %795 = arith.addf %794, %793 : vector<8x512xf32>
    %796 = arith.mulf %795, %795 : vector<8x512xf32>
    %cst_274 = arith.constant 1.000000e+00 : f32
    %797 = vector.broadcast %cst_274 : f32 to vector<8x512xf32>
    %798 = arith.subf %796, %797 : vector<8x512xf32>
    %799 = arith.mulf %790, %798 : vector<8x512xf32>
    %cst_275 = arith.constant 1.000000e+00 : f32
    %800 = vector.broadcast %cst_275 : f32 to vector<8x512xf32>
    %801 = arith.addf %796, %800 : vector<8x512xf32>
    %802 = tpu.reciprocal %801 {approx = true} : vector<8x512xf32> -> vector<8x512xf32>
    %803 = arith.mulf %799, %802 : vector<8x512xf32>
    %c0_276 = arith.constant 0 : index
    %c0_277 = arith.constant 0 : index
    %804 = vector.load %arg32[%c0_276, %c0_277] : memref<3x8xbf16, #tpu.memory_space<vmem>>, vector<3x8xbf16>
    %805 = arith.truncf %803 : vector<8x512xf32> to vector<8x512xbf16>
    %cst_278 = arith.constant dense<0.000000e+00> : vector<3x512xf32>
    %806 = tpu.matmul %804, %805, %cst_278 {dimension_numbers = #tpu.dot_dimension_numbers<[1], [0], [0], [1], [0, 0, 1, 1], [], []>} : vector<3x8xbf16>, vector<8x512xbf16>, vector<3x512xf32> -> vector<3x512xf32>
    %c0_279 = arith.constant 0 : index
    %c0_280 = arith.constant 0 : index
    %807 = vector.load %arg33[%c0_279, %c0_280] : memref<3x1xf32, #tpu.memory_space<vmem>>, vector<3x1xf32>
    %808 = vector.broadcast %807 : vector<3x1xf32> to vector<3x512xf32>
    %809 = arith.addf %806, %808 : vector<3x512xf32>
    %c0_281 = arith.constant 0 : index
    %c0_282 = arith.constant 0 : index
    %810 = vector.load %arg34[%c0_281, %c0_282] : memref<3x512xf32, #tpu.memory_space<vmem>>, vector<3x512xf32>
    tpu.vector_store %arg34[%c0_281, %c0_282], %809 {strides = array<i32>} : memref<3x512xf32, #tpu.memory_space<vmem>>, vector<3x512xf32>,
    return
  }
}

</mosaic_0001>

<bundles_post_ra>
// kernel: a_call__.1
= control target key start
LH: loop header
LB: loop body
LE: loop exit
PB: predicated region body
PF: predicated region fallthrough
CT: control target
= control target key end

     0   :  { %s6617_s6 = smov 1   ;;  %s6618_s10 = smov 2   ;;  %s8880_s0 = inlined_call_operand.smem [shape: u32[35], index: -1, kind: input, shape index: {}] }
   0x1   :  { %s6688_s5 = sld [smem:[%s8880_s0]]   ;;  %s6619_s14 = smov 3  }
   0x2   :  { %s6693_s9 = sld [smem:[%s8880_s0 + %s6617_s6]]   ;;  %s6620_s18 = smov 4  }
   0x3   :  { %s6698_s13 = sld [smem:[%s8880_s0 + %s6618_s10]]   ;;  %s6621_s22 = smov 5  }
   0x4   :  { %s6703_s17 = sld [smem:[%s8880_s0 + %s6619_s14]]   ;;  %s6622_s26 = smov 6  }
   0x5   :  { %s6708_s21 = sld [smem:[%s8880_s0 + %s6620_s18]]   ;;  %s6623_s30 = smov 7  }
   0x6   :  { %s6713_s25 = sld [smem:[%s8880_s0 + %s6621_s22]]   ;;  %s6624_s4 = smov 8  }
   0x7   :  { %s6718_s29 = sld [smem:[%s8880_s0 + %s6622_s26]]   ;;  %s6625_s10 = smov 9  }
   0x8   :  { %s6723_s3 = sld [smem:[%s8880_s0 + %s6623_s30]]   ;;  %s6626_s15 = smov 10  }
   0x9   :  { %9048 = sst [smem:[#allocation16_spill]] %s6698_s13  ;;  %s6627_s20 = smov 11  }
   0xa   :  { %9049 = sst [smem:[#allocation17_spill]] %s6703_s17  ;;  %s6628_s26 = smov 12  }
   0xb   :  { %s6728_s8 = sld [smem:[%s8880_s0 + %s6624_s4]]   ;;  %s6629_s1 = smov 13  }
   0xc   :  { %s6733_s14 = sld [smem:[%s8880_s0 + %s6625_s10]]   ;;  %s6630_s7 = smov 14  }
   0xd   :  { %s6738_s19 = sld [smem:[%s8880_s0 + %s6626_s15]]   ;;  %s6631_s15 = smov 15  }
   0xe   :  { %s6743_s24 = sld [smem:[%s8880_s0 + %s6627_s20]]   ;;  %s6632_s22 = smov 16  }
   0xf   :  { %s6748_s30 = sld [smem:[%s8880_s0 + %s6628_s26]]   ;;  %s6633_s28 = smov 17  }
  0x10   :  { %s6753_s6 = sld [smem:[%s8880_s0 + %s6629_s1]]  }
  0x11   :  { %s6758_s12 = sld [smem:[%s8880_s0 + %s6630_s7]]   ;;  %s6634_s7 = smov 18  }
  0x12   :  { %s6763_s20 = sld [smem:[%s8880_s0 + %s6631_s15]]   ;;  %s6635_s15 = smov 19  }
  0x13   :  { %s6768_s27 = sld [smem:[%s8880_s0 + %s6632_s22]]   ;;  %s6636_s22 = smov 20  }
  0x14   :  { %s6773_s4 = sld [smem:[%s8880_s0 + %s6633_s28]]   ;;  %s6637_s28 = smov 21  }
  0x15   :  { %s6778_s17 = sld [smem:[%s8880_s0 + %s6634_s7]]   ;;  %s6638_s7 = smov 22  }
  0x17   :  { %9050 = sst [smem:[#allocation18_spill]] %s6758_s12 }
  0x18   :  { %9051 = sst [smem:[#allocation19_spill]] %s6763_s20 }
  0x19   :  { %9052 = sst [smem:[#allocation20_spill]] %s6768_s27 }
  0x1a   :  { %9053 = sst [smem:[#allocation21_spill]] %s6773_s4 }
  0x1b   :  { %9054 = sst [smem:[#allocation22_spill]] %s6778_s17 }
  0x1c   :  { %s6783_s20 = sld [smem:[%s8880_s0 + %s6635_s15]]   ;;  %s6639_s15 = smov 23  }
  0x1d   :  { %s6788_s27 = sld [smem:[%s8880_s0 + %s6636_s22]]   ;;  %s6640_s22 = smov 24  }
  0x1e   :  { %s6793_s4 = sld [smem:[%s8880_s0 + %s6637_s28]]   ;;  %s6641_s28 = smov 25  }
  0x1f   :  { %s6798_s17 = sld [smem:[%s8880_s0 + %s6638_s7]]   ;;  %s6642_s7 = smov 26  }
  0x22   :  { %9055 = sst [smem:[#allocation23_spill]] %s6783_s20 }
  0x23   :  { %9056 = sst [smem:[#allocation24_spill]] %s6788_s27 }
  0x24   :  { %9057 = sst [smem:[#allocation25_spill]] %s6793_s4 }
  0x25   :  { %9058 = sst [smem:[#allocation26_spill]] %s6798_s17 }
  0x26   :  { %s6803_s20 = sld [smem:[%s8880_s0 + %s6639_s15]]   ;;  %s6643_s15 = smov 27  }
  0x27   :  { %s6808_s27 = sld [smem:[%s8880_s0 + %s6640_s22]]   ;;  %s6644_s22 = smov 28  }
  0x28   :  { %s6813_s4 = sld [smem:[%s8880_s0 + %s6641_s28]]   ;;  %s6645_s28 = smov 29  }
  0x29   :  { %s6818_s17 = sld [smem:[%s8880_s0 + %s6642_s7]]   ;;  %s6646_s7 = smov 30  }
  0x2a   :  { %s6833_s12 = sld [smem:[%s8880_s0 + %s6645_s28]]   ;;  %s6649_s28 = smov 33  }
  0x2b   :  { %s6853_s13 = sld [smem:[%s8880_s0 + %s6649_s28]]  }
  0x2c   :  { %9059 = sst [smem:[#allocation27_spill]] %s6803_s20 }
  0x2d   :  { %9060 = sst [smem:[#allocation28_spill]] %s6808_s27 }
  0x2e   :  { %s6823_s20 = sld [smem:[%s8880_s0 + %s6643_s15]]   ;;  %s6647_s15 = smov 31  }
  0x2f   :  { %9061 = sst [smem:[#allocation29_spill]] %s6818_s17 }
  0x30   :  { %s6828_s27 = sld [smem:[%s8880_s0 + %s6644_s22]]   ;;  %s6648_s22 = smov 32  }
  0x31   :  { %s6838_s17 = sld [smem:[%s8880_s0 + %s6646_s7]]   ;;  %s6650_s7 = smov 34  }
  0x34   :  { %9062 = sst [smem:[#allocation30_spill]] %s6823_s20 }
  0x35   :  { %s6843_s20 = sld [smem:[%s8880_s0 + %s6647_s15]]  }
  0x36   :  { %9063 = sst [smem:[#allocation31_spill]] %s6828_s27 }
  0x37   :  { %9064 = sst [smem:[#allocation32_spill]] %s6838_s17 }
  0x38   :  { %s6848_s27 = sld [smem:[%s8880_s0 + %s6648_s22]]  }
  0x39   :  { %s6858_s17 = sld [smem:[%s8880_s0 + %s6650_s7]]  }
  0x3a   :  { %74 = vsyncpa [#allocation3], 0 }
  0x3b   :  { %75 = vsyncpa [#allocation5], 0 }
  0x3c   :  { %76 = vsyncpa [#allocation8], 0 }
  0x3d   :  { %77 = vsyncpa [#allocation11], 0  ;;  %s6651_s15 = smov [#allocation4]  }
  0x3e   :  { %s107_s16 = sshll.u32 %s6651_s15, 4  ;;  %s108_s16 = int_to_ptr.vmem [resolvable:$true] %s107_s16 }
  0x3f   :  { %s6497_s18 = scalar_lea.vmem %s108_s16, 256  ;;  %p6502_p1 = scmp.lt.s32.totalorder %s108_s16, %s108_s16 }
  0x40   :  { %p6498_p0 = scmp.ne.s32.totalorder %s108_s16, %s6497_s18  ;;  %p6503_p2 = scmp.lt.s32.totalorder %s6497_s18, %s6497_s18 }
  0x42   :  { %p6504_p3 = por %p6503_p2, %p6502_p1 }
  0x44   :  { %p6505_p4 = pnand %p6504_p3, %p6498_p0 }
  0x46   :  { %6508 = shalt.err (!%p6505_p4)
}
  0x47   :  { %s6652_s22 = smov 64   ;;  %s6653_s23 = smov 4  }
  0x48   :  { %113 = dma.hbm_to_vmem [thread:$0]  %s6723_s3, 256, %s108_s16, [#allocation5], %s6652_s22, %s6652_s22, %s6653_s23  }
  0x49   :  { %s6654_s0 = smov [#allocation7]   ;;  %s6655_s28 = smov [#allocation2]  }
  0x4a   :  { %s163_s26 = sshll.u32 %s6654_s0, 4  ;;  %s91_s1 = sshll.u32 %s6655_s28, 4  ;;  %s164_s26 = int_to_ptr.vmem [resolvable:$true] %s163_s26  ;;  %s92_s1 = int_to_ptr.vmem [resolvable:$true] %s91_s1 }
  0x4b   :  { %s6517_s2 = scalar_lea.vmem %s164_s26, 256  ;;  %p6522_p6 = scmp.lt.s32.totalorder %s164_s26, %s164_s26 }
  0x4c   :  { %p6518_p5 = scmp.ne.s32.totalorder %s164_s26, %s6517_s2  ;;  %p6523_p7 = scmp.lt.s32.totalorder %s6517_s2, %s6517_s2 }
  0x4e   :  { %p6524_p8 = por %p6523_p7, %p6522_p6 }
  0x50   :  { %p6525_p9 = pnand %p6524_p8, %p6518_p5 }
  0x52   :  { %6528 = shalt.err (!%p6525_p9)
}
  0x53   :  { %s6656_s7 = smov 128   ;;  %s6657_s10 = smov 8  }
  0x54   :  { %169 = dma.hbm_to_vmem [thread:$0]  %s6813_s4, 256, %s164_s26, [#allocation8], %s6656_s7, %s6656_s7, %s6657_s10  }
  0x55   :  { %s6537_s11 = scalar_lea.vmem %s92_s1, 4096  ;;  %p6542_p11 = scmp.lt.s32.totalorder %s92_s1, %s92_s1 }
  0x56   :  { %p6538_p10 = scmp.ne.s32.totalorder %s92_s1, %s6537_s11  ;;  %p6543_p12 = scmp.lt.s32.totalorder %s6537_s11, %s6537_s11 }
  0x58   :  { %p6544_p13 = por %p6543_p12, %p6542_p11 }
  0x5a   :  { %p6545_p0 = pnand %p6544_p13, %p6538_p10 }
  0x5c   :  { %6548 = shalt.err (!%p6545_p0)
}
  0x5d   :  { %s6658_s3 = smov 256   ;;  %s6659_s15 = smov 16  }
  0x5e   :  { %97 = dma.hbm_to_vmem [thread:$0]  %s6708_s21, 4096, %s92_s1, [#allocation3], %s6658_s3, %s6658_s3, %s6659_s15  }
  0x5f   :  { %s6660_s16 = smov [#allocation6]   ;;  %s6661_s22 = smov [#allocation9]  }
  0x60   :  { %s125_s18 = sshll.u32 %s6660_s16, 4  ;;  %s182_s23 = sshll.u32 %s6661_s22, 4  ;;  %s126_s18 = int_to_ptr.vmem [resolvable:$true] %s125_s18  ;;  %s183_s23 = int_to_ptr.vmem [resolvable:$true] %s182_s23 }
  0x61   :  { %s6557_s0 = scalar_lea.vmem %s126_s18, 256  ;;  %p6562_p2 = scmp.lt.s32.totalorder %s126_s18, %s126_s18 }
  0x62   :  { %p6558_p1 = scmp.ne.s32.totalorder %s126_s18, %s6557_s0  ;;  %p6563_p3 = scmp.lt.s32.totalorder %s6557_s0, %s6557_s0 }
  0x64   :  { %p6564_p4 = por %p6563_p3, %p6562_p2 }
  0x66   :  { %p6565_p5 = pnand %p6564_p4, %p6558_p1 }
  0x68   :  { %6568 = shalt.err (!%p6565_p5)
}
  0x69   :  { %131 = dma.hbm_to_vmem [thread:$0]  %s6743_s24, 256, %s126_s18, [#allocation5], %s6656_s7, %s6656_s7, %s6657_s10  }
  0x6a   :  { %s6577_s4 = scalar_lea.vmem %s183_s23, 64  ;;  %p6582_p7 = scmp.lt.s32.totalorder %s183_s23, %s183_s23 }
  0x6b   :  { %p6578_p6 = scmp.ne.s32.totalorder %s183_s23, %s6577_s4  ;;  %p6583_p8 = scmp.lt.s32.totalorder %s6577_s4, %s6577_s4 }
  0x6d   :  { %p6584_p9 = por %p6583_p8, %p6582_p7 }
  0x6f   :  { %p6585_p10 = pnand %p6584_p9, %p6578_p6 }
  0x71   :  { %6588 = shalt.err (!%p6585_p10)
}
  0x72   :  { %185 = dma.hbm_to_vmem [thread:$0]  %s6833_s12, 64, %s183_s23, [#allocation8]  }
  0x73   :  { %s6662_s21 = smov [#allocation10]  }
  0x74   :  { %s196_s26 = sshll.u32 %s6662_s21, 4  ;;  %s197_s26 = int_to_ptr.vmem [resolvable:$true] %s196_s26 }
  0x75   :  { %s6597_s28 = scalar_lea.vmem %s197_s26, 32  ;;  %p6602_p12 = scmp.lt.s32.totalorder %s197_s26, %s197_s26 }
  0x76   :  { %p6598_p11 = scmp.ne.s32.totalorder %s197_s26, %s6597_s28  ;;  %p6603_p13 = scmp.lt.s32.totalorder %s6597_s28, %s6597_s28 }
  0x78   :  { %p6604_p0 = por %p6603_p13, %p6602_p12 }
  0x7a   :  { %p6605_p1 = pnand %p6604_p0, %p6598_p11 }
  0x7c   :  { %6608 = shalt.err (!%p6605_p1)
}
  0x7d   :  { %199 = dma.hbm_to_vmem [thread:$0]  %s6848_s27, 32, %s197_s26, [#allocation11]  }
  0x7e   :  { %6609 = dma.done.wait [#allocation3], 4096  }
  0x7f   :  { %6610 = vsyncadd [#allocation3], 4294963200 }
  0x80   :  { %6611 = dma.done.wait [#allocation5], 512  }
  0x81   :  { %6612 = vsyncadd [#allocation5], 4294966784 }
  0x82   :  { %6613 = dma.done.wait [#allocation8], 320  }
  0x83   :  { %6614 = vsyncadd [#allocation8], 4294966976 }
  0x84   :  { %6615 = dma.done.wait [#allocation11], 32  }
  0x85   :  { %6616 = vsyncadd [#allocation11], 4294967264  ;;  %v6870_v0 = vld [vmem:[%s6688_s5] sm:$0xff]  ;;  %v6873_v1 = vld [vmem:[%s6688_s5 + $0x8] sm:$0xff]  ;;  %s6663_s24 = smov 113   ;;  %s6664_s12 = smov 111   ;;  %v8942_v8 = vlaneseq }
  0x86   :  { %v6876_v2 = vld [vmem:[%s6688_s5 + $0x10] sm:$0xff]  ;;  %v5800_v3 = vpack.i.bf16 %v6873_v1, %v6870_v0  ;;  %v6881_v4 = vld [vmem:[%s6688_s5 + $0x18] sm:$0xff]  ;;  %s6665_s27 = smov 112   ;;  %s6666_s5 = smov 127   ;;  %v8981_v6 = vmov 0   ;;  %v491_v7 = vld [vmem:[%s6718_s29] sm:$0xff] }
  0x87   :  { %v5805_v5 = vpack.i.bf16 %v6881_v4, %v6876_v2  ;;  %s6667_s1 = smov 15   ;;  %s6668_s2 = smov 1   ;;  %546 = vmatprep.mubr.bf16.mxu0 %v8981_v6  ;;  %587 = vmatprep.mubr.bf16.mxu1 %v8981_v6  ;;  %v6907_v9 = vand.u32 127, %v8942_v8  ;;  %vm8904_vm1 = vcmask 1043456   ;;  %v9065_v22 = vmov 0 }
  0x88   :  { %5801 = vrot.lane.b32.xlu1 %v5800_v3, %s6663_s24  ;;  %5791 = vrot.lane.b32.xlu0 %v5800_v3, %s6664_s12  ;;  %s6670_s7 = smov 17   ;;  %v9067_v23 = vmov 0  ;;  %v9069_v25 = vmov 0  ;;  %v9072_v26 = vmov 0  ;;  %v9074_v31 = vmov 0  ;;  %s6674_s29 = smov 7  }
  0x89   :  { %5870 = vset.pattern.permute.xlu0 %v8981_v6  ;;  %5871 = vset.pattern.permute.xlu1 %v8981_v6  ;;  %v227_v10 = vadd.s32 128, %v6907_v9  ;;  %v229_v11 = vadd.s32 384, %v6907_v9  ;;  %v6912_v12 = vand.u32 15, %v6907_v9  ;;  %v6915_v15 = vadd.s32 256, %v6907_v9  ;;  %s6675_s11 = smov 121   ;;  %s6676_s3 = smov 9  }
  0x8a   :  { %vm8895_vm0 = vcmp.lt.s32.totalorder %v6907_v9, 111  ;;  %vm8903_vm3 = vcmp.lt.s32.totalorder %v6907_v9, 113  ;;  %vm8896_vm6 = vcmp.lt.s32.totalorder %v6907_v9, 112  ;;  %v9077_v32 = vmov 0  ;;  %s9320_s16 = sld [smem:[#allocation23_spill]] }
  0x8b   :  { %v231_v13 = vand.u32 15, %v227_v10  ;;  %v235_v14 = vand.u32 255, %v227_v10  ;;  %v233_v16 = vand.u32 15, %v229_v11  ;;  %v237_v17 = vand.u32 255, %v229_v11  ;;  %s9321_s18 = sld [smem:[#allocation24_spill]] }
  0x8c   :  { %5806 = vrot.lane.b32.xlu1 %v5805_v5, %s6663_s24  ;;  %5796 = vrot.lane.b32.xlu0 %v5805_v5, %s6664_s12  ;;  %vm8894_vm2 = vcmp.lt.s32.totalorder %v6912_v12, 15  ;;  %v232_v24 = vand.u32 15, %v6915_v15  ;;  %v9080_v36 = vmov 0  ;;  %v9083_v39 = vmov 0  ;;  %s9322_s22 = sld [smem:[#allocation19_spill]] }
  0x8d   :  { %vm6922_vm4 = vcmp.lt.s32.totalorder %v231_v13, 15  ;;  %vm6926_vm5 = vcmp.lt.s32.totalorder %v235_v14, 240  ;;  %vm6932_vm7 = vcmp.lt.s32.totalorder %v233_v16, 15  ;;  %vm6936_vm8 = vcmp.lt.s32.totalorder %v237_v17, 240  ;;  %s9323_s23 = sld [smem:[#allocation17_spill]] }
  0x8e   :  { %v9066_v22 = vsel %vm6922_vm4, 4294967295, %v9065_v22  ;;  %v9068_v23 = vsel %vm6926_vm5, 4294967295, %v9067_v23  ;;  %v9070_v25 = vsel %vm6932_vm7, 4294967295, %v9069_v25  ;;  %v9073_v26 = vsel %vm6936_vm8, 4294967295, %v9072_v26  ;;  %vm6961_vm13 = vmand %vm6926_vm5, %vm6922_vm4  ;;  %s9326_s0 = sld [smem:[#allocation25_spill]] }
  0x8f   :  { %9071 = vst [vmem:[#allocation33_spill] sm:$0xff] %v9070_v25  ;;  %vm6947_vm10 = vcmp.ge.s32.totalorder %v231_v13, 1  ;;  %vm6951_vm11 = vcmp.ge.s32.totalorder %v233_v16, 1  ;;  %v9081_v36 = vsel %vm6961_vm13, 4294967295, %v9080_v36  ;;  %vm6967_vm14 = vcmp.lt.s32.totalorder %v232_v24, 15  ;;  %s9338_s4 = sld [smem:[#allocation28_spill]] }
  0x90   :  { %5816 = vrot.lane.b32.xlu1 %v5805_v5, %s6665_s27  ;;  %5811 = vrot.lane.b32.xlu0 %v5800_v3, %s6665_s27  ;;  %v9075_v31 = vsel %vm6947_vm10, 4294967295, %v9074_v31  ;;  %v9078_v32 = vsel %vm6951_vm11, 4294967295, %v9077_v32  ;;  %9082 = vst [vmem:[#allocation36_spill] sm:$0xff] %v9081_v36  ;;  %v9084_v39 = vsel %vm6967_vm14, 4294967295, %v9083_v39  ;;  %vm6971_vm15 = vcmp.ge.s32.totalorder %v232_v24, 1  ;;  %vm6999_vm9 = vmand %vm6926_vm5, %vm6947_vm10  ;;  %s9339_s21 = sld [smem:[#allocation26_spill]] }
  0x91   :  { %9076 = vst [vmem:[#allocation34_spill] sm:$0xff] %v9075_v31  ;;  %9079 = vst [vmem:[#allocation35_spill] sm:$0xff] %v9078_v32  ;;  %v9086_v40 = vmov 0  ;;  %v9089_v43 = vmov 0  ;;  %v234_v45 = vand.u32 255, %v6907_v9  ;;  %v9092_v52 = vmov 0 }
  0x92   :  { %9085 = vst [vmem:[#allocation37_spill] sm:$0xff] %v9084_v39  ;;  %v9087_v40 = vsel %vm6971_vm15, 4294967295, %v9086_v40  ;;  %v9093_v52 = vsel %vm6999_vm9, 4294967295, %v9092_v52  ;;  %v9094_v61 = vmov 0  ;;  %vm9096_vm12 = vcmp.lt.s32.totalorder %v6907_v9, 112  ;;  %s9448_s26 = sld [smem:[#allocation30_spill]] }
  0x93   :  { %9088 = vst [vmem:[#allocation38_spill] sm:$0xff] %v9087_v40  ;;  %s9449_s28 = sld [smem:[#allocation31_spill]] }
  0x94   :  { %5826 = vrot.lane.b32.xlu1 %v5805_v5, %s6666_s5  ;;  %5821 = vrot.lane.b32.xlu0 %v5800_v3, %s6666_s5 }
  0x98   :  { %5836 = vrot.lane.b32.xlu1 %v5805_v5, %s6667_s1  ;;  %5831 = vrot.lane.b32.xlu0 %v5800_v3, %s6667_s1 }
  0x9c   :  { %5846 = vrot.lane.b32.xlu1 %v5805_v5, %s6668_s2  ;;  %5841 = vrot.lane.b32.xlu0 %v5800_v3, %s6668_s2 }
  0xa0   :  { %5856 = vrot.lane.b32.xlu1 %v5805_v5, %s6670_s7  ;;  %5851 = vrot.lane.b32.xlu0 %v5800_v3, %s6670_s7 }
  0xa4   :  { %5866 = vrot.lane.b32.xlu1 %v5805_v5, %s6659_s15  ;;  %5861 = vrot.lane.b32.xlu0 %v5800_v3, %s6659_s15 }
  0xa8   :  { %494 = vperm.xlu0 %5870, %v491_v7  }
  0xfa   :  { %v6917_v18 = vpop.permute.xlu1 %5801  ;;  %v5792_v19 = vpop.permute.xlu0 %5791 }
  0xfb   :  { %v5794_v20 = vunpack.i.h.bf16 %v5792_v19  ;;  %v5793_v21 = vunpack.i.l.bf16 %v5792_v19  ;;  %v5804_v37 = vunpack.i.h.bf16 %v6917_v18  ;;  %v5803_v41 = vunpack.i.l.bf16 %v6917_v18 }
  0xfd   :  { %v456_v27 = vsel %vm8895_vm0, %v5793_v21, %v5794_v20 }
  0xfe   :  { %v6942_v28 = vpop.permute.xlu1 %5806  ;;  %v5797_v29 = vpop.permute.xlu0 %5796  ;;  %v466_v30 = vsel %vm8894_vm2, %v456_v27, 0.0  ;;  %vm6982_vm2 = vmand %vm6936_vm8, %vm6932_vm7 }
  0xff   :  { %v5808_v33 = vunpack.i.l.bf16 %v6942_v28  ;;  %v5799_v34 = vunpack.i.h.bf16 %v5797_v29  ;;  %v5798_v35 = vunpack.i.l.bf16 %v5797_v29  ;;  %v5809_v38 = vunpack.i.h.bf16 %v6942_v28 }
 0x100   :  { %v9090_v43 = vsel %vm6982_vm2, 4294967295, %v9089_v43  ;;  %v486_v44 = vpack.c.bf16 %v466_v30, %v466_v30  ;;  %v9099_v28 = vmov 0 }
 0x101   :  { %v455_v42 = vsel %vm8895_vm0, %v5794_v20, %v5798_v35  ;;  %9091 = vst [vmem:[#allocation39_spill] sm:$0xff] %v9090_v43  ;;  %v405_v46 = vsel %vm8903_vm3, %v5804_v37, %v5808_v33  ;;  %v457_v50 = vsel %vm8895_vm0, %v5799_v34, %v5793_v21  ;;  %v454_v51 = vsel %vm8895_vm0, %v5798_v35, %v5799_v34  ;;  %vm7013_vm0 = vmand %vm6936_vm8, %vm6951_vm11 }
 0x102   :  { %v5817_v47 = vpop.permute.xlu1 %5816  ;;  %v5812_v48 = vpop.permute.xlu0 %5811  ;;  %v467_v49 = vsel %vm6961_vm13, %v455_v42, 0.0  ;;  %v407_v57 = vsel %vm8903_vm3, %v5809_v38, %v5803_v41  ;;  %v469_v59 = vsel %vm6982_vm2, %v457_v50, 0.0  ;;  %v468_v60 = vsel %vm6967_vm14, %v454_v51, 0.0  ;;  %vm9097_vm2 = vmpackc.low %vm6926_vm5, %vm6999_vm9 }
 0x103   :  { %v5819_v53 = vunpack.i.h.bf16 %v5817_v47  ;;  %v5818_v54 = vunpack.i.l.bf16 %v5817_v47  ;;  %v5814_v55 = vunpack.i.h.bf16 %v5812_v48  ;;  %v5813_v56 = vunpack.i.l.bf16 %v5812_v48 }
 0x104   :  { %v487_v58 = vpack.c.bf16 %v467_v49, %v467_v49  ;;  %v9095_v61 = vsel %vm7013_vm0, 4294967295, %v9094_v61  ;;  %v503_v5 = vsel %vm8904_vm1, %v486_v44, 0  ;;  %v489_v7 = vpack.c.bf16 %v469_v59, %v469_v59 }
 0x105   :  { %v430_v62 = vsel %vm8896_vm6, %v5814_v55, %v5818_v54  ;;  %v431_v63 = vsel %vm8896_vm6, %v5813_v56, %v5814_v55  ;;  %v432_v3 = vsel %vm8896_vm6, %v5819_v53, %v5813_v56  ;;  %v488_v13 = vpack.c.bf16 %v468_v60, %v468_v60 }
 0x106   :  { %4747 = vmatprep.subr.msk.bf16.mxu0 %vm8904_vm1, %v487_v58  ;;  %v5827_v10 = vpop.permute.xlu1 %5826  ;;  %v5822_v11 = vpop.permute.xlu0 %5821  ;;  %v4749_v14 = vpack.c.bf16 %v430_v62, %v405_v46  ;;  %v4775_v16 = vpack.c.bf16 %v432_v3, %v407_v57  ;;  %v406_v21 = vsel %vm8903_vm3, %v5803_v41, %v5804_v37  ;;  %v429_v24 = vsel %vm9096_vm12, %v5818_v54, %v5819_v53 }
 0x107   :  { %v5829_v17 = vunpack.i.h.bf16 %v5827_v10  ;;  %v5828_v18 = vunpack.i.l.bf16 %v5827_v10  ;;  %v5824_v19 = vunpack.i.h.bf16 %v5822_v11  ;;  %v5823_v20 = vunpack.i.l.bf16 %v5822_v11  ;;  %521 = vmatpush1.bf16.msra.mxu0 %v503_v5  ;;  %4773 = vmatprep.subr.msk.bf16.mxu1 %vm8904_vm1, %v489_v7 }
 0x108   :  { %v509_v27 = vsel %vm8904_vm1, %v488_v13, 0  ;;  %4750 = vmatprep.subr.msk.bf16.mxu0 %vm9097_vm2, %v4749_v14  ;;  %vm8911_vm13 = vmmov 1   ;;  %vm9098_vm11 = vcmp.ge.s32.totalorder %v6912_v12, 1  ;;  %vm9102_vm12 = vcmp.lt.s32.totalorder %v6907_v9, 127 }
 0x109   :  { %vm7047_vm6 = vmpackc.low %vm8911_vm13, %vm9098_vm11  ;;  %v380_v29 = vsel %vm9102_vm12, %v5824_v19, %v5828_v18  ;;  %562 = vmatpush1.bf16.msra.mxu1 %v509_v27  ;;  %v4752_v34 = vpack.c.bf16 %v431_v63, %v406_v21  ;;  %v9104_v35 = vmov 0  ;;  %v236_v37 = vand.u32 255, %v6915_v15 }
 0x10a   :  { %v9100_v28 = vsel %vm7047_vm6, 4294967295, %v9099_v28  ;;  %vm9103_vm3 = vmmov %vm9102_vm12  ;;  %vm9107_vm11 = vcmp.lt.s32.totalorder %v6907_v9, 113  ;;  %v5837_v44 = vpop.permute.xlu1 %5836  ;;  %v5832_v46 = vpop.permute.xlu0 %5831  ;;  %v9110_v47 = vmov 0  ;;  %v4755_v15 = vpack.c.bf16 %v380_v29, %v6873_v1 }
 0x10b   :  { %9101 = vst [vmem:[#allocation40_spill] sm:$0xff] %v9100_v28  ;;  %v382_v30 = vsel %vm9103_vm3, %v5829_v17, %v5823_v20  ;;  %vm7058_vm2 = vmpackc.low %vm6922_vm4, %vm8911_vm13  ;;  %v404_v41 = vsel %vm9107_vm11, %v5808_v33, %v5809_v38  ;;  %4753 = vmatpush1.bf16.msk.msra.mxu0 %vm7047_vm6, %v4752_v34  ;;  %v9113_v49 = vmov 0  ;;  %v9116_v50 = vmov 0 }
 0x10c   :  { %v9105_v35 = vsel %vm7058_vm2, 4294967295, %v9104_v35  ;;  %vm9108_vm1 = vmmov %vm9103_vm3  ;;  %v4781_v33 = vpack.c.bf16 %v382_v30, %v6881_v4  ;;  %v4778_v48 = vpack.c.bf16 %v429_v24, %v404_v41  ;;  %v5839_v1 = vunpack.i.h.bf16 %v5837_v44  ;;  %4756 = vmatprep.subr.msk.bf16.mxu0 %vm7058_vm2, %v4755_v15 }
 0x10d   :  { %9106 = vst [vmem:[#allocation41_spill] sm:$0xff] %v9105_v35  ;;  %v381_v42 = vsel %vm9108_vm1, %v5823_v20, %v5824_v19  ;;  %vm9109_vm3 = vmpackc.low %vm6936_vm8, %vm7013_vm0  ;;  %v379_v38 = vsel %vm9108_vm1, %v5828_v18, %v5829_v17  ;;  %v5838_v4 = vunpack.i.l.bf16 %v5837_v44  ;;  %v5834_v51 = vunpack.i.h.bf16 %v5832_v46 }
 0x10e   :  { %4776 = vmatprep.subr.msk.bf16.mxu1 %vm9109_vm3, %v4775_v16  ;;  %vm7075_vm12 = vmpackc.low %vm8911_vm13, %vm6971_vm15  ;;  %vm7092_vm3 = vcmp.ge.s32.totalorder %v234_v45, 16  ;;  %v5833_v53 = vunpack.i.l.bf16 %v5832_v46  ;;  %vm9119_vm1 = vcmp.lt.s32.totalorder %v6912_v12, 15  ;;  %v9120_v54 = vmov 0  ;;  %v5847_v57 = vpop.permute.xlu1 %5846  ;;  %v5842_v58 = vpop.permute.xlu0 %5841 }
 0x10f   :  { %v9111_v47 = vsel %vm7075_vm12, 4294967295, %v9110_v47  ;;  %vm7088_vm11 = vmpackc.low %vm6932_vm7, %vm8911_vm13  ;;  %v9117_v50 = vsel %vm7092_vm3, 4294967295, %v9116_v50  ;;  %4779 = vmatpush1.bf16.msk.msra.mxu1 %vm7075_vm12, %v4778_v48  ;;  %v4758_v45 = vpack.c.bf16 %v381_v42, %v6870_v0  ;;  %v9123_v55 = vmov 0 }
 0x110   :  { %9112 = vst [vmem:[#allocation42_spill] sm:$0xff] %v9111_v47  ;;  %v9114_v49 = vsel %vm7088_vm11, 4294967295, %v9113_v49  ;;  %9118 = vst [vmem:[#allocation44_spill] sm:$0xff] %v9117_v50  ;;  %vm7116_vm2 = vcmp.ge.s32.totalorder %v236_v37, 16  ;;  %v9126_v56 = vmov 0  ;;  %4782 = vmatprep.subr.msk.bf16.mxu1 %vm7088_vm11, %v4781_v33  ;;  %v4784_v0 = vpack.c.bf16 %v379_v38, %v6876_v2 }
 0x111   :  { %9115 = vst [vmem:[#allocation43_spill] sm:$0xff] %v9114_v49  ;;  %vm7101_vm6 = vmpackc.low %vm9119_vm1, %vm8911_vm13  ;;  %v9127_v56 = vsel %vm7116_vm2, 4294967295, %v9126_v56  ;;  %v5849_v59 = vunpack.i.h.bf16 %v5847_v57  ;;  %v5848_v60 = vunpack.i.l.bf16 %v5847_v57  ;;  %v5844_v62 = vunpack.i.h.bf16 %v5842_v58 }
 0x112   :  { %v9121_v54 = vsel %vm7101_vm6, 4294967295, %v9120_v54  ;;  %vm7112_vm9 = vmpackc.low %vm6967_vm14, %vm8911_vm13  ;;  %9128 = vst [vmem:[#allocation47_spill] sm:$0xff] %v9127_v56  ;;  %v5843_v63 = vunpack.i.l.bf16 %v5842_v58  ;;  %4759 = vmatpush1.bf16.msk.msra.mxu0 %vm7101_vm6, %v4758_v45  ;;  %v9130_v3 = vmov 0  ;;  %vm9133_vm11 = vcmp.lt.s32.totalorder %v6907_v9, 15  ;;  %v5857_v18 = vpop.permute.xlu1 %5856  ;;  %v5852_v19 = vpop.permute.xlu0 %5851 }
 0x113   :  { %9122 = vst [vmem:[#allocation45_spill] sm:$0xff] %v9121_v54  ;;  %v9124_v55 = vsel %vm7112_vm9, 4294967295, %v9123_v55  ;;  %vm9129_vm0 = vmmov %vm9119_vm1  ;;  %v329_v2 = vsel %vm9133_vm11, %v5838_v4, %v5839_v1  ;;  %v9137_v11 = vmov 0  ;;  %vm9140_vm6 = vcmp.lt.s32.totalorder %v6907_v9, 1  ;;  %4785 = vmatpush1.bf16.msk.msra.mxu1 %vm7112_vm9, %v4784_v0 }
 0x114   :  { %9125 = vst [vmem:[#allocation46_spill] sm:$0xff] %v9124_v55  ;;  %vm7134_vm1 = vmand %vm7092_vm3, %vm9129_vm0  ;;  %v354_v13 = vsel %vm9140_vm6, %v5848_v60, %v5849_v59  ;;  %v9146_v24 = vmov 0  ;;  %v5859_v30 = vunpack.i.h.bf16 %v5857_v18  ;;  %v5858_v34 = vunpack.i.l.bf16 %v5857_v18  ;;  %v6231_v18 = vld [vmem:[%s6693_s9 + $0x70] sm:$0xff]  }
 0x115   :  { %v9131_v3 = vsel %vm7134_vm1, 4294967295, %v9130_v3  ;;  %vm9134_vm13 = vmmov %vm9133_vm11  ;;  %v4787_v21 = vpack.c.bf16 %v354_v13, %v329_v2  ;;  %v5854_v37 = vunpack.i.h.bf16 %v5852_v19  ;;  %v5853_v41 = vunpack.i.l.bf16 %v5852_v19  ;;  %v6227_v13 = vld [vmem:[%s6693_s9 + $0x78] sm:$0xff]   ;;  %v6232_v19 = vld [vmem:[%s6693_s9 + $0xf0] sm:$0xff]  }
 0x116   :  { %9132 = vst [vmem:[#allocation48_spill] sm:$0xff] %v9131_v3  ;;  %v330_v5 = vsel %vm9134_vm13, %v5834_v51, %v5838_v4  ;;  %vm9135_vm12 = vmmov %vm9133_vm11  ;;  %v9151_v42 = vmov 0  ;;  %v5867_v44 = vpop.permute.xlu1 %5866  ;;  %v5862_v46 = vpop.permute.xlu0 %5861  ;;  %v9155_v15 = vmov 0  ;;  %v9158_v4 = vmov 0 }
 0x117   :  { %v331_v7 = vsel %vm9135_vm12, %v5833_v53, %v5834_v51  ;;  %vm9136_vm5 = vmmov %vm9133_vm11  ;;  %v5869_v33 = vunpack.i.h.bf16 %v5867_v44  ;;  %v5868_v38 = vunpack.i.l.bf16 %v5867_v44  ;;  %v5864_v48 = vunpack.i.h.bf16 %v5862_v46  ;;  %v6241_v44 = vld [vmem:[%s6693_s9 + $0x20] sm:$0xff]  }
 0x118   :  { %v332_v10 = vsel %vm9136_vm5, %v5839_v1, %v5833_v53  ;;  %vm7150_vm0 = vmand %vm7116_vm2, %vm6967_vm14  ;;  %vm9144_vm5 = vnez %v9078_v32  ;;  %v5863_v1 = vunpack.i.l.bf16 %v5862_v46  ;;  %v9165_v58 = vmov 0  ;;  %v6242_v46 = vld [vmem:[%s6693_s9 + $0xa0] sm:$0xff]  }
 0x119   :  { %v9138_v11 = vsel %vm7150_vm0, 4294967295, %v9137_v11  ;;  %vm9141_vm11 = vmmov %vm9140_vm6 }
 0x11a   :  { %9139 = vst [vmem:[#allocation49_spill] sm:$0xff] %v9138_v11  ;;  %v355_v14 = vsel %vm9141_vm11, %v5844_v62, %v5848_v60  ;;  %vm9142_vm13 = vmmov %vm9140_vm6 }
 0x11b   :  { %v356_v16 = vsel %vm9142_vm13, %v5843_v63, %v5844_v62  ;;  %vm9143_vm12 = vmmov %vm9140_vm6  ;;  %vm9145_vm6 = vcmp.ge.s32.totalorder %v6912_v12, 1  ;;  %v4790_v29 = vpack.c.bf16 %v355_v14, %v330_v5  ;;  %vm9150_vm13 = vmmov 1   ;;  %v6228_v14 = vld [vmem:[%s6693_s9 + $0xf8] sm:$0xff]  }
 0x11c   :  { %v357_v17 = vsel %vm9143_vm12, %v5849_v59, %v5843_v63  ;;  %vm8921_vm14 = vmpackc.low %vm9144_vm5, %vm6932_vm7  ;;  %v4761_v20 = vpack.c.bf16 %v356_v16, %v331_v7  ;;  %vm9168_vm7 = vcmp.lt.s32.totalorder %v6907_v9, 16  ;;  %v6229_v16 = vld [vmem:[%s6693_s9 + $0x38] sm:$0xff]  }
 0x11d   :  { %vm7172_vm11 = vmpackc.low %vm9145_vm6, %vm7134_vm1  ;;  %v4764_v27 = vpack.c.bf16 %v357_v17, %v332_v10  ;;  %4788 = vmatprep.subr.msk.bf16.mxu1 %vm8921_vm14, %v4787_v21  ;;  %vm9161_vm14 = vcmp.lt.s32.totalorder %v6907_v9, 17  ;;  %v304_v0 = vsel %vm9168_vm7, %v5868_v38, %v5869_v33  ;;  %v490_v10 = vld [vmem:[%s6713_s25] sm:$0xf]  ;;  %v6230_v17 = vld [vmem:[%s6693_s9 + $0xb8] sm:$0xff]   ;;  %s6673_s25 = smov 119  }
 0x11e   :  { %v9147_v24 = vsel %vm7172_vm11, 4294967295, %v9146_v24  ;;  %vm9149_vm12 = vmpackc.low %vm6947_vm10, %vm6922_vm4  ;;  %v279_v51 = vsel %vm9161_vm14, %v5858_v34, %v5859_v30  ;;  %v6234_v21 = vld [vmem:[%s6693_s9 + $0xb0] sm:$0xff]  }
 0x11f   :  { %9148 = vst [vmem:[#allocation50_spill] sm:$0xff] %v9147_v24  ;;  %4762 = vmatprep.subr.msk.bf16.mxu0 %vm9149_vm12, %v4761_v20  ;;  %vm7196_vm9 = vmpackc.low %vm9150_vm13, %vm6947_vm10  ;;  %v4793_v2 = vpack.c.bf16 %v304_v0, %v279_v51  ;;  %v6233_v20 = vld [vmem:[%s6693_s9 + $0x30] sm:$0xff]   ;;  %v6251_v0 = vld [vmem:[%s6693_s9 + $0x48] sm:$0xff]  }
 0x120   :  { %4765 = vmatpush1.bf16.msk.msra.mxu0 %vm7172_vm11, %v4764_v27  ;;  %v9152_v42 = vsel %vm7196_vm9, 4294967295, %v9151_v42  ;;  %vm9154_vm12 = vmpackc.low %vm6971_vm15, %vm7150_vm0  ;;  %v6235_v27 = vld [vmem:[%s6693_s9 + $0x68] sm:$0xff]   ;;  %v6247_v51 = vld [vmem:[%s6693_s9 + $0x50] sm:$0xff]  }
 0x121   :  { %9153 = vst [vmem:[#allocation51_spill] sm:$0xff] %v9152_v42  ;;  %4791 = vmatpush1.bf16.msk.msra.mxu1 %vm9154_vm12, %v4790_v29  ;;  %vm7210_vm11 = vmand %vm7092_vm3, %vm9145_vm6  ;;  %v6236_v29 = vld [vmem:[%s6693_s9 + $0xe8] sm:$0xff]  }
 0x122   :  { %v9156_v15 = vsel %vm7210_vm11, 4294967295, %v9155_v15  ;;  %vm7218_vm12 = vmand %vm7116_vm2, %vm6971_vm15 }
 0x123   :  { %9157 = vst [vmem:[#allocation52_spill] sm:$0xff] %v9156_v15  ;;  %v9159_v4 = vsel %vm7218_vm12, 4294967295, %v9158_v4  ;;  %vm9162_vm6 = vmmov %vm9161_vm14 }
 0x124   :  { %9160 = vst [vmem:[#allocation53_spill] sm:$0xff] %v9159_v4  ;;  %v280_v53 = vsel %vm9162_vm6, %v5854_v37, %v5858_v34  ;;  %vm9163_vm0 = vmmov %vm9162_vm6  ;;  %v6238_v34 = vld [vmem:[%s6693_s9 + $0xa8] sm:$0xff]  }
 0x125   :  { %v281_v45 = vsel %vm9163_vm0, %v5853_v41, %v5854_v37  ;;  %vm9164_vm1 = vmmov %vm9163_vm0  ;;  %v6239_v37 = vld [vmem:[%s6693_s9 + $0x60] sm:$0xff]  }
 0x126   :  { %v282_v57 = vsel %vm9164_vm1, %v5859_v30, %v5853_v41  ;;  %vm7233_vm10 = vmpackc.low %vm9150_vm13, %vm9144_vm5  ;;  %v6237_v30 = vld [vmem:[%s6693_s9 + $0x28] sm:$0xff]   ;;  %v6240_v41 = vld [vmem:[%s6693_s9 + $0xe0] sm:$0xff]  }
 0x127   :  { %v9166_v58 = vsel %vm7233_vm10, 4294967295, %v9165_v58  ;;  %vm9169_vm14 = vmmov %vm9168_vm7  ;;  %4794 = vmatprep.subr.msk.bf16.mxu1 %vm7233_vm10, %v4793_v2  ;;  %v6256_v2 = vld [vmem:[%s6693_s9 + $0xc0] sm:$0xff]   ;;  %vm9182_vm10 = vcmask 1043456  }
 0x128   :  { %9167 = vst [vmem:[#allocation54_spill] sm:$0xff] %v9166_v58  ;;  %v305_v59 = vsel %vm9169_vm14, %v5864_v48, %v5868_v38  ;;  %vm9170_vm6 = vmmov %vm9168_vm7  ;;  %vm8933_vm14 = vcmask 588800   ;;  %v6244_v38 = vld [vmem:[%s6693_s9 + $0xd8] sm:$0xff]  }
 0x129   :  { %v306_v60 = vsel %vm9170_vm6, %v5863_v1, %v5864_v48  ;;  %vm9171_vm0 = vmmov %vm9170_vm6  ;;  %v4796_v7 = vpack.c.bf16 %v305_v59, %v280_v53  ;;  %v6245_v48 = vld [vmem:[%s6693_s9 + $0x18] sm:$0xff]   ;;  %v6248_v53 = vld [vmem:[%s6693_s9 + $0xd0] sm:$0xff]  }
 0x12a   :  { %v307_v62 = vsel %vm9171_vm0, %v5869_v33, %v5863_v1  ;;  %vm8932_vm1 = vmpackc.low %vm7092_vm3, %vm7210_vm11  ;;  %v4767_v63 = vpack.c.bf16 %v306_v60, %v281_v45  ;;  %v6243_v33 = vld [vmem:[%s6693_s9 + $0x58] sm:$0xff]   ;;  %v6249_v45 = vld [vmem:[%s6693_s9 + $0x10] sm:$0xff]  }
 0x12b   :  { %v4770_v5 = vpack.c.bf16 %v307_v62, %v282_v57  ;;  %vm8931_vm7 = vmpackc.low %vm7116_vm2, %vm7218_vm12  ;;  %v6246_v1 = vld [vmem:[%s6693_s9 + $0x98] sm:$0xff]   ;;  %v6250_v57 = vld [vmem:[%s6693_s9 + $0x90] sm:$0xff]  }
 0x12c   :  { %4768 = vmatprep.subr.msk.bf16.mxu0 %vm7196_vm9, %v4767_v63  ;;  %4797 = vmatpush1.bf16.msk.msra.mxu1 %vm8931_vm7, %v4796_v7  ;;  %v6252_v59 = vld [vmem:[%s6693_s9 + $0xc8] sm:$0xff]   ;;  %v6255_v63 = vld [vmem:[%s6693_s9 + $0x40] sm:$0xff]   ;;  %vm9183_vm9 = vmmov %vm9182_vm10 }
 0x12d   :  { %4771 = vmatpush1.bf16.msk.msra.mxu0 %vm8932_vm1, %v4770_v5  ;;  %5378 = vmatprep.subr.bf16.mxu1 %v6228_v14  ;;  %v6253_v60 = vld [vmem:[%s6693_s9 + $0x8] sm:$0xff]   ;;  %v6257_v5 = vld [vmem:[%s6693_s9] sm:$0xff]  }
 0x12e   :  { %5356 = vmatprep.subr.bf16.mxu0 %v6227_v13  ;;  %v6254_v62 = vld [vmem:[%s6693_s9 + $0x88] sm:$0xff]   ;;  %v6258_v7 = vld [vmem:[%s6693_s9 + $0x80] sm:$0xff]   ;;  %s6672_s9 = smov 120  }
 0x12f   :  { %4798 = vmatmul.mubr.msk.bf16.vlgmr.msra.gmra.mxu1 %vm8933_vm14, %v490_v10 }
 0x130   :  { %4772 = vmatmul.mubr.msk.bf16.vlgmr.msra.gmra.mxu0 %vm8933_vm14, %v490_v10  ;;  %5379 = vmatpush3.bf16.msra.mxu1 %v6230_v17  ;;  %v495_v10 = vpop.permute.xlu0 %494 }
 0x131   :  { %5357 = vmatpush3.bf16.msra.mxu0 %v6229_v16  ;;  %5380 = vmatprep.subr.bf16.mxu1 %v6232_v19 }
 0x132   :  { %5358 = vmatprep.subr.bf16.mxu0 %v6231_v18 }
 0x134   :  { %5381 = vmatpush3.bf16.msra.mxu1 %v6234_v21 }
 0x135   :  { %5359 = vmatpush3.bf16.msra.mxu0 %v6233_v20  ;;  %5382 = vmatprep.subr.bf16.mxu1 %v6236_v29 }
 0x136   :  { %5360 = vmatprep.subr.bf16.mxu0 %v6235_v27 }
 0x138   :  { %5383 = vmatpush3.bf16.msra.mxu1 %v6238_v34 }
 0x139   :  { %5361 = vmatpush3.bf16.msra.mxu0 %v6237_v30  ;;  %5384 = vmatprep.subr.bf16.mxu1 %v6240_v41 }
 0x13a   :  { %5362 = vmatprep.subr.bf16.mxu0 %v6239_v37 }
 0x13c   :  { %5385 = vmatpush3.bf16.msra.mxu1 %v6242_v46 }
 0x13d   :  { %5363 = vmatpush3.bf16.msra.mxu0 %v6241_v44  ;;  %5386 = vmatprep.subr.bf16.mxu1 %v6244_v38 }
 0x13e   :  { %5364 = vmatprep.subr.bf16.mxu0 %v6243_v33 }
 0x140   :  { %5387 = vmatpush3.bf16.msra.mxu1 %v6246_v1 }
 0x141   :  { %5365 = vmatpush3.bf16.msra.mxu0 %v6245_v48  ;;  %5388 = vmatprep.subr.bf16.mxu1 %v6248_v53 }
 0x142   :  { %5366 = vmatprep.subr.bf16.mxu0 %v6247_v51 }
 0x144   :  { %5389 = vmatpush3.bf16.msra.mxu1 %v6250_v57 }
 0x145   :  { %5367 = vmatpush3.bf16.msra.mxu0 %v6249_v45  ;;  %5390 = vmatprep.subr.bf16.mxu1 %v6252_v59 }
 0x146   :  { %5368 = vmatprep.subr.bf16.mxu0 %v6251_v0 }
 0x148   :  { %5391 = vmatpush3.bf16.msra.mxu1 %v6254_v62 }
 0x149   :  { %5369 = vmatpush3.bf16.msra.mxu0 %v6253_v60  ;;  %5392 = vmatprep.subr.bf16.mxu1 %v6256_v2 }
 0x14a   :  { %5370 = vmatprep.subr.bf16.mxu0 %v6255_v63 }
 0x14c   :  { %5393 = vmatpush3.bf16.msra.mxu1 %v6258_v7 }
 0x14d   :  { %5371 = vmatpush3.bf16.msra.mxu0 %v6257_v5  ;;  %1265 = vmatprep.subr.bf16.mxu1 %v8981_v6 }
 0x1ef   :  { %v589_v14 = vpop.f32.mrf.mxu1 }
 0x1f0   :  { %v548_v13 = vpop.f32.mrf.mxu0  ;;  %v590_v17 = vadd.f32 %v589_v14, %v495_v10 }
 0x1f1   :  { %v549_v16 = vadd.f32 %v548_v13, %v495_v10  ;;  %v591_v19 = vpop.f32.mrf.mxu1 }
 0x1f2   :  { %v550_v18 = vpop.f32.mrf.mxu0  ;;  %v598_v21 = vmin.f32 %v590_v17, 20.0  ;;  %v592_v29 = vadd.f32 %v591_v19, %v495_v10 }
 0x1f3   :  { %v596_v20 = vmin.f32 %v549_v16, 20.0  ;;  %v551_v27 = vadd.f32 %v550_v18, %v495_v10  ;;  %v593_v34 = vpop.f32.mrf.mxu1 }
 0x1f4   :  { %v552_v30 = vpop.f32.mrf.mxu0  ;;  %v604_v41 = vmul.f32 1.442695, %v598_v21  ;;  %v599_v46 = vmin.f32 %v592_v29, 20.0 }
 0x1f5   :  { %v600_v37 = vmul.f32 1.442695, %v596_v20  ;;  %v597_v44 = vmin.f32 %v551_v27, 20.0  ;;  %v594_v38 = vpop.f32.mrf.mxu1 }
 0x1f6   :  { %v553_v33 = vpop.f32.mrf.mxu0  ;;  %v606_v1 = vmul.f32 1.442695, %v599_v46 }
 0x1f7   :  { %6353 = vpow2.f32 %v600_v37  ;;  %v602_v48 = vmul.f32 1.442695, %v597_v44 }
 0x1f8   :  { %6355 = vpow2.f32 %v604_v41 }
 0x1f9   :  { %6357 = vpow2.f32 %v602_v48 }
 0x1fa   :  { %6359 = vpow2.f32 %v606_v1 }
 0x204   :  { %v6354_v51 = vpop.eup %6353 }
 0x205   :  { %v6356_v53 = vpop.eup %6355  ;;  %v608_v45 = vadd.f32 1.0, %v6354_v51 }
 0x206   :  { %v6358_v57 = vpop.eup %6357  ;;  %v610_v0 = vadd.f32 1.0, %v6356_v53 }
 0x207   :  { %v6360_v59 = vpop.eup %6359  ;;  %v612_v60 = vmul.f32 %v608_v45, %v608_v45  ;;  %v609_v62 = vadd.f32 1.0, %v6358_v57 }
 0x208   :  { %v614_v63 = vmul.f32 %v610_v0, %v610_v0  ;;  %v611_v2 = vadd.f32 1.0, %v6360_v59 }
 0x209   :  { %v624_v5 = vadd.f32 1.0, %v612_v60  ;;  %v613_v7 = vmul.f32 %v609_v62, %v609_v62  ;;  %v4799_v19 = vadd.f32 -1.0, %v612_v60 }
 0x20a   :  { %v626_v10 = vadd.f32 1.0, %v614_v63  ;;  %v615_v13 = vmul.f32 %v611_v2, %v611_v2  ;;  %v4801_v20 = vadd.f32 -1.0, %v614_v63 }
 0x20b   :  { %6361 = vrcp.f32 %v624_v5  ;;  %v625_v14 = vadd.f32 1.0, %v613_v7  ;;  %v4800_v21 = vadd.f32 -1.0, %v613_v7  ;;  %v620_v37 = vmul.f32 %v4799_v19, %v549_v16 }
 0x20c   :  { %6363 = vrcp.f32 %v626_v10  ;;  %v627_v18 = vadd.f32 1.0, %v615_v13  ;;  %v4802_v30 = vadd.f32 -1.0, %v615_v13  ;;  %v622_v44 = vmul.f32 %v4801_v20, %v590_v17 }
 0x20d   :  { %6365 = vrcp.f32 %v625_v14  ;;  %v621_v46 = vmul.f32 %v4800_v21, %v551_v27  ;;  %v6259_v14 = vld [vmem:[#allocation4] sm:$0xff]   ;;  %v977_v19 = vand.u32 63, %v6907_v9  ;;  %v9197_v20 = vmov 0 }
 0x20e   :  { %6367 = vrcp.f32 %v627_v18  ;;  %v623_v48 = vmul.f32 %v4802_v30, %v592_v29  ;;  %v976_v18 = vand.u32 7, %v6907_v9 }
 0x20f   :  { %vm7318_vm0 = vcmp.lt.s32.totalorder %v977_v19, 56  ;;  %vm7350_vm11 = vcmp.ge.s32.totalorder %v977_v19, 8 }
 0x210   :  { %vm7314_vm6 = vcmp.lt.s32.totalorder %v976_v18, 7  ;;  %vm7330_vm1 = vcmp.ge.s32.totalorder %v976_v18, 1 }
 0x211   :  { %vm7326_vm7 = vmand %vm7318_vm0, %vm7314_vm6 }
 0x218   :  { %v6362_v34 = vpop.eup %6361 }
 0x219   :  { %v6364_v41 = vpop.eup %6363  ;;  %v632_v38 = vmul.f32 %v6362_v34, %v620_v37 }
 0x21a   :  { %v6366_v33 = vpop.eup %6365  ;;  %v634_v51 = vmul.f32 %v6364_v41, %v622_v44  ;;  %v9195_v44 = vmov 0 }
 0x21b   :  { %v6368_v1 = vpop.eup %6367  ;;  %v633_v53 = vmul.f32 %v6366_v33, %v621_v46  ;;  %v636_v0 = vpack.c.bf16 %v632_v38, %v632_v38 }
 0x21c   :  { %v635_v45 = vmul.f32 %v6368_v1, %v623_v48  ;;  %v638_v62 = vpack.c.bf16 %v634_v51, %v634_v51 }
 0x21d   :  { %v637_v57 = vpack.c.bf16 %v633_v53, %v633_v53 }
 0x21e   :  { %v639_v59 = vpack.c.bf16 %v635_v45, %v635_v45 }
 0x21f   :  { %928 = vmatprep.mubr.bf16.mxu0 %v637_v57  ;;  %v9201_v57 = vmov 0 }
 0x220   :  { %968 = vmatprep.mubr.bf16.mxu1 %v639_v59  ;;  %929 = vmatmul.mubr.bf16.vlgmr.msra.gmra.mxu0 %v636_v0 }
 0x221   :  { %969 = vmatmul.mubr.bf16.vlgmr.msra.gmra.mxu1 %v638_v62  ;;  %5550 = vmatprep.mubr.msk.bf16.mxu0 %vm8933_vm14, %v6259_v14  ;;  %vm7340_vm14 = vmand %vm7318_vm0, %vm7330_vm1 }
 0x222   :  { %vm4837_vm12 = vmpackc.low %vm7318_vm0, %vm7340_vm14 }
 0x2e0   :  { %v5372_v60 = vpop.f32.mrf.mxu0 }
 0x2e1   :  { %v5394_v16 = vpop.f32.mrf.mxu1 }
 0x2e2   :  { %v5373_v63 = vpop.f32.mrf.mxu0 }
 0x2e3   :  { %v5374_v17 = vadd.f32 %v5373_v63, %v5372_v60  ;;  %v5395_v27 = vpop.f32.mrf.mxu1 }
 0x2e4   :  { %v5396_v2 = vadd.f32 %v5395_v27, %v5394_v16  ;;  %v5375_v5 = vpop.f32.mrf.mxu0  ;;  %v6260_v27 = vld [vmem:[#allocation4 + $0x8] sm:$0xff]  }
 0x2e5   :  { %v5397_v29 = vpop.f32.mrf.mxu1 }
 0x2e6   :  { %v971_v7 = vadd.f32 %v5396_v2, %v5374_v17  ;;  %v5376_v10 = vpop.f32.mrf.mxu0 }
 0x2e7   :  { %v5398_v13 = vpop.f32.mrf.mxu1 }
 0x2e8   :  { %1016 = vrot.lane.b32.xlu0 %v971_v7, %s6672_s9  ;;  %1021 = vrot.lane.b32.xlu1 %v971_v7, %s6673_s25 }
 0x2ec   :  { %996 = vrot.lane.b32.xlu0 %v971_v7, %s6674_s29  ;;  %1011 = vrot.lane.b32.xlu1 %v971_v7, %s6675_s11 }
 0x2f0   :  { %986 = vrot.lane.b32.xlu0 %v971_v7, %s6676_s3  ;;  %1006 = vrot.lane.b32.xlu1 %v971_v7, %s6666_s5 }
 0x2f4   :  { %1001 = vrot.lane.b32.xlu1 %v971_v7, %s6668_s2 }
 0x2f8   :  { %991 = vrot.lane.b32.xlu1 %v971_v7, %s6657_s10 }
 0x35a   :  { %v1022_v37 = vpop.permute.xlu1 %1021  ;;  %v1017_v33 = vpop.permute.xlu0 %1016 }
 0x35b   :  { %v1025_v41 = vsel %vm7326_vm7, %v1022_v37, 0.0 }
 0x35c   :  { %v1030_v46 = vpack.c.bf16 %v1025_v41, %v1025_v41 }
 0x35e   :  { %5726 = vmatprep.subr.msk.bf16.mxu0 %vm9182_vm10, %v1030_v46  ;;  %v1012_v38 = vpop.permute.xlu1 %1011  ;;  %v1052_v48 = vsel %vm9183_vm9, %v1030_v46, 0  ;;  %vm4840_vm10 = vmpackc.low %vm7314_vm6, %vm9150_vm13  ;;  %v997_v0 = vpop.permute.xlu0 %996 }
 0x35f   :  { %v4838_v1 = vpack.c.bf16 %v1017_v33, %v1012_v38  ;;  %5541 = vmatpush3.bf16.msra.mxu0 %v1052_v48  ;;  %vm7361_vm9 = vmand %vm7350_vm11, %vm7314_vm6 }
 0x360   :  { %vm4843_vm2 = vmpackc.low %vm7330_vm1, %vm7361_vm9 }
 0x361   :  { %5542 = vmatprep.subr.msk.bf16.mxu0 %vm4837_vm12, %v4838_v1  ;;  %vm7373_vm13 = vmand %vm7350_vm11, %vm7330_vm1 }
 0x362   :  { %v1007_v53 = vpop.permute.xlu1 %1006  ;;  %v987_v16 = vpop.permute.xlu0 %986 }
 0x363   :  { %v4841_v45 = vpack.c.bf16 %v1007_v53, %v971_v7  ;;  %5543 = vmatpush3.bf16.msk.msra.mxu0 %vm4837_vm12, %v4838_v1  ;;  %vm4846_vm12 = vmpackc.low %vm7350_vm11, %vm7373_vm13 }
 0x365   :  { %5544 = vmatprep.subr.msk.bf16.mxu0 %vm4840_vm10, %v4841_v45 }
 0x366   :  { %v1002_v59 = vpop.permute.xlu1 %1001 }
 0x367   :  { %v4844_v62 = vpack.c.bf16 %v1002_v59, %v997_v0  ;;  %5545 = vmatpush3.bf16.msk.msra.mxu0 %vm4840_vm10, %v4841_v45  ;;  %vm9190_vm10 = vcmask 588800  }
 0x369   :  { %5546 = vmatprep.subr.msk.bf16.mxu0 %vm4843_vm2, %v4844_v62 }
 0x36a   :  { %v992_v63 = vpop.permute.xlu1 %991 }
 0x36b   :  { %v4847_v17 = vpack.c.bf16 %v992_v63, %v987_v16  ;;  %5547 = vmatpush3.bf16.msk.msra.mxu0 %vm4843_vm2, %v4844_v62  ;;  %v1121_v62 = vld [vmem:[%s6733_s14] sm:$0xff]  ;;  %vm8943_vm2 = vcmask 130048  }
 0x36d   :  { %5548 = vmatprep.subr.msk.bf16.mxu0 %vm4846_vm12, %v4847_v17 }
 0x36f   :  { %5549 = vmatpush3.bf16.msk.msra.mxu0 %vm4846_vm12, %v4847_v17  ;;  %v1129_v17 = vld [vmem:[%s6738_s19] sm:$0xff]  ;;  %vm7402_vm12 = vmpackc.low %vm7318_vm0, %vm7318_vm0 }
 0x370   :  { %vm7422_vm0 = vmpackc.low %vm7314_vm6, %vm7314_vm6 }
 0x371   :  { %v9196_v44 = vsel %vm7422_vm0, 4294967295, %v9195_v44  ;;  %vm7442_vm6 = vmpackc.low %vm7361_vm9, %vm7361_vm9 }
 0x372   :  { %5551 = vmatmul.mubr.msk.bf16.vlgmr.msra.gmra.mxu0 %vm9190_vm10, %v6260_v27  ;;  %v1122_v27 = vld [vmem:[%s6733_s14 + $0x8] sm:$0xff]  ;;  %vm7411_vm10 = vmpackc.low %vm7340_vm14, %vm7340_vm14  ;;  %s9207_s14 = sld [smem:[#allocation16_spill]] }
 0x373   :  { %vm7433_vm14 = vmpackc.low %vm7330_vm1, %vm7330_vm1 }
 0x374   :  { %v9198_v20 = vsel %vm7433_vm14, 4294967295, %v9197_v20  ;;  %vm7453_vm1 = vmpackc.low %vm7350_vm11, %vm7350_vm11 }
 0x375   :  { %v9202_v57 = vsel %vm7453_vm1, 4294967295, %v9201_v57  ;;  %vm7462_vm9 = vmpackc.low %vm7373_vm13, %vm7373_vm13 }
 0x376   :  { %vm7472_vm11 = vmpackc.low %vm7326_vm7, %vm7326_vm7  ;;  %vm8944_vm7 = vmmov 0  }
 0x432   :  { %v7382_v2 = vpop.f32.mrf.mxu0 }
 0x434   :  { %v1088_v5 = vpop.f32.mrf.mxu0 }
 0x435   :  { %1103 = vadd.xlane.f32.xlu0 %v1088_v5  ;;  %v1109_v7 = vmul.f32 %v1088_v5, %v1088_v5 }
 0x436   :  { %v7384_v29 = vpop.f32.mrf.mxu0 }
 0x438   :  { %v1091_v10 = vpop.f32.mrf.mxu0 }
 0x439   :  { %1111 = vadd.xlane.f32.xlu0 %v1109_v7  ;;  %1105 = vadd.xlane.f32.xlu1 %v1091_v10  ;;  %v1110_v13 = vmul.f32 %v1091_v10, %v1091_v10 }
 0x43d   :  { %1113 = vadd.xlane.f32.xlu0 %v1110_v13 }
 0x4be   :  { %v1104_v14 = vpop.xlane.xlu0 %1103 }
 0x4bf   :  { %v1107_v18 = vmul.f32 0.0078125, %v1104_v14 }
 0x4c1   :  { %v1117_v41 = vmul.f32 %v1107_v18, %v1107_v18 }
 0x4c2   :  { %v1112_v19 = vpop.xlane.xlu0 %1111  ;;  %v1106_v37 = vpop.xlane.xlu1 %1105 }
 0x4c3   :  { %v1115_v46 = vmul.f32 0.0078125, %v1112_v19  ;;  %v1108_v33 = vmul.f32 0.0078125, %v1106_v37  ;;  %v1130_v37 = vld [vmem:[%s6738_s19 + $0x8] sm:$0xff]  ;;  %s9279_s19 = sld [smem:[#allocation20_spill]] }
 0x4c5   :  { %v1119_v38 = vsub.f32 %v1115_v46, %v1117_v41  ;;  %v1118_v53 = vmul.f32 %v1108_v33, %v1108_v33 }
 0x4c6   :  { %v1114_v48 = vpop.xlane.xlu0 %1113 }
 0x4c7   :  { %v1123_v1 = vadd.f32 1e-05, %v1119_v38  ;;  %v1116_v45 = vmul.f32 0.0078125, %v1114_v48 }
 0x4c9   :  { %6369 = vrsqrt.f32 %v1123_v1  ;;  %v1120_v0 = vsub.f32 %v1116_v45, %v1118_v53 }
 0x4cb   :  { %v1124_v59 = vadd.f32 1e-05, %v1120_v0 }
 0x4cd   :  { %6371 = vrsqrt.f32 %v1124_v59 }
 0x4d6   :  { %v6370_v16 = vpop.eup %6369 }
 0x4d7   :  { %v1127_v63 = vmul.f32 %v6370_v16, %v1121_v62 }
 0x4d9   :  { %1137 = vperm.xlu1 %5871, %v1127_v63   ;;  %v1131_v7 = vmul.f32 %v1127_v63, %v1107_v18 }
 0x4da   :  { %v6372_v13 = vpop.eup %6371 }
 0x4db   :  { %v1133_v14 = vsub.f32 %v1129_v17, %v1131_v7  ;;  %v1128_v19 = vmul.f32 %v6372_v13, %v1122_v27 }
 0x4dd   :  { %1149 = vperm.xlu1 %5871, %v1133_v14   ;;  %1142 = vperm.xlu0 %5870, %v1128_v19   ;;  %v1132_v41 = vmul.f32 %v1128_v19, %v1108_v33 }
 0x4df   :  { %v1134_v46 = vsub.f32 %v1130_v37, %v1132_v41 }
 0x4e1   :  { %1154 = vperm.xlu1 %5871, %v1134_v46  }
 0x554   :  { %v1138_v38 = vpop.permute.xlu1 %1137 }
 0x555   :  { %v1145_v48 = vmul.f32 %v1138_v38, %v1088_v5 }
 0x558   :  { %v1150_v1 = vpop.permute.xlu1 %1149  ;;  %v1143_v53 = vpop.permute.xlu0 %1142 }
 0x559   :  { %v1157_v45 = vadd.f32 %v1150_v1, %v1145_v48  ;;  %v1146_v59 = vmul.f32 %v1143_v53, %v1091_v10 }
 0x55b   :  { %v1159_v0 = vmin.f32 %v1157_v45, 20.0 }
 0x55c   :  { %v1155_v62 = vpop.permute.xlu1 %1154 }
 0x55d   :  { %v1161_v16 = vmul.f32 1.442695, %v1159_v0  ;;  %v1158_v8 = vadd.f32 %v1155_v62, %v1146_v59 }
 0x55f   :  { %6373 = vpow2.f32 %v1161_v16  ;;  %v1160_v18 = vmin.f32 %v1158_v8, 20.0 }
 0x561   :  { %v1163_v63 = vmul.f32 1.442695, %v1160_v18 }
 0x563   :  { %6375 = vpow2.f32 %v1163_v63  ;;  %v9191_v63 = vmov 0 }
 0x564   :  { %v9192_v63 = vsel %vm7402_vm12, 4294967295, %v9191_v63 }
 0x56c   :  { %v6374_v17 = vpop.eup %6373 }
 0x56d   :  { %v1165_v27 = vadd.f32 1.0, %v6374_v17 }
 0x56f   :  { %v1167_v7 = vmul.f32 %v1165_v27, %v1165_v27 }
 0x570   :  { %v6376_v33 = vpop.eup %6375 }
 0x571   :  { %v1173_v13 = vadd.f32 1.0, %v1167_v7  ;;  %v1166_v14 = vadd.f32 1.0, %v6376_v33  ;;  %v4851_v37 = vadd.f32 -1.0, %v1167_v7 }
 0x573   :  { %v1168_v19 = vmul.f32 %v1166_v14, %v1166_v14  ;;  %6377 = vrcp.f32 %v1173_v13  ;;  %v1171_v46 = vmul.f32 %v4851_v37, %v1157_v45  ;;  %v9193_v13 = vmov 0 }
 0x574   :  { %v9194_v13 = vsel %vm7411_vm10, 4294967295, %v9193_v13 }
 0x575   :  { %v1174_v5 = vadd.f32 1.0, %v1168_v19  ;;  %v4852_v41 = vadd.f32 -1.0, %v1168_v19 }
 0x577   :  { %6379 = vrcp.f32 %v1174_v5  ;;  %v1172_v38 = vmul.f32 %v4852_v41, %v1158_v8  ;;  %v6261_v8 = vld [vmem:[#allocation6 + $0x4] ss:$8 sps:$4 sm:$0xff]  }
 0x578   :  { %4879 = vmatprep.mubr.msk.bf16.mxu1 %vm8943_vm2, %v6261_v8 }
 0x580   :  { %v6378_v10 = vpop.eup %6377 }
 0x581   :  { %v1177_v1 = vmul.f32 %v6378_v10, %v1171_v46 }
 0x584   :  { %v6380_v48 = vpop.eup %6379 }
 0x585   :  { %v1178_v53 = vmul.f32 %v6380_v48, %v1172_v38 }
 0x587   :  { %v5877_v0 = vpack.i.bf16 %v1178_v53, %v1177_v1  ;;  %v1245_v59 = vpack.c.bf16 %v1178_v53, %v1177_v1 }
 0x589   :  { %5878 = vrot.lane.b32.xlu1 %v5877_v0, %s6675_s11  ;;  %5873 = vrot.lane.b32.xlu0 %v5877_v0, %s6672_s9 }
 0x58d   :  { %5888 = vrot.lane.b32.xlu1 %v5877_v0, %s6668_s2  ;;  %5883 = vrot.lane.b32.xlu0 %v5877_v0, %s6666_s5 }
 0x591   :  { %5898 = vrot.lane.b32.xlu1 %v5877_v0, %s6657_s10  ;;  %5893 = vrot.lane.b32.xlu0 %v5877_v0, %s6674_s29 }
 0x595   :  { %5908 = vrot.lane.b32.xlu1 %v5877_v0, %s6673_s25  ;;  %5903 = vrot.lane.b32.xlu0 %v5877_v0, %s6676_s3  ;;  %v9199_v0 = vmov 0 }
 0x596   :  { %v9200_v0 = vsel %vm7442_vm6, 4294967295, %v9199_v0 }
 0x5fb   :  { %v5879_v45 = vpop.permute.xlu1 %5878  ;;  %v5874_v62 = vpop.permute.xlu0 %5873 }
 0x5fc   :  { %v5876_v16 = vunpack.i.h.bf16 %v5874_v62  ;;  %v5875_v18 = vunpack.i.l.bf16 %v5874_v62  ;;  %v5881_v17 = vunpack.i.h.bf16 %v5879_v45  ;;  %v5880_v27 = vunpack.i.l.bf16 %v5879_v45 }
 0x5fe   :  { %v4856_v7 = vpack.c.bf16 %v5876_v16, %v5875_v18  ;;  %v4859_v21 = vpack.c.bf16 %v5881_v17, %v5880_v27  ;;  %v9203_v27 = vmov 0 }
 0x5ff   :  { %v5884_v33 = vpop.permute.xlu0 %5883  ;;  %v5889_v37 = vpop.permute.xlu1 %5888  ;;  %v9204_v27 = vsel %vm7462_vm9, 4294967295, %v9203_v27 }
 0x600   :  { %4857 = vmatpush1.bf16.msk.msra.mxu1 %vm7402_vm12, %v4856_v7  ;;  %v5886_v14 = vunpack.i.h.bf16 %v5884_v33  ;;  %v5885_v19 = vunpack.i.l.bf16 %v5884_v33  ;;  %v5891_v41 = vunpack.i.h.bf16 %v5889_v37  ;;  %v5890_v10 = vunpack.i.l.bf16 %v5889_v37 }
 0x601   :  { %1267 = vmatprep.subr.bf16.mxu1 %v8981_v6 }
 0x602   :  { %v4862_v5 = vpack.c.bf16 %v5886_v14, %v5885_v19  ;;  %v4865_v38 = vpack.c.bf16 %v5891_v41, %v5890_v10  ;;  %v6263_v14 = vld [vmem:[#allocation6] ss:$8 sps:$4 sm:$0xff]  }
 0x603   :  { %v5894_v46 = vpop.permute.xlu0 %5893  ;;  %v5899_v53 = vpop.permute.xlu1 %5898 }
 0x604   :  { %4860 = vmatpush1.bf16.msk.msra.mxu1 %vm7411_vm10, %v4859_v21  ;;  %v5896_v48 = vunpack.i.h.bf16 %v5894_v46  ;;  %v5895_v1 = vunpack.i.l.bf16 %v5894_v46  ;;  %v5901_v34 = vunpack.i.h.bf16 %v5899_v53  ;;  %v9205_v21 = vmov 0 }
 0x605   :  { %1269 = vmatprep.subr.bf16.mxu1 %v8981_v6  ;;  %v9206_v21 = vsel %vm7472_vm11, 4294967295, %v9205_v21 }
 0x606   :  { %v4868_v8 = vpack.c.bf16 %v5896_v48, %v5895_v1 }
 0x607   :  { %v5904_v45 = vpop.permute.xlu0 %5903  ;;  %v5909_v17 = vpop.permute.xlu1 %5908 }
 0x608   :  { %4863 = vmatpush1.bf16.msk.msra.mxu1 %vm7422_vm0, %v4862_v5  ;;  %v5906_v16 = vunpack.i.h.bf16 %v5904_v45  ;;  %v5905_v18 = vunpack.i.l.bf16 %v5904_v45  ;;  %v5911_v51 = vunpack.i.h.bf16 %v5909_v17  ;;  %v5910_v7 = vunpack.i.l.bf16 %v5909_v17 }
 0x609   :  { %1271 = vmatprep.subr.bf16.mxu1 %v8981_v6 }
 0x60a   :  { %v4874_v33 = vpack.c.bf16 %v5906_v16, %v5905_v18  ;;  %v4877_v60 = vpack.c.bf16 %v5911_v51, %v5910_v7  ;;  %v1324_v7 = vld [vmem:[%s6748_s30] sm:$0xff] }
 0x60c   :  { %1272 = vmatpush1.bf16.msra.mxu1 %v1245_v59  ;;  %v5900_v59 = vunpack.i.l.bf16 %v5899_v53 }
 0x60d   :  { %1273 = vmatprep.subr.bf16.mxu1 %v8981_v6 }
 0x60e   :  { %v4871_v62 = vpack.c.bf16 %v5901_v34, %v5900_v59 }
 0x610   :  { %4866 = vmatpush1.bf16.msk.msra.mxu1 %vm7433_vm14, %v4865_v38 }
 0x611   :  { %1275 = vmatprep.subr.bf16.mxu1 %v8981_v6 }
 0x614   :  { %4869 = vmatpush1.bf16.msk.msra.mxu1 %vm7442_vm6, %v4868_v8 }
 0x615   :  { %1277 = vmatprep.subr.bf16.mxu1 %v8981_v6 }
 0x618   :  { %4872 = vmatpush1.bf16.msk.msra.mxu1 %vm7453_vm1, %v4871_v62 }
 0x619   :  { %1279 = vmatprep.subr.bf16.mxu1 %v8981_v6 }
 0x61c   :  { %4875 = vmatpush1.bf16.msk.msra.mxu1 %vm7462_vm9, %v4874_v33 }
 0x61d   :  { %1295 = vmatprep.subr.bf16.mxu1 %v8981_v6 }
 0x620   :  { %4878 = vmatpush2.bf16.msk.msra.mxu1 %vm7472_vm11, %v4877_v60 }
 0x623   :  { %1298 = vmatmul.mubr.bf16.vlgmr.msra.gmra.mxu1 %v6263_v14  ;;  %v1332_v14 = vld [vmem:[%s6753_s6] sm:$0xff] }
 0x6e3   :  { %v7479_v19 = vpop.f32.mrf.mxu1 }
 0x6e4   :  { %1306 = vadd.xlane.f32.xlu0 %v7479_v19  ;;  %v1312_v30 = vmul.f32 %v7479_v19, %v7479_v19 }
 0x6e5   :  { %v1301_v5 = vpop.f32.mrf.mxu1 }
 0x6e6   :  { %v1325_v5 = vld [vmem:[%s6748_s30 + $0x8] sm:$0xff]  ;;  %s9280_s30 = sld [smem:[#allocation21_spill]] }
 0x6e7   :  { %v7484_v37 = vpop.f32.mrf.mxu1 }
 0x6e8   :  { %1314 = vadd.xlane.f32.xlu0 %v1312_v30  ;;  %1308 = vadd.xlane.f32.xlu1 %v7484_v37  ;;  %v1313_v10 = vmul.f32 %v7484_v37, %v7484_v37 }
 0x6e9   :  { %v1304_v41 = vpop.f32.mrf.mxu1 }
 0x6ec   :  { %1316 = vadd.xlane.f32.xlu0 %v1313_v10 }
 0x76d   :  { %v1307_v46 = vpop.xlane.xlu0 %1306 }
 0x76e   :  { %v1310_v38 = vmul.f32 0.0078125, %v1307_v46 }
 0x770   :  { %v1320_v53 = vmul.f32 %v1310_v38, %v1310_v38 }
 0x771   :  { %v1315_v48 = vpop.xlane.xlu0 %1314  ;;  %v1309_v1 = vpop.xlane.xlu1 %1308 }
 0x772   :  { %v1318_v34 = vmul.f32 0.0078125, %v1315_v48  ;;  %v1311_v59 = vmul.f32 0.0078125, %v1309_v1  ;;  %v1333_v48 = vld [vmem:[%s6753_s6 + $0x8] sm:$0xff]  ;;  %s9299_s6 = sld [smem:[#allocation22_spill]] }
 0x774   :  { %v1322_v8 = vsub.f32 %v1318_v34, %v1320_v53  ;;  %v1321_v16 = vmul.f32 %v1311_v59, %v1311_v59  ;;  %v1179_v53 = vld [vmem:[%s6728_s8] sm:$0xff] }
 0x775   :  { %v1317_v45 = vpop.xlane.xlu0 %1316 }
 0x776   :  { %v1326_v62 = vadd.f32 1e-05, %v1322_v8  ;;  %v1319_v18 = vmul.f32 0.0078125, %v1317_v45  ;;  %v1180_v8 = vld [vmem:[%s6728_s8 + $0x8] sm:$0xff]  ;;  %v6264_v45 = vld [vmem:[%s9207_s14 + $0x38] sm:$0xff]   ;;  %s9245_s8 = sld [smem:[#allocation18_spill]] }
 0x778   :  { %6381 = vrsqrt.f32 %v1326_v62  ;;  %v1323_v17 = vsub.f32 %v1319_v18, %v1321_v16  ;;  %v6677_v62 = vmov 0.0   ;;  %v6267_v16 = vld [vmem:[%s9207_s14 + $0x20] sm:$0xff]   ;;  %v6268_v18 = vld [vmem:[%s9207_s14 + $0x18] sm:$0xff]  }
 0x779   :  { %5554 = vmatprep.subr.bf16.mxu0 %v6677_v62  ;;  %5574 = vmatprep.subr.bf16.mxu1 %v6677_v62 }
 0x77a   :  { %v1327_v51 = vadd.f32 1e-05, %v1323_v17  ;;  %5555 = vmatpush3.bf16.msra.mxu0 %v6264_v45  ;;  %v6269_v17 = vld [vmem:[%s9207_s14 + $0x10] sm:$0xff]   ;;  %5570 = vmatprep.mubr.msk.bf16.mxu0 %vm8944_vm7, %v6677_v62 }
 0x77b   :  { %5556 = vmatprep.subr.bf16.mxu0 %v6677_v62  ;;  %5578 = vmatprep.mubr.msk.bf16.mxu1 %vm8944_vm7, %v6677_v62 }
 0x77c   :  { %6383 = vrsqrt.f32 %v1327_v51  ;;  %v6270_v51 = vld [vmem:[%s9207_s14 + $0x8] sm:$0xff]  }
 0x785   :  { %v6382_v33 = vpop.eup %6381 }
 0x786   :  { %v1330_v60 = vmul.f32 %v6382_v33, %v1324_v7  ;;  %v6271_v7 = vld [vmem:[%s9207_s14] sm:$0xff]  }
 0x788   :  { %1340 = vperm.xlu1 %5871, %v1330_v60   ;;  %v1334_v30 = vmul.f32 %v1330_v60, %v1310_v38  ;;  %v6265_v38 = vld [vmem:[%s9207_s14 + $0x30] sm:$0xff]  }
 0x789   :  { %v6384_v41 = vpop.eup %6383  ;;  %5557 = vmatpush3.bf16.msra.mxu0 %v6265_v38 }
 0x78a   :  { %v1336_v10 = vsub.f32 %v1332_v14, %v1334_v30  ;;  %v1331_v46 = vmul.f32 %v6384_v41, %v1325_v5  ;;  %5558 = vmatprep.subr.bf16.mxu0 %v6677_v62 }
 0x78c   :  { %1352 = vperm.xlu1 %5871, %v1336_v10   ;;  %1345 = vperm.xlu0 %5870, %v1331_v46   ;;  %v1335_v1 = vmul.f32 %v1331_v46, %v1311_v59  ;;  %v6266_v59 = vld [vmem:[%s9207_s14 + $0x28] sm:$0xff]  }
 0x78d   :  { %5559 = vmatpush3.bf16.msra.mxu0 %v6266_v59 }
 0x78e   :  { %v1337_v34 = vsub.f32 %v1333_v48, %v1335_v1  ;;  %5560 = vmatprep.subr.bf16.mxu0 %v6677_v62 }
 0x790   :  { %1183 = vperm.xlu0 %5870, %v1179_v53   ;;  %1357 = vperm.xlu1 %5871, %v1337_v34  }
 0x791   :  { %5561 = vmatpush3.bf16.msra.mxu0 %v6267_v16 }
 0x792   :  { %5562 = vmatprep.subr.bf16.mxu0 %v6677_v62 }
 0x794   :  { %1188 = vperm.xlu1 %5871, %v1180_v8  }
 0x795   :  { %5563 = vmatpush3.bf16.msra.mxu0 %v6268_v18 }
 0x796   :  { %5564 = vmatprep.subr.bf16.mxu0 %v6677_v62 }
 0x799   :  { %5565 = vmatpush3.bf16.msra.mxu0 %v6269_v17 }
 0x79a   :  { %5566 = vmatprep.subr.bf16.mxu0 %v6677_v62 }
 0x79d   :  { %5567 = vmatpush3.bf16.msra.mxu0 %v6270_v51 }
 0x79e   :  { %5568 = vmatprep.subr.bf16.mxu0 %v6677_v62 }
 0x7a1   :  { %5569 = vmatpush3.bf16.msra.mxu0 %v6271_v7 }
 0x7a2   :  { %5590 = vmatprep.subr.bf16.mxu0 %v6677_v62 }
 0x803   :  { %v1341_v33 = vpop.permute.xlu1 %1340 }
 0x804   :  { %v1348_v60 = vmul.f32 %v1341_v33, %v7479_v19 }
 0x807   :  { %v1353_v14 = vpop.permute.xlu1 %1352  ;;  %v1346_v5 = vpop.permute.xlu0 %1345 }
 0x808   :  { %v1360_v30 = vadd.f32 %v1353_v14, %v1348_v60  ;;  %v1349_v10 = vmul.f32 %v1346_v5, %v7484_v37 }
 0x80a   :  { %v1362_v41 = vmin.f32 %v1360_v30, 20.0 }
 0x80b   :  { %v1358_v46 = vpop.permute.xlu1 %1357  ;;  %v1184_v60 = vpop.permute.xlu0 %1183 }
 0x80c   :  { %v1364_v48 = vmul.f32 1.442695, %v1362_v41  ;;  %v1361_v1 = vadd.f32 %v1358_v46, %v1349_v10  ;;  %v1191_v46 = vadd.f32 %v7382_v2, %v1184_v60  ;;  %v1753_v60 = vadd.s32 1, %v6907_v9 }
 0x80e   :  { %6385 = vpow2.f32 %v1364_v48  ;;  %v1363_v53 = vmin.f32 %v1361_v1, 20.0 }
 0x80f   :  { %v1189_v14 = vpop.permute.xlu1 %1188 }
 0x810   :  { %v1366_v34 = vmul.f32 1.442695, %v1363_v53  ;;  %v1192_v53 = vadd.f32 %v7384_v29, %v1189_v14  ;;  %v9215_v14 = vmov 0 }
 0x812   :  { %6387 = vpow2.f32 %v1366_v34 }
 0x81b   :  { %v6386_v8 = vpop.eup %6385 }
 0x81c   :  { %v1368_v45 = vadd.f32 1.0, %v6386_v8 }
 0x81e   :  { %v1370_v38 = vmul.f32 %v1368_v45, %v1368_v45 }
 0x81f   :  { %v6388_v59 = vpop.eup %6387 }
 0x820   :  { %v1376_v16 = vadd.f32 1.0, %v1370_v38  ;;  %v1369_v18 = vadd.f32 1.0, %v6388_v59  ;;  %v4880_v51 = vadd.f32 -1.0, %v1370_v38  ;;  %v9208_v38 = vlaneseq }
 0x822   :  { %6389 = vrcp.f32 %v1376_v16  ;;  %v1371_v19 = vmul.f32 %v1369_v18, %v1369_v18  ;;  %v1374_v33 = vmul.f32 %v4880_v51, %v1360_v30  ;;  %v7524_v59 = vshrl.u32 %v9208_v38, 7 }
 0x823   :  { %v1504_v30 = vadd.s32 27, %v6907_v9  ;;  %v9211_v51 = vmov 0 }
 0x824   :  { %v1377_v17 = vadd.f32 1.0, %v1371_v19  ;;  %v4881_v7 = vadd.f32 -1.0, %v1371_v19  ;;  %v7529_v16 = vadd.s32 16, %v7524_v59  ;;  %v7532_v2 = vadd.s32 24, %v7524_v59 }
 0x825   :  { %v1505_v29 = vand.u32 31, %v1504_v30  ;;  %v9209_v19 = vmov 0 }
 0x826   :  { %6391 = vrcp.f32 %v1377_v17  ;;  %v1375_v41 = vmul.f32 %v4881_v7, %v1361_v1  ;;  %v1631_v1 = vadd.s32 29, %v6907_v9  ;;  %v8988_v17 = vmov 1.0|1.0  }
 0x827   :  { %vm1508_vm13 = vcmp.eq.s32.totalorder %v1505_v29, %v7529_v16  ;;  %vm1509_vm2 = vcmp.eq.s32.totalorder %v1505_v29, %v7532_v2  ;;  %v1501_v7 = vadd.s32 8, %v7524_v59 }
 0x828   :  { %v1632_v18 = vand.u32 31, %v1631_v1  ;;  %vm7537_vm3 = vmpackc.low %vm1509_vm2, %vm1508_vm13  ;;  %vm1506_vm2 = vcmp.eq.s32.totalorder %v1505_v29, %v7524_v59  ;;  %v9227_v1 = vmov 0 }
 0x829   :  { %v9210_v19 = vsel %vm7537_vm3, 4294967295, %v9209_v19  ;;  %5575 = vmatpush3.bf16.msk.msra.mxu1 %vm7537_vm3, %v8988_v17  ;;  %vm1507_vm13 = vcmp.eq.s32.totalorder %v1505_v29, %v1501_v7 }
 0x82a   :  { %vm1636_vm5 = vcmp.eq.s32.totalorder %v1632_v18, %v7532_v2  ;;  %5576 = vmatprep.subr.bf16.mxu1 %v6677_v62  ;;  %vm1633_vm4 = vcmp.eq.s32.totalorder %v1632_v18, %v7524_v59  ;;  %vm1634_vm8 = vcmp.eq.s32.totalorder %v1632_v18, %v1501_v7 }
 0x82f   :  { %v6390_v37 = vpop.eup %6389 }
 0x830   :  { %v1380_v5 = vmul.f32 %v6390_v37, %v1374_v33  ;;  %v9213_v37 = vmov 0  ;;  %v1570_v33 = vadd.s32 28, %v6907_v9 }
 0x832   :  { %v1382_v34 = vadd.f32 %v1380_v5, %v1191_v46  ;;  %v1571_v5 = vand.u32 31, %v1570_v33  ;;  %v9231_v33 = vmov 0  ;;  %v6283_v46 = vld [vmem:[%s9245_s8 + $0x30] ss:$8 sps:$4 sm:$0xff]  }
 0x833   :  { %v6392_v10 = vpop.eup %6391 }
 0x834   :  { %v1381_v48 = vmul.f32 %v6392_v10, %v1375_v41  ;;  %v1754_v41 = vand.u32 31, %v1753_v60  ;;  %vm1572_vm11 = vcmp.eq.s32.totalorder %v1571_v5, %v7524_v59  ;;  %vm1573_vm1 = vcmp.eq.s32.totalorder %v1571_v5, %v1501_v7  ;;  %v6281_v10 = vld [vmem:[%s9245_s8 + $0x34] ss:$8 sps:$4 sm:$0xff]  }
 0x835   :  { %vm7588_vm6 = vmpackc.low %vm1573_vm1, %vm1572_vm11 }
 0x836   :  { %v1383_v8 = vadd.f32 %v1381_v48, %v1192_v53  ;;  %vm1757_vm9 = vcmp.eq.s32.totalorder %v1754_v41, %v7529_v16  ;;  %vm1755_vm10 = vcmp.eq.s32.totalorder %v1754_v41, %v7524_v59  ;;  %vm1756_vm14 = vcmp.eq.s32.totalorder %v1754_v41, %v1501_v7  ;;  %v6284_v48 = vld [vmem:[%s9299_s6 + $0x8] ss:$12 sps:$4 sm:$0xff]  }
 0x837   :  { %v1692_v53 = vadd.s32 31, %v6907_v9 }
 0x838   :  { %v1384_v45 = vpack.c.bf16 %v1383_v8, %v1382_v34  ;;  %v1875_v34 = vadd.s32 4, %v6907_v9  ;;  %v6288_v8 = vld [vmem:[%s9299_s6 + $0x4] ss:$12 sps:$4 sm:$0xff]  }
 0x83a   :  { %5571 = vmatmul.mubr.bf16.vlgmr.msra.gmra.mxu0 %v1384_v45  ;;  %v1693_v45 = vand.u32 31, %v1692_v53  ;;  %v1876_v38 = vand.u32 31, %v1875_v34  ;;  %v1936_v53 = vadd.s32 5, %v6907_v9 }
 0x83b   :  { %5594 = vmatprep.mubr.msk.bf16.mxu0 %vm8944_vm7, %v6677_v62  ;;  %vm1635_vm7 = vcmp.eq.s32.totalorder %v1632_v18, %v7529_v16  ;;  %v1814_v18 = vadd.s32 3, %v6907_v9 }
 0x83c   :  { %vm7545_vm15 = vmpackc.low %vm1636_vm5, %vm1635_vm7  ;;  %vm1697_vm1 = vcmp.eq.s32.totalorder %v1693_v45, %v7532_v2  ;;  %vm1879_vm11 = vcmp.eq.s32.totalorder %v1876_v38, %v7529_v16  ;;  %vm1694_vm12 = vcmp.eq.s32.totalorder %v1693_v45, %v7524_v59  ;;  %v1937_v34 = vand.u32 31, %v1936_v53 }
 0x83d   :  { %v9212_v51 = vsel %vm7545_vm15, 4294967295, %v9211_v51  ;;  %5591 = vmatpush3.bf16.msk.msra.mxu0 %vm7545_vm15, %v8988_v17  ;;  %vm7557_vm5 = vmpackc.low %vm1507_vm13, %vm1506_vm2  ;;  %vm1574_vm2 = vcmp.eq.s32.totalorder %v1571_v5, %v7529_v16  ;;  %vm1575_vm13 = vcmp.eq.s32.totalorder %v1571_v5, %v7532_v2  ;;  %vm1877_vm15 = vcmp.eq.s32.totalorder %v1876_v38, %v7524_v59 }
 0x83e   :  { %5592 = vmatprep.subr.bf16.mxu0 %v6677_v62  ;;  %v9214_v37 = vsel %vm7557_vm5, 4294967295, %v9213_v37  ;;  %5577 = vmatpush3.bf16.msk.msra.mxu1 %vm7557_vm5, %v8988_v17  ;;  %vm7566_vm7 = vmpackc.low %vm1634_vm8, %vm1633_vm4  ;;  %vm1758_vm4 = vcmp.eq.s32.totalorder %v1754_v41, %v7532_v2  ;;  %vm1878_vm5 = vcmp.eq.s32.totalorder %v1876_v38, %v1501_v7  ;;  %v1815_v60 = vand.u32 31, %v1814_v18 }
 0x83f   :  { %v9216_v14 = vsel %vm7566_vm7, 4294967295, %v9215_v14  ;;  %5582 = vmatprep.subr.bf16.mxu1 %v6677_v62  ;;  %vm7579_vm8 = vmpackc.low %vm1575_vm13, %vm1574_vm2  ;;  %vm1880_vm13 = vcmp.eq.s32.totalorder %v1876_v38, %v7532_v2  ;;  %v9233_v5 = vmov 0  ;;  %v9239_v38 = vmov 0 }
 0x840   :  { %vm7584_vm0 = vmpackc.low %vm1758_vm4, %vm1757_vm9  ;;  %vm1696_vm9 = vcmp.eq.s32.totalorder %v1693_v45, %v7529_v16 }
 0x841   :  { %5593 = vmatpush3.bf16.msk.msra.mxu0 %vm7566_vm7, %v8988_v17  ;;  %vm7595_vm2 = vmpackc.low %vm1756_vm14, %vm1755_vm10  ;;  %vm1695_vm10 = vcmp.eq.s32.totalorder %v1693_v45, %v1501_v7  ;;  %v9237_v45 = vmov 0 }
 0x842   :  { %5606 = vmatprep.subr.bf16.mxu0 %v6677_v62  ;;  %vm7603_vm4 = vmpackc.low %vm1697_vm1, %vm1696_vm9  ;;  %vm1818_vm1 = vcmp.eq.s32.totalorder %v1815_v60, %v7529_v16 }
 0x843   :  { %vm7608_vm14 = vmpackc.low %vm1880_vm13, %vm1879_vm11  ;;  %vm1819_vm11 = vcmp.eq.s32.totalorder %v1815_v60, %v7532_v2 }
 0x844   :  { %v9228_v1 = vsel %vm7608_vm14, 4294967295, %v9227_v1  ;;  %vm7612_vm7 = vmpackc.low %vm1695_vm10, %vm1694_vm12  ;;  %vm1816_vm12 = vcmp.eq.s32.totalorder %v1815_v60, %v7524_v59  ;;  %vm1817_vm10 = vcmp.eq.s32.totalorder %v1815_v60, %v1501_v7 }
 0x845   :  { %vm7618_vm9 = vmpackc.low %vm1878_vm5, %vm1877_vm15  ;;  %vm1940_vm15 = vcmp.eq.s32.totalorder %v1937_v34, %v7529_v16  ;;  %vm1941_vm5 = vcmp.eq.s32.totalorder %v1937_v34, %v7532_v2 }
 0x846   :  { %v9232_v33 = vsel %vm7618_vm9, 4294967295, %v9231_v33  ;;  %vm7624_vm13 = vmpackc.low %vm1819_vm11, %vm1818_vm1  ;;  %vm1938_vm1 = vcmp.eq.s32.totalorder %v1937_v34, %v7524_v59  ;;  %vm1939_vm11 = vcmp.eq.s32.totalorder %v1937_v34, %v1501_v7 }
 0x847   :  { %v9234_v5 = vsel %vm7624_vm13, 4294967295, %v9233_v5  ;;  %vm7629_vm3 = vmpackc.low %vm1817_vm10, %vm1816_vm12  ;;  %vm8996_vm12 = vcmask 261120   ;;  %vm9241_vm10 = vmmov 0  }
 0x848   :  { %vm7636_vm9 = vmpackc.low %vm1941_vm5, %vm1940_vm15  ;;  %vm9242_vm15 = vnez %v9232_v33  ;;  %vm9244_vm5 = vnez %v9234_v5 }
 0x849   :  { %v9238_v45 = vsel %vm7636_vm9, 4294967295, %v9237_v45  ;;  %vm7641_vm13 = vmpackc.low %vm1939_vm11, %vm1938_vm1  ;;  %vm9246_vm1 = vnez %v9210_v19  ;;  %vm9247_vm11 = vnez %v9214_v37 }
 0x84a   :  { %v9240_v38 = vsel %vm7641_vm13, 4294967295, %v9239_v38 }
 0x8fa   :  { %v1483_v18 = vpop.f32.mrf.mxu0 }
 0x8fc   :  { %v5572_v60 = vpop.f32.mrf.mxu0 }
 0x8fe   :  { %v1486_v6 = vpop.f32.mrf.mxu0 }
 0x8ff   :  { %v7645_v53 = vpack.c.bf16 %v1486_v6, %v1483_v18  ;;  %v9243_v6 = vmov 0  }
 0x900   :  { %v5573_v16 = vpop.f32.mrf.mxu0 }
 0x901   :  { %5579 = vmatmul.mubr.msk.bf16.vlgmr.msra.gmra.mxu1 %vm8996_vm12, %v7645_v53  ;;  %5595 = vmatmul.mubr.msk.bf16.vlgmr.msra.gmra.mxu0 %vm8996_vm12, %v7645_v53 }
 0x902   :  { %5583 = vmatpush3.bf16.msk.msra.mxu1 %vm7579_vm8, %v8988_v17  ;;  %5607 = vmatpush3.bf16.msk.msra.mxu0 %vm7584_vm0, %v8988_v17 }
 0x903   :  { %5584 = vmatprep.subr.bf16.mxu1 %v6677_v62  ;;  %5608 = vmatprep.subr.bf16.mxu0 %v6677_v62 }
 0x904   :  { %5586 = vmatprep.mubr.msk.bf16.mxu1 %vm9241_vm10, %v6677_v62  ;;  %5610 = vmatprep.mubr.msk.bf16.mxu0 %vm9241_vm10, %v6677_v62 }
 0x906   :  { %5585 = vmatpush3.bf16.msk.msra.mxu1 %vm7588_vm6, %v8988_v17  ;;  %5609 = vmatpush3.bf16.msk.msra.mxu0 %vm7595_vm2, %v8988_v17 }
 0x907   :  { %5598 = vmatprep.subr.bf16.mxu1 %v6677_v62  ;;  %5622 = vmatprep.subr.bf16.mxu0 %v6677_v62 }
 0x909   :  { %5587 = vmatmul.mubr.msk.bf16.vlgmr.msra.gmra.mxu1 %vm8996_vm12, %v7645_v53  ;;  %5611 = vmatmul.mubr.msk.bf16.vlgmr.msra.gmra.mxu0 %vm8996_vm12, %v7645_v53 }
 0x90a   :  { %5599 = vmatpush3.bf16.msk.msra.mxu1 %vm7603_vm4, %v8988_v17  ;;  %5623 = vmatpush3.bf16.msk.msra.mxu0 %vm7608_vm14, %v8988_v17 }
 0x90b   :  { %5600 = vmatprep.subr.bf16.mxu1 %v6677_v62  ;;  %5624 = vmatprep.subr.bf16.mxu0 %v6677_v62 }
 0x90c   :  { %5602 = vmatprep.mubr.msk.bf16.mxu1 %vm9241_vm10, %v6677_v62  ;;  %5626 = vmatprep.mubr.msk.bf16.mxu0 %vm9241_vm10, %v6677_v62 }
 0x90e   :  { %5601 = vmatpush3.bf16.msk.msra.mxu1 %vm7612_vm7, %v8988_v17  ;;  %5625 = vmatpush3.bf16.msk.msra.mxu0 %vm9242_vm15, %v8988_v17 }
 0x90f   :  { %5614 = vmatprep.subr.bf16.mxu1 %v6677_v62  ;;  %2061 = vmatprep.subr.bf16.mxu0 %v9243_v6 }
 0x911   :  { %5603 = vmatmul.mubr.msk.bf16.vlgmr.msra.gmra.mxu1 %vm8996_vm12, %v7645_v53  ;;  %5627 = vmatmul.mubr.msk.bf16.vlgmr.msra.gmra.mxu0 %vm8996_vm12, %v7645_v53 }
 0x912   :  { %5615 = vmatpush3.bf16.msk.msra.mxu1 %vm9244_vm5, %v8988_v17  ;;  %5618 = vmatprep.mubr.msk.bf16.mxu1 %vm9241_vm10, %v6677_v62 }
 0x913   :  { %5616 = vmatprep.subr.bf16.mxu1 %v6677_v62 }
 0x916   :  { %5617 = vmatpush3.bf16.msk.msra.mxu1 %vm7629_vm3, %v8988_v17 }
 0x917   :  { %5630 = vmatprep.subr.bf16.mxu1 %v6677_v62 }
 0x919   :  { %5619 = vmatmul.mubr.msk.bf16.vlgmr.msra.gmra.mxu1 %vm8996_vm12, %v7645_v53 }
 0x91a   :  { %5631 = vmatpush3.bf16.msk.msra.mxu1 %vm7636_vm9, %v8988_v17  ;;  %5634 = vmatprep.mubr.msk.bf16.mxu1 %vm9241_vm10, %v6677_v62  ;;  %vm9248_vm10 = vcmask 130048  }
 0x91b   :  { %5632 = vmatprep.subr.bf16.mxu1 %v6677_v62  ;;  %v6272_v62 = vld [vmem:[%s9245_s8 + $0x4] ss:$8 sps:$4 sm:$0xff]  }
 0x91c   :  { %4994 = vmatprep.mubr.msk.bf16.mxu0 %vm9248_vm10, %v6272_v62 }
 0x91e   :  { %5633 = vmatpush3.bf16.msk.msra.mxu1 %vm7641_vm13, %v8988_v17 }
 0x91f   :  { %5638 = vmatprep.subr.msk.bf16.mxu1 %vm9246_vm1, %v8988_v17 }
 0x921   :  { %5635 = vmatmul.mubr.msk.bf16.vlgmr.msra.gmra.mxu1 %vm8996_vm12, %v7645_v53 }
 0x922   :  { %5639 = vmatpush3.bf16.msk.msra.mxu1 %vm9246_vm1, %v8988_v17  ;;  %vm9001_vm1 = vcmp.lt.s32.totalorder %v6912_v12, 12 }
 0x923   :  { %5640 = vmatprep.subr.msk.bf16.mxu1 %vm9247_vm11, %v8988_v17 }
 0x926   :  { %5641 = vmatpush3.bf16.msk.msra.mxu1 %vm9247_vm11, %v8988_v17  ;;  %vm7748_vm11 = vmpackc.low %vm9001_vm1, %vm9001_vm1 }
 0x927   :  { %5646 = vmatprep.subr.msk.bf16.mxu1 %vm7579_vm8, %v8988_v17 }
 0x9c1   :  { %v7739_v59 = vpop.f32.mrf.mxu1  ;;  %v1681_v2 = vpop.f32.mrf.mxu0 }
 0x9c3   :  { %v5580_v19 = vpop.f32.mrf.mxu1  ;;  %v5596_v7 = vpop.f32.mrf.mxu0 }
 0x9c4   :  { %v1490_v7 = vand.u32 3, %v6907_v9 }
 0x9c5   :  { %v7741_v34 = vpop.f32.mrf.mxu1  ;;  %v1684_v18 = vpop.f32.mrf.mxu0 }
 0x9c6   :  { %vm7752_vm10 = vcmp.ge.s32.totalorder %v1490_v7, 1  ;;  %vm7767_vm9 = vcmp.lt.s32.totalorder %v1490_v7, 3 }
 0x9c7   :  { %v5581_v60 = vpop.f32.mrf.mxu1  ;;  %v5597_v16 = vpop.f32.mrf.mxu0  ;;  %vm1497_vm12 = vmand %vm9001_vm1, %vm7752_vm10 }
 0x9c8   :  { %vm7763_vm13 = vmpackc.low %vm1497_vm12, %vm1497_vm12  ;;  %vm1493_vm12 = vcmp.ge.s32.totalorder %v6912_v12, 4 }
 0x9c9   :  { %v1620_v58 = vpop.f32.mrf.mxu1  ;;  %v1803_v37 = vpop.f32.mrf.mxu0  ;;  %vm7777_vm1 = vmpackc.low %vm7767_vm9, %vm7767_vm9 }
 0x9ca   :  { %vm7806_vm15 = vmpackc.low %vm1493_vm12, %vm1493_vm12 }
 0x9cb   :  { %v5588_v42 = vpop.f32.mrf.mxu1  ;;  %v5612_v24 = vpop.f32.mrf.mxu0 }
 0x9cc   :  { %v9249_v42 = vmov 0 }
 0x9cd   :  { %v1623_v55 = vpop.f32.mrf.mxu1  ;;  %v1806_v54 = vpop.f32.mrf.mxu0  ;;  %v9250_v42 = vsel %vm7748_vm11, 4294967295, %v9249_v42 }
 0x9ce   :  { %v4977_v4 = vpack.c.bf16 %v1806_v54, %v1803_v37  ;;  %v6274_v37 = vld [vmem:[%s9245_s8] ss:$8 sps:$4 sm:$0xff]  }
 0x9cf   :  { %v5589_v17 = vpop.f32.mrf.mxu1  ;;  %v5613_v49 = vpop.f32.mrf.mxu0 }
 0x9d1   :  { %v1742_v35 = vpop.f32.mrf.mxu1  ;;  %v1925_v62 = vpop.f32.mrf.mxu0 }
 0x9d3   :  { %v5604_v47 = vpop.f32.mrf.mxu1  ;;  %v5628_v19 = vpop.f32.mrf.mxu0 }
 0x9d5   :  { %v1745_v28 = vpop.f32.mrf.mxu1  ;;  %v1928_v43 = vpop.f32.mrf.mxu0 }
 0x9d6   :  { %v4971_v24 = vpack.c.bf16 %v1928_v43, %v1925_v62  ;;  %v9253_v43 = vmov 0  ;;  %v4980_v54 = vpack.c.bf16 %v1745_v28, %v1742_v35  ;;  %v4986_v35 = vpack.c.bf16 %v1623_v55, %v1620_v58  ;;  %v6286_v55 = vld [vmem:[%s9299_s6] ss:$12 sps:$4 sm:$0xff]   ;;  %v6291_v28 = vld [vmem:[%s9299_s6 + $0x18] ss:$12 sps:$4 sm:$0xff]  }
 0x9d7   :  { %v5605_v17 = vpop.f32.mrf.mxu1  ;;  %v5629_v49 = vpop.f32.mrf.mxu0  ;;  %v9254_v43 = vsel %vm7763_vm13, 4294967295, %v9253_v43 }
 0x9d8   :  { %4972 = vmatpush1.bf16.msk.msra.mxu0 %vm7748_vm11, %v4971_v24 }
 0x9d9   :  { %v1864_v47 = vpop.f32.mrf.mxu1  ;;  %2063 = vmatprep.subr.bf16.mxu0 %v9243_v6 }
 0x9db   :  { %v5620_v16 = vpop.f32.mrf.mxu1 }
 0x9dc   :  { %v9257_v16 = vmov 0 }
 0x9dd   :  { %v1867_v19 = vpop.f32.mrf.mxu1  ;;  %v9258_v16 = vsel %vm7777_vm1, 4294967295, %v9257_v16 }
 0x9de   :  { %v4974_v62 = vpack.c.bf16 %v1867_v19, %v1864_v47 }
 0x9df   :  { %v5621_v24 = vpop.f32.mrf.mxu1 }
 0x9e0   :  { %4975 = vmatpush1.bf16.msk.msra.mxu0 %vm7763_vm13, %v4974_v62  ;;  %vm7790_vm13 = vmpackc.low %vm7752_vm10, %vm7752_vm10  ;;  %v9259_v62 = vmov 0 }
 0x9e1   :  { %v1986_v49 = vpop.f32.mrf.mxu1  ;;  %2065 = vmatprep.subr.bf16.mxu0 %v9243_v6  ;;  %v9260_v62 = vsel %vm7790_vm13, 4294967295, %v9259_v62 }
 0x9e3   :  { %v5636_v47 = vpop.f32.mrf.mxu1 }
 0x9e4   :  { %4978 = vmatpush1.bf16.msk.msra.mxu0 %vm7777_vm1, %v4977_v4  ;;  %vm1496_vm1 = vmand %vm1493_vm12, %vm7767_vm9  ;;  %v9261_v4 = vmov 0 }
 0x9e5   :  { %v1989_v7 = vpop.f32.mrf.mxu1  ;;  %2067 = vmatprep.subr.bf16.mxu0 %v9243_v6  ;;  %vm7799_vm11 = vmpackc.low %vm1496_vm1, %vm1496_vm1 }
 0x9e6   :  { %v9262_v4 = vsel %vm7799_vm11, 4294967295, %v9261_v4  ;;  %vm1495_vm1 = vmand %vm1493_vm12, %vm7752_vm10  ;;  %v4992_v58 = vpack.c.bf16 %v1989_v7, %v1986_v49  ;;  %vm9270_vm12 = vcmask 130048  }
 0x9e7   :  { %v5637_v19 = vpop.f32.mrf.mxu1 }
 0x9e8   :  { %2068 = vmatpush1.bf16.msra.mxu0 %v7645_v53  ;;  %v4983_v53 = vpack.c.bf16 %v1684_v18, %v1681_v2  ;;  %v4989_v18 = vpack.c.bf16 %v7741_v34, %v7739_v59  ;;  %v6275_v59 = vld [vmem:[%s9245_s8 + $0x14] ss:$8 sps:$4 sm:$0xff]   ;;  %v6277_v34 = vld [vmem:[%s9245_s8 + $0x10] ss:$8 sps:$4 sm:$0xff]  }
 0x9e9   :  { %2069 = vmatprep.subr.bf16.mxu0 %v9243_v6 }
 0x9ec   :  { %4981 = vmatpush1.bf16.msk.msra.mxu0 %vm7790_vm13, %v4980_v54  ;;  %vm7815_vm13 = vmpackc.low %vm1495_vm1, %vm1495_vm1 }
 0x9ed   :  { %2071 = vmatprep.subr.bf16.mxu0 %v9243_v6 }
 0x9f0   :  { %4984 = vmatpush1.bf16.msk.msra.mxu0 %vm7799_vm11, %v4983_v53  ;;  %vm9267_vm11 = vcmp.lt.s32.totalorder %v6912_v12, 12 }
 0x9f1   :  { %2073 = vmatprep.subr.bf16.mxu0 %v9243_v6  ;;  %vm1498_vm14 = vmand %vm9267_vm11, %vm7767_vm9  ;;  %vm9271_vm9 = vcmask 261120  }
 0x9f2   :  { %vm7828_vm10 = vmpackc.low %vm1498_vm14, %vm1498_vm14 }
 0x9f3   :  { %vm9272_vm14 = vmmov %vm9271_vm9 }
 0x9f4   :  { %4987 = vmatpush1.bf16.msk.msra.mxu0 %vm7806_vm15, %v4986_v35  ;;  %vm9273_vm11 = vmmov %vm9271_vm9 }
 0x9f5   :  { %2075 = vmatprep.subr.bf16.mxu0 %v9243_v6  ;;  %vm9274_vm1 = vmmov %vm9271_vm9 }
 0x9f8   :  { %4990 = vmatpush1.bf16.msk.msra.mxu0 %vm7815_vm13, %v4989_v18 }
 0x9f9   :  { %2091 = vmatprep.subr.bf16.mxu0 %v9243_v6 }
 0x9fc   :  { %4993 = vmatpush2.bf16.msk.msra.mxu0 %vm7828_vm10, %v4992_v58 }
 0x9ff   :  { %2094 = vmatmul.mubr.bf16.vlgmr.msra.gmra.mxu0 %v6274_v37 }
 0xa00   :  { %4995 = vmatprep.mubr.msk.bf16.mxu0 %vm9270_vm12, %v6275_v59  ;;  %vm9275_vm12 = vmmov %vm9274_vm1 }
 0xa07   :  { %2102 = vmatmul.mubr.bf16.gmra.mxu0 %v6277_v34 }
 0xabf   :  { %v7838_v60 = vpop.f32.mrf.mxu0 }
 0xac0   :  { %v2126_v17 = vsel %vm9271_vm9, %v7838_v60, 0.0  ;;  %v2142_v24 = vmul.f32 %v7838_v60, %v7838_v60  ;;  %vm9276_vm9 = vmmov %vm9274_vm1 }
 0xac1   :  { %2127 = vadd.xlane.f32.xlu0 %v2126_v17  ;;  %v2097_v49 = vpop.f32.mrf.mxu0 }
 0xac2   :  { %v2146_v47 = vsel %vm9272_vm14, %v2142_v24, 0.0  ;;  %vm9277_vm14 = vmmov %vm9274_vm1 }
 0xac3   :  { %2147 = vadd.xlane.f32.xlu1 %v2146_v47  ;;  %v7845_v7 = vpop.f32.mrf.mxu0 }
 0xac4   :  { %v2143_v19 = vmul.f32 %v7845_v7, %v7845_v7  ;;  %v2129_v35 = vsel %vm9274_vm1, %v7845_v7, 0.0 }
 0xac5   :  { %v2100_v54 = vpop.f32.mrf.mxu0 }
 0xac6   :  { %v2149_v53 = vsel %vm9273_vm11, %v2143_v19, 0.0  ;;  %vm9278_vm11 = vmmov %vm9274_vm1 }
 0xac7   :  { %2150 = vadd.xlane.f32.xlu0 %v2149_v53  ;;  %2130 = vadd.xlane.f32.xlu1 %v2129_v35  ;;  %v7852_v18 = vpop.f32.mrf.mxu0 }
 0xac8   :  { %v2132_v58 = vsel %vm9275_vm12, %v7852_v18, 0.0  ;;  %v2144_v37 = vmul.f32 %v7852_v18, %v7852_v18  ;;  %vm9281_vm12 = vmmov %vm9274_vm1 }
 0xac9   :  { %v2105_v59 = vpop.f32.mrf.mxu0 }
 0xaca   :  { %v2152_v34 = vsel %vm9276_vm9, %v2144_v37, 0.0  ;;  %vm9283_vm9 = vmmov %vm9274_vm1 }
 0xacb   :  { %2133 = vadd.xlane.f32.xlu0 %v2132_v58  ;;  %v7859_v17 = vpop.f32.mrf.mxu0  ;;  %2153 = vadd.xlane.f32.xlu1 %v2152_v34 }
 0xacc   :  { %v2135_v49 = vsel %vm9277_vm14, %v7859_v17, 0.0  ;;  %v2145_v47 = vmul.f32 %v7859_v17, %v7859_v17  ;;  %vm9284_vm14 = vnez %v9212_v51  ;;  %v6278_v51 = vld [vmem:[%s9245_s8 + $0x24] ss:$8 sps:$4 sm:$0xff]  }
 0xacd   :  { %v2108_v24 = vpop.f32.mrf.mxu0 }
 0xace   :  { %v2155_v19 = vsel %vm9278_vm11, %v2145_v47, 0.0  ;;  %vm9285_vm11 = vmmov %vm9274_vm1 }
 0xacf   :  { %2136 = vadd.xlane.f32.xlu0 %v2135_v49 }
 0xad3   :  { %2156 = vadd.xlane.f32.xlu0 %v2155_v19 }
 0xb4a   :  { %v2128_v54 = vpop.xlane.xlu0 %2127 }
 0xb4b   :  { %v2138_v53 = vmul.f32 0.03125, %v2128_v54 }
 0xb4c   :  { %v2148_v35 = vpop.xlane.xlu1 %2147 }
 0xb4d   :  { %v2162_v59 = vmul.f32 %v2138_v53, %v2138_v53  ;;  %v2158_v37 = vmul.f32 0.03125, %v2148_v35 }
 0xb4f   :  { %v2166_v58 = vsub.f32 %v2158_v37, %v2162_v59 }
 0xb50   :  { %v2151_v36 = vpop.xlane.xlu0 %2150  ;;  %v2131_v15 = vpop.xlane.xlu1 %2130 }
 0xb51   :  { %v2174_v34 = vadd.f32 1e-05, %v2166_v58  ;;  %v2139_v24 = vmul.f32 0.03125, %v2131_v15  ;;  %v2159_v56 = vmul.f32 0.03125, %v2151_v36 }
 0xb53   :  { %6393 = vrsqrt.f32 %v2174_v34  ;;  %v2163_v50 = vmul.f32 %v2139_v24, %v2139_v24  ;;  %v2170_v34 = vld [vmem:[%s9279_s19] sm:$0xff] }
 0xb54   :  { %v2134_v11 = vpop.xlane.xlu0 %2133  ;;  %v2154_v3 = vpop.xlane.xlu1 %2153 }
 0xb55   :  { %v2167_v49 = vsub.f32 %v2159_v56, %v2163_v50  ;;  %v2140_v32 = vmul.f32 0.03125, %v2134_v11  ;;  %v2160_v47 = vmul.f32 0.03125, %v2154_v3  ;;  %v2171_v3 = vld [vmem:[%s9279_s19 + $0x8] sm:$0xff] }
 0xb57   :  { %v2175_v19 = vadd.f32 1e-05, %v2167_v49  ;;  %v2164_v31 = vmul.f32 %v2140_v32, %v2140_v32 }
 0xb58   :  { %v2137_v54 = vpop.xlane.xlu0 %2136 }
 0xb59   :  { %6395 = vrsqrt.f32 %v2175_v19  ;;  %v2168_v35 = vsub.f32 %v2160_v47, %v2164_v31  ;;  %v2141_v59 = vmul.f32 0.03125, %v2137_v54  ;;  %v2172_v47 = vld [vmem:[%s9279_s19 + $0x10] sm:$0xff]  ;;  %v2186_v19 = vld [vmem:[%s9280_s30] sm:$0xff] }
 0xb5b   :  { %v2176_v37 = vadd.f32 1e-05, %v2168_v35  ;;  %v2165_v36 = vmul.f32 %v2141_v59, %v2141_v59 }
 0xb5c   :  { %v2157_v58 = vpop.xlane.xlu0 %2156 }
 0xb5d   :  { %6397 = vrsqrt.f32 %v2176_v37  ;;  %v2161_v15 = vmul.f32 0.03125, %v2157_v58 }
 0xb5f   :  { %v2169_v39 = vsub.f32 %v2161_v15, %v2165_v36  ;;  %v2187_v36 = vld [vmem:[%s9280_s30 + $0x8] sm:$0xff]  ;;  %v2188_v15 = vld [vmem:[%s9280_s30 + $0x10] sm:$0xff] }
 0xb60   :  { %v6394_v25 = vpop.eup %6393 }
 0xb61   :  { %v2177_v50 = vadd.f32 1e-05, %v2169_v39  ;;  %v2182_v56 = vmul.f32 %v6394_v25, %v2170_v34  ;;  %v2173_v39 = vld [vmem:[%s9279_s19 + $0x18] sm:$0xff] }
 0xb63   :  { %6399 = vrsqrt.f32 %v2177_v50  ;;  %2200 = vperm.xlu1 %5871, %v2182_v56   ;;  %v2190_v49 = vmul.f32 %v2182_v56, %v2138_v53 }
 0xb65   :  { %v2194_v58 = vsub.f32 %v2186_v19, %v2190_v49 }
 0xb66   :  { %v6396_v31 = vpop.eup %6395 }
 0xb67   :  { %v2183_v11 = vmul.f32 %v6396_v31, %v2171_v3  ;;  %v2189_v3 = vld [vmem:[%s9280_s30 + $0x18] sm:$0xff] }
 0xb69   :  { %2205 = vperm.xlu0 %5870, %v2183_v11   ;;  %v2191_v35 = vmul.f32 %v2183_v11, %v2139_v24 }
 0xb6a   :  { %v6398_v54 = vpop.eup %6397 }
 0xb6b   :  { %v2184_v37 = vmul.f32 %v6398_v54, %v2172_v47  ;;  %v2195_v34 = vsub.f32 %v2187_v36, %v2191_v35 }
 0xb6d   :  { %2210 = vperm.xlu1 %5871, %v2184_v37   ;;  %2224 = vperm.xlu0 %5870, %v2194_v58   ;;  %v2192_v25 = vmul.f32 %v2184_v37, %v2140_v32 }
 0xb6f   :  { %v2196_v50 = vsub.f32 %v2188_v15, %v2192_v25 }
 0xb70   :  { %v6400_v40 = vpop.eup %6399 }
 0xb71   :  { %2229 = vperm.xlu1 %5871, %v2195_v34   ;;  %2234 = vperm.xlu0 %5870, %v2196_v50   ;;  %v2185_v53 = vmul.f32 %v6400_v40, %v2173_v39 }
 0xb73   :  { %v2193_v56 = vmul.f32 %v2185_v53, %v2141_v59 }
 0xb75   :  { %2215 = vperm.xlu1 %5871, %v2185_v53   ;;  %v2197_v31 = vsub.f32 %v2189_v3, %v2193_v56 }
 0xb79   :  { %2239 = vperm.xlu1 %5871, %v2197_v31  }
 0xbde   :  { %v2201_v24 = vpop.permute.xlu1 %2200 }
 0xbdf   :  { %v2218_v49 = vmul.f32 %v2201_v24, %v7838_v60 }
 0xbe4   :  { %v2206_v11 = vpop.permute.xlu0 %2205 }
 0xbe5   :  { %v2219_v32 = vmul.f32 %v2206_v11, %v7845_v7 }
 0xbe8   :  { %v2211_v47 = vpop.permute.xlu1 %2210  ;;  %v2225_v19 = vpop.permute.xlu0 %2224 }
 0xbe9   :  { %v2242_v54 = vadd.f32 %v2225_v19, %v2218_v49  ;;  %v2220_v35 = vmul.f32 %v2211_v47, %v7852_v18 }
 0xbeb   :  { %v2246_v37 = vmin.f32 %v2242_v54, 20.0 }
 0xbec   :  { %v2230_v58 = vpop.permute.xlu1 %2229  ;;  %v2235_v36 = vpop.permute.xlu0 %2234 }
 0xbed   :  { %v2250_v40 = vmul.f32 1.442695, %v2246_v37  ;;  %v2243_v59 = vadd.f32 %v2230_v58, %v2219_v32  ;;  %v2244_v15 = vadd.f32 %v2235_v36, %v2220_v35 }
 0xbef   :  { %6401 = vpow2.f32 %v2250_v40  ;;  %v2247_v25 = vmin.f32 %v2243_v59, 20.0  ;;  %v2248_v39 = vmin.f32 %v2244_v15, 20.0 }
 0xbf0   :  { %v2216_v34 = vpop.permute.xlu1 %2215 }
 0xbf1   :  { %v2252_v50 = vmul.f32 1.442695, %v2247_v25  ;;  %v2254_v53 = vmul.f32 1.442695, %v2248_v39  ;;  %v2221_v60 = vmul.f32 %v2216_v34, %v7859_v17 }
 0xbf3   :  { %6403 = vpow2.f32 %v2252_v50 }
 0xbf4   :  { %6405 = vpow2.f32 %v2254_v53  ;;  %v2240_v56 = vpop.permute.xlu1 %2239 }
 0xbf5   :  { %v2245_v7 = vadd.f32 %v2240_v56, %v2221_v60 }
 0xbf7   :  { %v2249_v3 = vmin.f32 %v2245_v7, 20.0 }
 0xbf9   :  { %v2256_v18 = vmul.f32 1.442695, %v2249_v3 }
 0xbfb   :  { %6407 = vpow2.f32 %v2256_v18 }
 0xbfc   :  { %v6402_v31 = vpop.eup %6401 }
 0xbfd   :  { %v2258_v24 = vadd.f32 1.0, %v6402_v31 }
 0xbff   :  { %v2262_v11 = vmul.f32 %v2258_v24, %v2258_v24 }
 0xc00   :  { %v6404_v49 = vpop.eup %6403 }
 0xc01   :  { %v6406_v47 = vpop.eup %6405  ;;  %v2274_v19 = vadd.f32 1.0, %v2262_v11  ;;  %v2259_v32 = vadd.f32 1.0, %v6404_v49  ;;  %v4998_v50 = vadd.f32 -1.0, %v2262_v11 }
 0xc02   :  { %v2260_v35 = vadd.f32 1.0, %v6406_v47 }
 0xc03   :  { %v2263_v37 = vmul.f32 %v2259_v32, %v2259_v32  ;;  %6409 = vrcp.f32 %v2274_v19  ;;  %v2270_v56 = vmul.f32 %v4998_v50, %v2242_v54  ;;  %v9282_v54 = vmov 1.0|1.0  }
 0xc04   :  { %v2264_v36 = vmul.f32 %v2260_v35, %v2260_v35 }
 0xc05   :  { %v2275_v58 = vadd.f32 1.0, %v2263_v37  ;;  %v4999_v53 = vadd.f32 -1.0, %v2263_v37 }
 0xc06   :  { %v2276_v40 = vadd.f32 1.0, %v2264_v36  ;;  %v5000_v47 = vadd.f32 -1.0, %v2264_v36 }
 0xc07   :  { %6411 = vrcp.f32 %v2275_v58  ;;  %v2271_v3 = vmul.f32 %v4999_v53, %v2243_v59 }
 0xc08   :  { %v6408_v17 = vpop.eup %6407  ;;  %6413 = vrcp.f32 %v2276_v40  ;;  %v2272_v35 = vmul.f32 %v5000_v47, %v2244_v15 }
 0xc09   :  { %v2261_v25 = vadd.f32 1.0, %v6408_v17 }
 0xc0b   :  { %v2265_v39 = vmul.f32 %v2261_v25, %v2261_v25 }
 0xc0d   :  { %v2277_v34 = vadd.f32 1.0, %v2265_v39  ;;  %v5001_v19 = vadd.f32 -1.0, %v2265_v39 }
 0xc0f   :  { %6415 = vrcp.f32 %v2277_v34  ;;  %v2273_v58 = vmul.f32 %v5001_v19, %v2245_v7 }
 0xc10   :  { %v6410_v60 = vpop.eup %6409 }
 0xc11   :  { %v2282_v31 = vmul.f32 %v6410_v60, %v2270_v56 }
 0xc14   :  { %v6412_v18 = vpop.eup %6411 }
 0xc15   :  { %v2283_v24 = vmul.f32 %v6412_v18, %v2271_v3  ;;  %v6414_v32 = vpop.eup %6413 }
 0xc16   :  { %v2284_v11 = vmul.f32 %v6414_v32, %v2272_v35 }
 0xc17   :  { %v7878_v49 = vpack.c.bf16 %v2283_v24, %v2282_v31 }
 0xc19   :  { %5642 = vmatprep.mubr.msk.bf16.mxu1 %vm9274_vm1, %v7878_v49 }
 0xc1c   :  { %v6416_v17 = vpop.eup %6415 }
 0xc1d   :  { %v2285_v37 = vmul.f32 %v6416_v17, %v2273_v58 }
 0xc1f   :  { %v7882_v40 = vpack.c.bf16 %v2285_v37, %v2284_v11 }
 0xc21   :  { %5643 = vmatmul.mubr.msk.bf16.vlgmr.msra.gmra.mxu1 %vm9281_vm12, %v7882_v40 }
 0xc22   :  { %5647 = vmatpush3.bf16.msk.msra.mxu1 %vm7579_vm8, %v9282_v54  ;;  %5650 = vmatprep.mubr.msk.bf16.mxu1 %vm9283_vm9, %v7878_v49  ;;  %vm9286_vm8 = vmmov %vm9274_vm1  ;;  %vm9287_vm1 = vnez %v9216_v14  ;;  %v6280_v14 = vld [vmem:[%s9245_s8 + $0x20] ss:$8 sps:$4 sm:$0xff]  }
 0xc23   :  { %5648 = vmatprep.subr.msk.bf16.mxu1 %vm7588_vm6, %v9282_v54 }
 0xc26   :  { %5649 = vmatpush3.bf16.msk.msra.mxu1 %vm7588_vm6, %v9282_v54  ;;  %vm9288_vm6 = vmmov %vm9286_vm8 }
 0xc27   :  { %5654 = vmatprep.subr.msk.bf16.mxu1 %vm9284_vm14, %v9282_v54  ;;  %vm9289_vm12 = vmmov %vm9288_vm6 }
 0xc28   :  { %vm9290_vm9 = vmmov %vm9288_vm6 }
 0xc29   :  { %5651 = vmatmul.mubr.msk.bf16.vlgmr.msra.gmra.mxu1 %vm9285_vm11, %v7882_v40  ;;  %vm9297_vm11 = vnez %v9232_v33 }
 0xc2a   :  { %5655 = vmatpush3.bf16.msk.msra.mxu1 %vm9284_vm14, %v9282_v54  ;;  %5658 = vmatprep.mubr.msk.bf16.mxu1 %vm9286_vm8, %v7878_v49 }
 0xc2b   :  { %5656 = vmatprep.subr.msk.bf16.mxu1 %vm9287_vm1, %v9282_v54 }
 0xc2e   :  { %5657 = vmatpush3.bf16.msk.msra.mxu1 %vm9287_vm1, %v9282_v54 }
 0xc2f   :  { %5662 = vmatprep.subr.msk.bf16.mxu1 %vm7603_vm4, %v9282_v54 }
 0xc31   :  { %5659 = vmatmul.mubr.msk.bf16.vlgmr.msra.gmra.mxu1 %vm9288_vm6, %v7882_v40 }
 0xc32   :  { %5663 = vmatpush3.bf16.msk.msra.mxu1 %vm7603_vm4, %v9282_v54  ;;  %5666 = vmatprep.mubr.msk.bf16.mxu1 %vm9289_vm12, %v7878_v49  ;;  %vm9291_vm4 = vmmov %vm9288_vm6  ;;  %vm9302_vm6 = vnez %v9240_v38 }
 0xc33   :  { %5664 = vmatprep.subr.msk.bf16.mxu1 %vm7612_vm7, %v9282_v54 }
 0xc36   :  { %5665 = vmatpush3.bf16.msk.msra.mxu1 %vm7612_vm7, %v9282_v54  ;;  %vm9292_vm7 = vmmov %vm9291_vm4 }
 0xc37   :  { %5670 = vmatprep.subr.msk.bf16.mxu1 %vm7584_vm0, %v9282_v54 }
 0xc39   :  { %5667 = vmatmul.mubr.msk.bf16.vlgmr.msra.gmra.mxu1 %vm9290_vm9, %v7882_v40  ;;  %vm9304_vm9 = vcmask 130048  }
 0xc3a   :  { %5671 = vmatpush3.bf16.msk.msra.mxu1 %vm7584_vm0, %v9282_v54  ;;  %5674 = vmatprep.mubr.msk.bf16.mxu1 %vm9291_vm4, %v7878_v49  ;;  %vm9293_vm0 = vmmov %vm9291_vm4 }
 0xc3b   :  { %5672 = vmatprep.subr.msk.bf16.mxu1 %vm7595_vm2, %v9282_v54  ;;  %vm9295_vm14 = vmmov %vm9293_vm0  ;;  %4996 = vmatprep.mubr.msk.bf16.mxu0 %vm9304_vm9, %v6278_v51 }
 0xc3c   :  { %vm9300_vm8 = vmmov %vm9293_vm0  ;;  %2110 = vmatmul.mubr.bf16.gmra.mxu0 %v6280_v14 }
 0xc3d   :  { %vm9301_vm1 = vmmov %vm9293_vm0 }
 0xc3e   :  { %5673 = vmatpush3.bf16.msk.msra.mxu1 %vm7595_vm2, %v9282_v54  ;;  %vm9294_vm2 = vnez %v9228_v1  ;;  %vm9303_vm12 = vmmov %vm9293_vm0 }
 0xc3f   :  { %5678 = vmatprep.subr.msk.bf16.mxu1 %vm9244_vm5, %v9282_v54  ;;  %vm9305_vm4 = vmmov %vm9304_vm9 }
 0xc40   :  { %4997 = vmatprep.mubr.msk.bf16.mxu0 %vm9305_vm4, %v6281_v10  ;;  %vm9319_vm9 = vmmov %vm9301_vm1 }
 0xc41   :  { %5675 = vmatmul.mubr.msk.bf16.vlgmr.msra.gmra.mxu1 %vm9292_vm7, %v7882_v40  ;;  %vm9306_vm7 = vmmov %vm9293_vm0 }
 0xc42   :  { %5679 = vmatpush3.bf16.msk.msra.mxu1 %vm9244_vm5, %v9282_v54  ;;  %5682 = vmatprep.mubr.msk.bf16.mxu1 %vm9293_vm0, %v7878_v49  ;;  %vm9296_vm5 = vmmov %vm9293_vm0  ;;  %vm9307_vm0 = vnez %v9250_v42 }
 0xc43   :  { %5680 = vmatprep.subr.msk.bf16.mxu1 %vm7629_vm3, %v9282_v54  ;;  %vm9324_vm4 = vmmov %vm9301_vm1 }
 0xc44   :  { %2118 = vmatmul.mubr.bf16.gmra.mxu0 %v6283_v46 }
 0xc45   :  { %2838 = vmatprep.mubr.bf16.mxu0 %v6288_v8 }
 0xc46   :  { %5681 = vmatpush3.bf16.msk.msra.mxu1 %vm7629_vm3, %v9282_v54  ;;  %vm9298_vm3 = vnez %v9238_v45 }
 0xc47   :  { %5686 = vmatprep.subr.msk.bf16.mxu1 %vm9294_vm2, %v9282_v54 }
 0xc49   :  { %5683 = vmatmul.mubr.msk.bf16.vlgmr.msra.gmra.mxu1 %vm9295_vm14, %v7882_v40  ;;  %vm9309_vm14 = vnez %v9254_v43 }
 0xc4a   :  { %5687 = vmatpush3.bf16.msk.msra.mxu1 %vm9294_vm2, %v9282_v54  ;;  %5690 = vmatprep.mubr.msk.bf16.mxu1 %vm9296_vm5, %v7878_v49  ;;  %vm9308_vm2 = vnez %v9260_v62  ;;  %vm9310_vm5 = vnez %v9262_v4 }
 0xc4b   :  { %5688 = vmatprep.subr.msk.bf16.mxu1 %vm9297_vm11, %v9282_v54 }
 0xc4e   :  { %5689 = vmatpush3.bf16.msk.msra.mxu1 %vm9297_vm11, %v9282_v54  ;;  %vm9311_vm11 = vnez %v9258_v16  ;;  %v6289_v16 = vld [vmem:[%s9299_s6 + $0x1c] ss:$12 sps:$4 sm:$0xff]  }
 0xc4f   :  { %5694 = vmatprep.subr.msk.bf16.mxu1 %vm9298_vm3, %v9282_v54 }
 0xc51   :  { %5691 = vmatmul.mubr.msk.bf16.vlgmr.msra.gmra.mxu1 %vm9300_vm8, %v7882_v40  ;;  %vm9316_vm8 = vmmov %vm9301_vm1 }
 0xc52   :  { %5695 = vmatpush3.bf16.msk.msra.mxu1 %vm9298_vm3, %v9282_v54  ;;  %5698 = vmatprep.mubr.msk.bf16.mxu1 %vm9301_vm1, %v7878_v49  ;;  %vm9312_vm3 = vmmov %vm9301_vm1 }
 0xc53   :  { %5696 = vmatprep.subr.msk.bf16.mxu1 %vm9302_vm6, %v9282_v54 }
 0xc56   :  { %5697 = vmatpush3.bf16.msk.msra.mxu1 %vm9302_vm6, %v9282_v54  ;;  %vm9317_vm6 = vmmov %vm9301_vm1 }
 0xc59   :  { %5699 = vmatmul.mubr.msk.bf16.vlgmr.msra.gmra.mxu1 %vm9303_vm12, %v7882_v40  ;;  %vm9318_vm12 = vmmov %vm9301_vm1 }
 0xc5a   :  { %5706 = vmatprep.mubr.msk.bf16.mxu1 %vm9306_vm7, %v6284_v48  ;;  %vm9325_vm7 = vmmov %vm9301_vm1 }
 0xce1   :  { %v8004_v30 = vpop.f32.mrf.mxu1 }
 0xce3   :  { %v8006_v1 = vpop.f32.mrf.mxu1 }
 0xce5   :  { %v8008_v29 = vpop.f32.mrf.mxu1 }
 0xce6   :  { %v5075_v33 = vpack.c.bf16 %v8008_v29, %v8004_v30 }
 0xce7   :  { %v8012_v5 = vpop.f32.mrf.mxu1 }
 0xce8   :  { %v5078_v41 = vpack.c.bf16 %v8012_v5, %v8006_v1 }
 0xce9   :  { %v5652_v45 = vpop.f32.mrf.mxu1 }
 0xceb   :  { %v2409_v38 = vpop.f32.mrf.mxu1 }
 0xced   :  { %v5653_v59 = vpop.f32.mrf.mxu1 }
 0xcee   :  { %v5069_v43 = vpack.c.bf16 %v5653_v59, %v5652_v45 }
 0xcef   :  { %v2412_v15 = vpop.f32.mrf.mxu1 }
 0xcf0   :  { %v5072_v4 = vpack.c.bf16 %v2412_v15, %v2409_v38 }
 0xcf1   :  { %v5660_v7 = vpop.f32.mrf.mxu1 }
 0xcf3   :  { %v2462_v36 = vpop.f32.mrf.mxu1 }
 0xcf5   :  { %v5661_v25 = vpop.f32.mrf.mxu1 }
 0xcf7   :  { %v2465_v39 = vpop.f32.mrf.mxu1 }
 0xcf8   :  { %v5066_v42 = vpack.c.bf16 %v2465_v39, %v2462_v36 }
 0xcf9   :  { %v5668_v34 = vpop.f32.mrf.mxu1 }
 0xcfb   :  { %v2515_v50 = vpop.f32.mrf.mxu1 }
 0xcfd   :  { %v5669_v53 = vpop.f32.mrf.mxu1 }
 0xcfe   :  { %v5057_v37 = vpack.c.bf16 %v5669_v53, %v5668_v34  ;;  %v5063_v53 = vpack.c.bf16 %v5661_v25, %v5660_v7  ;;  %v6285_v7 = vld [vmem:[%s9299_s6 + $0x20] ss:$12 sps:$4 sm:$0xff]  }
 0xcff   :  { %v2518_v60 = vpop.f32.mrf.mxu1 }
 0xd00   :  { %v5060_v10 = vpack.c.bf16 %v2518_v60, %v2515_v50 }
 0xd01   :  { %v5676_v56 = vpop.f32.mrf.mxu1 }
 0xd03   :  { %v2568_v3 = vpop.f32.mrf.mxu1 }
 0xd05   :  { %v5677_v18 = vpop.f32.mrf.mxu1 }
 0xd06   :  { %v5093_v62 = vpack.c.bf16 %v5677_v18, %v5676_v56 }
 0xd07   :  { %v2571_v31 = vpop.f32.mrf.mxu1 }
 0xd08   :  { %v5096_v25 = vpack.c.bf16 %v2571_v31, %v2568_v3 }
 0xd09   :  { %v5684_v24 = vpop.f32.mrf.mxu1 }
 0xd0b   :  { %v2621_v47 = vpop.f32.mrf.mxu1 }
 0xd0d   :  { %v5685_v19 = vpop.f32.mrf.mxu1 }
 0xd0e   :  { %v5087_v48 = vpack.c.bf16 %v5685_v19, %v5684_v24 }
 0xd0f   :  { %v2624_v32 = vpop.f32.mrf.mxu1 }
 0xd11   :  { %v5692_v35 = vpop.f32.mrf.mxu1 }
 0xd13   :  { %v2674_v58 = vpop.f32.mrf.mxu1 }
 0xd15   :  { %v5693_v17 = vpop.f32.mrf.mxu1 }
 0xd16   :  { %v5081_v11 = vpack.c.bf16 %v5693_v17, %v5692_v35 }
 0xd17   :  { %v2677_v54 = vpop.f32.mrf.mxu1 }
 0xd18   :  { %v5084_v51 = vpack.c.bf16 %v2677_v54, %v2674_v58  ;;  %5472 = vmatprep.subr.msk.bf16.mxu0 %vm9307_vm0, %v5081_v11  ;;  %v5090_v58 = vpack.c.bf16 %v2624_v32, %v2621_v47 }
 0xd19   :  { %v5700_v14 = vpop.f32.mrf.mxu1  ;;  %5473 = vmatpush3.bf16.msk.msra.mxu0 %vm9308_vm2, %v5057_v37 }
 0xd1a   :  { %5474 = vmatprep.subr.msk.bf16.mxu0 %vm9307_vm0, %v5084_v51  ;;  %vm9327_vm0 = vmmov %vm9301_vm1 }
 0xd1b   :  { %v2727_v46 = vpop.f32.mrf.mxu1 }
 0xd1d   :  { %v5701_v8 = vpop.f32.mrf.mxu1  ;;  %5475 = vmatpush3.bf16.msk.msra.mxu0 %vm9308_vm2, %v5060_v10  ;;  %vm9328_vm2 = vnez %v9192_v63 }
 0xd1e   :  { %v5099_v34 = vpack.c.bf16 %v5701_v8, %v5700_v14  ;;  %5476 = vmatprep.subr.msk.bf16.mxu0 %vm9309_vm14, %v5087_v48 }
 0xd1f   :  { %v2730_v35 = vpop.f32.mrf.mxu1 }
 0xd20   :  { %v5102_v17 = vpack.c.bf16 %v2730_v35, %v2727_v46  ;;  %5702 = vmatprep.subr.msk.bf16.mxu1 %vm7828_vm10, %v5099_v34 }
 0xd21   :  { %5477 = vmatpush3.bf16.msk.msra.mxu0 %vm9310_vm5, %v5063_v53  ;;  %5703 = vmatpush3.bf16.msk.msra.mxu1 %vm7828_vm10, %v5099_v34 }
 0xd22   :  { %5478 = vmatprep.subr.msk.bf16.mxu0 %vm9309_vm14, %v5090_v58  ;;  %5704 = vmatprep.subr.msk.bf16.mxu1 %vm7828_vm10, %v5102_v17  ;;  %vm9329_vm14 = vnez %v9198_v20 }
 0xd25   :  { %5479 = vmatpush3.bf16.msk.msra.mxu0 %vm9310_vm5, %v5066_v42  ;;  %5705 = vmatpush3.bf16.msk.msra.mxu1 %vm7828_vm10, %v5102_v17  ;;  %vm9315_vm10 = vmmov %vm9301_vm1  ;;  %vm9330_vm5 = vnez %v9194_v13 }
 0xd26   :  { %5480 = vmatprep.subr.msk.bf16.mxu0 %vm9311_vm11, %v5093_v62 }
 0xd28   :  { %5707 = vmatmul.mubr.msk.bf16.vlgmr.msra.gmra.mxu1 %vm9312_vm3, %v6285_v7  ;;  %vm9332_vm3 = vnez %v9196_v44 }
 0xd29   :  { %5481 = vmatpush3.bf16.msk.msra.mxu0 %vm7806_vm15, %v5069_v43 }
 0xd2a   :  { %5482 = vmatprep.subr.msk.bf16.mxu0 %vm9311_vm11, %v5096_v25  ;;  %vm9331_vm11 = vnez %v9200_v0 }
 0xd2d   :  { %5483 = vmatpush3.bf16.msk.msra.mxu0 %vm7806_vm15, %v5072_v4  ;;  %vm9314_vm15 = vmmov %vm9301_vm1 }
 0xd2e   :  { %5484 = vmatprep.subr.bf16.mxu0 %v7882_v40  ;;  %v8065_v40 = vpop.f32.mrf.mxu0 }
 0xd30   :  { %v2113_v30 = vpop.f32.mrf.mxu0 }
 0xd31   :  { %5485 = vmatpush3.bf16.msk.msra.mxu0 %vm7815_vm13, %v5075_v33 }
 0xd32   :  { %5486 = vmatprep.subr.bf16.mxu0 %v7878_v49  ;;  %v8067_v29 = vpop.f32.mrf.mxu0 }
 0xd34   :  { %v2116_v33 = vpop.f32.mrf.mxu0 }
 0xd35   :  { %5487 = vmatpush3.bf16.msk.msra.mxu0 %vm7815_vm13, %v5078_v41  ;;  %vm9313_vm13 = vmmov %vm9301_vm1 }
 0xd36   :  { %v8069_v45 = vpop.f32.mrf.mxu0 }
 0xd38   :  { %2839 = vmatmul.mubr.bf16.vlgmr.msra.gmra.mxu0 %v6286_v55  ;;  %v2121_v49 = vpop.f32.mrf.mxu0 }
 0xd39   :  { %2846 = vmatprep.mubr.bf16.mxu0 %v6289_v16 }
 0xd3a   :  { %v8071_v38 = vpop.f32.mrf.mxu0 }
 0xd3c   :  { %v2124_v1 = vpop.f32.mrf.mxu0 }
 0xd40   :  { %2847 = vmatmul.mubr.bf16.gmra.mxu0 %v6291_v28 }
 0xde8   :  { %v5708_v5 = vpop.f32.mrf.mxu1 }
 0xdea   :  { %v2889_v2 = vpop.f32.mrf.mxu1 }
 0xdec   :  { %v5709_v36 = vpop.f32.mrf.mxu1 }
 0xdee   :  { %v2892_v31 = vpop.f32.mrf.mxu1 }
 0xdf8   :  { %v5488_v41 = vpop.f32.mrf.mxu0 }
 0xdfa   :  { %v5489_v59 = vpop.f32.mrf.mxu0 }
 0xdfb   :  { %v5490_v15 = vadd.f32 %v5489_v59, %v5488_v41 }
 0xdfc   :  { %v5491_v39 = vpop.f32.mrf.mxu0 }
 0xdfd   :  { %v8073_v50 = vadd.f32 %v5490_v15, %v2889_v2 }
 0xdfe   :  { %v5492_v60 = vpop.f32.mrf.mxu0 }
 0xdff   :  { %v5493_v56 = vadd.f32 %v5492_v60, %v5491_v39  ;;  %v2904_v3 = vsel %vm9313_vm13, %v8073_v50, 0.0  ;;  %v2920_v18 = vmul.f32 %v8073_v50, %v8073_v50  ;;  %vm9333_vm13 = vnez %v9202_v57 }
 0xe00   :  { %v5494_v24 = vpop.f32.mrf.mxu0  ;;  %2905 = vadd.xlane.f32.xlu0 %v2904_v3 }
 0xe01   :  { %v8079_v47 = vadd.f32 %v5493_v56, %v2892_v31  ;;  %v2924_v19 = vsel %vm9314_vm15, %v2920_v18, 0.0  ;;  %vm9334_vm15 = vnez %v9206_v21 }
 0xe02   :  { %v5495_v32 = vpop.f32.mrf.mxu0  ;;  %2925 = vadd.xlane.f32.xlu1 %v2924_v19 }
 0xe03   :  { %v5496_v11 = vadd.f32 %v5495_v32, %v5494_v24  ;;  %v2921_v37 = vmul.f32 %v8079_v47, %v8079_v47  ;;  %v2907_v14 = vsel %vm9315_vm10, %v8079_v47, 0.0  ;;  %v2948_v32 = vld [vmem:[%s9320_s16] sm:$0xff]  ;;  %vm9335_vm10 = vnez %v9204_v27 }
 0xe04   :  { %v5497_v54 = vpop.f32.mrf.mxu0 }
 0xe05   :  { %v8084_v51 = vadd.f32 %v5708_v5, %v5496_v11  ;;  %v2927_v10 = vsel %vm9316_vm8, %v2921_v37, 0.0  ;;  %vm9336_vm8 = vmmov %vm9327_vm0 }
 0xe06   :  { %v5498_v46 = vpop.f32.mrf.mxu0  ;;  %2908 = vadd.xlane.f32.xlu1 %v2907_v14  ;;  %2928 = vadd.xlane.f32.xlu0 %v2927_v10  ;;  %v2949_v10 = vld [vmem:[%s9320_s16 + $0x8] sm:$0xff] }
 0xe07   :  { %v5499_v48 = vadd.f32 %v5498_v46, %v5497_v54  ;;  %v2922_v8 = vmul.f32 %v8084_v51, %v8084_v51  ;;  %v2910_v35 = vsel %vm9317_vm6, %v8084_v51, 0.0 }
 0xe09   :  { %v8091_v34 = vadd.f32 %v5709_v36, %v5499_v48  ;;  %v2930_v53 = vsel %vm9301_vm1, %v2922_v8, 0.0  ;;  %vm9340_vm1 = vcmask 130048  }
 0xe0a   :  { %2931 = vadd.xlane.f32.xlu1 %v2930_v53  ;;  %2911 = vadd.xlane.f32.xlu0 %v2910_v35  ;;  %v2950_v53 = vld [vmem:[%s9320_s16 + $0x10] sm:$0xff]  ;;  %v2964_v35 = vld [vmem:[%s9321_s18] sm:$0xff]  ;;  %vm9341_vm6 = vmmov %vm9340_vm1 }
 0xe0b   :  { %v2913_v58 = vsel %vm9318_vm12, %v8091_v34, 0.0  ;;  %v2923_v17 = vmul.f32 %v8091_v34, %v8091_v34  ;;  %vm9342_vm12 = vcmp.lt.s32.totalorder %v6907_v9, 113 }
 0xe0d   :  { %v2933_v42 = vsel %vm9319_vm9, %v2923_v17, 0.0  ;;  %vm9343_vm9 = vmmov %vm9342_vm12 }
 0xe0e   :  { %2914 = vadd.xlane.f32.xlu0 %v2913_v58 }
 0xe12   :  { %2934 = vadd.xlane.f32.xlu0 %v2933_v42 }
 0xe89   :  { %v2906_v62 = vpop.xlane.xlu0 %2905 }
 0xe8a   :  { %v2916_v7 = vmul.f32 0.03125, %v2906_v62 }
 0xe8b   :  { %v2926_v43 = vpop.xlane.xlu1 %2925 }
 0xe8c   :  { %v2940_v25 = vmul.f32 %v2916_v7, %v2916_v7  ;;  %v2936_v4 = vmul.f32 0.03125, %v2926_v43  ;;  %v2965_v43 = vld [vmem:[%s9321_s18 + $0x8] sm:$0xff] }
 0xe8e   :  { %v2944_v55 = vsub.f32 %v2936_v4, %v2940_v25  ;;  %v2966_v25 = vld [vmem:[%s9321_s18 + $0x10] sm:$0xff] }
 0xe8f   :  { %v2909_v16 = vpop.xlane.xlu1 %2908  ;;  %v2929_v28 = vpop.xlane.xlu0 %2928 }
 0xe90   :  { %v2952_v30 = vadd.f32 1e-05, %v2944_v55  ;;  %v2917_v33 = vmul.f32 0.03125, %v2909_v16  ;;  %v2937_v1 = vmul.f32 0.03125, %v2929_v28  ;;  %v2951_v55 = vld [vmem:[%s9320_s16 + $0x18] sm:$0xff] }
 0xe92   :  { %6417 = vrsqrt.f32 %v2952_v30  ;;  %v2941_v49 = vmul.f32 %v2917_v33, %v2917_v33 }
 0xe93   :  { %v2932_v5 = vpop.xlane.xlu1 %2931  ;;  %v2912_v2 = vpop.xlane.xlu0 %2911 }
 0xe94   :  { %v2945_v41 = vsub.f32 %v2937_v1, %v2941_v49  ;;  %v2918_v59 = vmul.f32 0.03125, %v2912_v2  ;;  %v2938_v36 = vmul.f32 0.03125, %v2932_v5  ;;  %v2286_v49 = vld [vmem:[%s9322_s22] sm:$0xff]  ;;  %v2288_v5 = vld [vmem:[%s9322_s22 + $0x10] sm:$0xff] }
 0xe96   :  { %v2953_v15 = vadd.f32 1e-05, %v2945_v41  ;;  %v2942_v39 = vmul.f32 %v2918_v59, %v2918_v59  ;;  %v2287_v41 = vld [vmem:[%s9322_s22 + $0x8] sm:$0xff] }
 0xe97   :  { %v2915_v60 = vpop.xlane.xlu0 %2914 }
 0xe98   :  { %6419 = vrsqrt.f32 %v2953_v15  ;;  %v2946_v56 = vsub.f32 %v2938_v36, %v2942_v39  ;;  %v2919_v3 = vmul.f32 0.03125, %v2915_v60  ;;  %v6292_v15 = vld [vmem:[%s9323_s23 + $0x8] sm:$0xff]   ;;  %v6293_v36 = vld [vmem:[%s9323_s23] sm:$0xff]  }
 0xe99   :  { %5710 = vmatprep.subr.bf16.mxu1 %v6292_v15 }
 0xe9a   :  { %v2954_v18 = vadd.f32 1e-05, %v2946_v56  ;;  %v2943_v24 = vmul.f32 %v2919_v3, %v2919_v3  ;;  %5711 = vmatpush3.bf16.msra.mxu1 %v6292_v15 }
 0xe9b   :  { %v2935_v31 = vpop.xlane.xlu0 %2934  ;;  %5712 = vmatprep.subr.bf16.mxu1 %v6293_v36 }
 0xe9c   :  { %6421 = vrsqrt.f32 %v2954_v18  ;;  %v2939_v19 = vmul.f32 0.03125, %v2935_v31 }
 0xe9e   :  { %v2947_v11 = vsub.f32 %v2939_v19, %v2943_v24  ;;  %5713 = vmatpush3.bf16.msra.mxu1 %v6293_v36 }
 0xe9f   :  { %v6418_v37 = vpop.eup %6417 }
 0xea0   :  { %v2955_v54 = vadd.f32 1e-05, %v2947_v11  ;;  %v2960_v14 = vmul.f32 %v6418_v37, %v2948_v32 }
 0xea2   :  { %6423 = vrsqrt.f32 %v2955_v54  ;;  %2978 = vperm.xlu1 %5871, %v2960_v14   ;;  %v2968_v8 = vmul.f32 %v2960_v14, %v2916_v7 }
 0xea4   :  { %v2972_v42 = vsub.f32 %v2964_v35, %v2968_v8 }
 0xea5   :  { %v6420_v46 = vpop.eup %6419 }
 0xea6   :  { %v2961_v48 = vmul.f32 %v6420_v46, %v2949_v10 }
 0xea8   :  { %2983 = vperm.xlu0 %5870, %v2961_v48   ;;  %v2969_v62 = vmul.f32 %v2961_v48, %v2917_v33  ;;  %v2967_v33 = vld [vmem:[%s9321_s18 + $0x18] sm:$0xff] }
 0xea9   :  { %v6422_v58 = vpop.eup %6421 }
 0xeaa   :  { %v2962_v17 = vmul.f32 %v6422_v58, %v2950_v53  ;;  %v2973_v16 = vsub.f32 %v2965_v43, %v2969_v62 }
 0xeac   :  { %v2970_v4 = vmul.f32 %v2962_v17, %v2918_v59  ;;  %3002 = vperm.xlu0 %5870, %v2972_v42   ;;  %2988 = vperm.xlu1 %5871, %v2962_v17   ;;  %v2289_v59 = vld [vmem:[%s9322_s22 + $0x18] sm:$0xff] }
 0xeae   :  { %v2974_v28 = vsub.f32 %v2966_v25, %v2970_v4 }
 0xeaf   :  { %v6424_v7 = vpop.eup %6423 }
 0xeb0   :  { %3007 = vperm.xlu1 %5871, %v2973_v16   ;;  %3012 = vperm.xlu0 %5870, %v2974_v28   ;;  %v2963_v30 = vmul.f32 %v6424_v7, %v2951_v55 }
 0xeb2   :  { %v2971_v1 = vmul.f32 %v2963_v30, %v2919_v3 }
 0xeb4   :  { %2292 = vperm.xlu0 %5870, %v2286_v49   ;;  %2993 = vperm.xlu1 %5871, %v2963_v30   ;;  %v2975_v2 = vsub.f32 %v2967_v33, %v2971_v1 }
 0xeb8   :  { %2302 = vperm.xlu0 %5870, %v2288_v5   ;;  %3017 = vperm.xlu1 %5871, %v2975_v2  }
 0xebc   :  { %2297 = vperm.xlu1 %5871, %v2287_v41  }
 0xec0   :  { %2307 = vperm.xlu1 %5871, %v2289_v59  }
 0xf1d   :  { %v2979_v39 = vpop.permute.xlu1 %2978 }
 0xf1e   :  { %v2996_v56 = vmul.f32 %v2979_v39, %v8073_v50 }
 0xf23   :  { %v2984_v60 = vpop.permute.xlu0 %2983 }
 0xf24   :  { %v2997_v24 = vmul.f32 %v2984_v60, %v8079_v47 }
 0xf27   :  { %v2989_v3 = vpop.permute.xlu1 %2988  ;;  %v3003_v18 = vpop.permute.xlu0 %3002 }
 0xf28   :  { %v3020_v31 = vadd.f32 %v3003_v18, %v2996_v56  ;;  %v2998_v19 = vmul.f32 %v2989_v3, %v8084_v51 }
 0xf2a   :  { %v3024_v32 = vmin.f32 %v3020_v31, 20.0 }
 0xf2b   :  { %v3008_v11 = vpop.permute.xlu1 %3007  ;;  %v3013_v37 = vpop.permute.xlu0 %3012 }
 0xf2c   :  { %v3028_v54 = vmul.f32 1.442695, %v3024_v32  ;;  %v3021_v14 = vadd.f32 %v3008_v11, %v2997_v24  ;;  %v3022_v10 = vadd.f32 %v3013_v37, %v2998_v19 }
 0xf2e   :  { %6425 = vpow2.f32 %v3028_v54  ;;  %v3025_v46 = vmin.f32 %v3021_v14, 20.0  ;;  %v3026_v48 = vmin.f32 %v3022_v10, 20.0 }
 0xf2f   :  { %v2994_v8 = vpop.permute.xlu1 %2993  ;;  %v2293_v39 = vpop.permute.xlu0 %2292 }
 0xf30   :  { %v3030_v53 = vmul.f32 1.442695, %v3025_v46  ;;  %v3032_v35 = vmul.f32 1.442695, %v3026_v48  ;;  %v2999_v50 = vmul.f32 %v2994_v8, %v8091_v34  ;;  %v2310_v19 = vadd.f32 %v2293_v39, %v8065_v40 }
 0xf32   :  { %6427 = vpow2.f32 %v3030_v53 }
 0xf33   :  { %6429 = vpow2.f32 %v3032_v35  ;;  %v3018_v58 = vpop.permute.xlu1 %3017  ;;  %v2303_v35 = vpop.permute.xlu0 %2302 }
 0xf34   :  { %v3023_v47 = vadd.f32 %v3018_v58, %v2999_v50 }
 0xf36   :  { %v3027_v17 = vmin.f32 %v3023_v47, 20.0 }
 0xf37   :  { %v2298_v60 = vpop.permute.xlu1 %2297 }
 0xf38   :  { %v3034_v51 = vmul.f32 1.442695, %v3027_v17  ;;  %v2311_v32 = vadd.f32 %v2298_v60, %v8067_v29  ;;  %v2312_v17 = vadd.f32 %v2303_v35, %v8069_v45 }
 0xf3a   :  { %6431 = vpow2.f32 %v3034_v51 }
 0xf3b   :  { %v6426_v42 = vpop.eup %6425  ;;  %v2308_v50 = vpop.permute.xlu1 %2307 }
 0xf3c   :  { %v3036_v62 = vadd.f32 1.0, %v6426_v42  ;;  %v2313_v40 = vadd.f32 %v2308_v50, %v8071_v38 }
 0xf3e   :  { %v3040_v43 = vmul.f32 %v3036_v62, %v3036_v62 }
 0xf3f   :  { %v6428_v25 = vpop.eup %6427 }
 0xf40   :  { %v6430_v4 = vpop.eup %6429  ;;  %v3052_v55 = vadd.f32 1.0, %v3040_v43  ;;  %v3037_v16 = vadd.f32 1.0, %v6428_v25  ;;  %v5106_v2 = vadd.f32 -1.0, %v3040_v43 }
 0xf41   :  { %v3038_v28 = vadd.f32 1.0, %v6430_v4 }
 0xf42   :  { %6433 = vrcp.f32 %v3052_v55  ;;  %v3041_v7 = vmul.f32 %v3037_v16, %v3037_v16  ;;  %v3048_v36 = vmul.f32 %v5106_v2, %v3020_v31  ;;  %v6296_v55 = vld [vmem:[%s9326_s0 + $0x4] ss:$12 sps:$4 sm:$0xff]   ;;  %v6297_v16 = vld [vmem:[%s9326_s0 + $0x8] ss:$12 sps:$4 sm:$0xff]  }
 0xf43   :  { %v3042_v30 = vmul.f32 %v3038_v28, %v3038_v28  ;;  %3331 = vmatprep.mubr.bf16.mxu0 %v6296_v55 }
 0xf44   :  { %v3053_v49 = vadd.f32 1.0, %v3041_v7  ;;  %v5107_v59 = vadd.f32 -1.0, %v3041_v7 }
 0xf45   :  { %v3054_v34 = vadd.f32 1.0, %v3042_v30  ;;  %v5108_v24 = vadd.f32 -1.0, %v3042_v30 }
 0xf46   :  { %6435 = vrcp.f32 %v3053_v49  ;;  %v3049_v56 = vmul.f32 %v5107_v59, %v3021_v14 }
 0xf47   :  { %v6432_v1 = vpop.eup %6431  ;;  %6437 = vrcp.f32 %v3054_v34  ;;  %v3050_v8 = vmul.f32 %v5108_v24, %v3022_v10 }
 0xf48   :  { %v3039_v33 = vadd.f32 1.0, %v6432_v1 }
 0xf4a   :  { %v3043_v5 = vmul.f32 %v3039_v33, %v3039_v33 }
 0xf4c   :  { %v3055_v41 = vadd.f32 1.0, %v3043_v5  ;;  %v5109_v54 = vadd.f32 -1.0, %v3043_v5 }
 0xf4e   :  { %6439 = vrcp.f32 %v3055_v41  ;;  %v3051_v31 = vmul.f32 %v5109_v54, %v3023_v47 }
 0xf4f   :  { %v6434_v15 = vpop.eup %6433 }
 0xf50   :  { %v3060_v3 = vmul.f32 %v6434_v15, %v3048_v36 }
 0xf52   :  { %v3064_v37 = vadd.f32 %v3060_v3, %v2310_v19 }
 0xf53   :  { %v6436_v18 = vpop.eup %6435 }
 0xf54   :  { %v3061_v11 = vmul.f32 %v6436_v18, %v3049_v56  ;;  %v6438_v48 = vpop.eup %6437 }
 0xf55   :  { %v3062_v58 = vmul.f32 %v6438_v48, %v3050_v8 }
 0xf56   :  { %v3065_v46 = vadd.f32 %v3061_v11, %v2311_v32 }
 0xf57   :  { %v3066_v29 = vadd.f32 %v3062_v58, %v2312_v17 }
 0xf58   :  { %v3068_v53 = vpack.c.bf16 %v3065_v46, %v3064_v37 }
 0xf5a   :  { %5714 = vmatprep.mubr.msk.bf16.mxu1 %vm9324_vm4, %v3068_v53  ;;  %vm9344_vm4 = vcmp.lt.s32.totalorder %v6907_v9, 112 }
 0xf5b   :  { %v6440_v14 = vpop.eup %6439 }
 0xf5c   :  { %v3063_v51 = vmul.f32 %v6440_v14, %v3051_v31 }
 0xf5e   :  { %v3067_v42 = vadd.f32 %v3063_v51, %v2313_v40 }
 0xf60   :  { %v3069_v62 = vpack.c.bf16 %v3067_v42, %v3066_v29 }
 0xf62   :  { %5715 = vmatmul.mubr.msk.bf16.vlgmr.msra.gmra.mxu1 %vm9325_vm7, %v3069_v62  ;;  %vm9345_vm7 = vmmov %vm9344_vm4 }
 0xf63   :  { %5722 = vmatprep.mubr.msk.bf16.mxu1 %vm9327_vm0, %v6297_v16  ;;  %vm9346_vm0 = vmmov %vm9344_vm4 }
0x1022   :  { %v8125_v43 = vpop.f32.mrf.mxu1 }
0x1024   :  { %v8127_v10 = vpop.f32.mrf.mxu1 }
0x1026   :  { %v8129_v25 = vpop.f32.mrf.mxu1 }
0x1027   :  { %v5917_v47 = vpack.i.bf16 %v8129_v25, %v8125_v43  ;;  %v3246_v38 = vpack.c.bf16 %v8129_v25, %v8125_v43  ;;  %v6298_v25 = vld [vmem:[%s9326_s0 + $0x20] ss:$12 sps:$4 sm:$0xff]  }
0x1028   :  { %v8133_v4 = vpop.f32.mrf.mxu1 }
0x1029   :  { %5918 = vrot.lane.b32.xlu1 %v5917_v47, %s6668_s2  ;;  %5913 = vrot.lane.b32.xlu0 %v5917_v47, %s6672_s9  ;;  %v5932_v45 = vpack.i.bf16 %v8133_v4, %v8127_v10 }
0x102d   :  { %5933 = vrot.lane.b32.xlu1 %v5932_v45, %s6668_s2  ;;  %5923 = vrot.lane.b32.xlu0 %v5932_v45, %s6672_s9  ;;  %s9450_s9 = sld [smem:[#allocation29_spill]] }
0x1031   :  { %5938 = vrot.lane.b32.xlu1 %v5917_v47, %s6674_s29  ;;  %5928 = vrot.lane.b32.xlu0 %v5917_v47, %s6675_s11 }
0x1035   :  { %5953 = vrot.lane.b32.xlu1 %v5932_v45, %s6674_s29  ;;  %5943 = vrot.lane.b32.xlu0 %v5932_v45, %s6675_s11 }
0x1039   :  { %5958 = vrot.lane.b32.xlu1 %v5917_v47, %s6657_s10  ;;  %5948 = vrot.lane.b32.xlu0 %v5917_v47, %s6666_s5 }
0x103d   :  { %5968 = vrot.lane.b32.xlu1 %v5932_v45, %s6657_s10  ;;  %5963 = vrot.lane.b32.xlu0 %v5932_v45, %s6666_s5  ;;  %s9337_s10 = sld [smem:[#allocation27_spill]] }
0x1041   :  { %5978 = vrot.lane.b32.xlu1 %v5917_v47, %s6673_s25  ;;  %5973 = vrot.lane.b32.xlu0 %v5917_v47, %s6676_s3 }
0x1045   :  { %5988 = vrot.lane.b32.xlu1 %v5932_v45, %s6673_s25  ;;  %5983 = vrot.lane.b32.xlu0 %v5932_v45, %s6676_s3 }
0x109b   :  { %v5919_v28 = vpop.permute.xlu1 %5918  ;;  %v5914_v7 = vpop.permute.xlu0 %5913 }
0x109c   :  { %v5921_v30 = vunpack.i.h.bf16 %v5919_v28  ;;  %v5920_v49 = vunpack.i.l.bf16 %v5919_v28  ;;  %v5916_v34 = vunpack.i.h.bf16 %v5914_v7  ;;  %v5915_v1 = vunpack.i.l.bf16 %v5914_v7 }
0x109e   :  { %v5121_v33 = vpack.c.bf16 %v5921_v30, %v5920_v49  ;;  %v5145_v5 = vpack.c.bf16 %v5916_v34, %v5915_v1 }
0x109f   :  { %v5934_v2 = vpop.permute.xlu1 %5933  ;;  %v5924_v41 = vpop.permute.xlu0 %5923 }
0x10a0   :  { %v5936_v59 = vunpack.i.h.bf16 %v5934_v2  ;;  %v5935_v15 = vunpack.i.l.bf16 %v5934_v2  ;;  %v5926_v36 = vunpack.i.h.bf16 %v5924_v41  ;;  %v5925_v39 = vunpack.i.l.bf16 %v5924_v41  ;;  %5508 = vmatprep.subr.msk.bf16.mxu0 %vm9328_vm2, %v5145_v5 }
0x10a1   :  { %5509 = vmatpush3.bf16.msk.msra.mxu0 %vm9329_vm14, %v5121_v33 }
0x10a2   :  { %v5124_v60 = vpack.c.bf16 %v5936_v59, %v5935_v15  ;;  %v5148_v56 = vpack.c.bf16 %v5926_v36, %v5925_v39  ;;  %v3245_v15 = vpack.c.bf16 %v8133_v4, %v8127_v10  ;;  %v6294_v10 = vld [vmem:[%s9326_s0] ss:$12 sps:$4 sm:$0xff]   ;;  %v6299_v4 = vld [vmem:[%s9326_s0 + $0x1c] ss:$12 sps:$4 sm:$0xff]  }
0x10a3   :  { %v5939_v3 = vpop.permute.xlu1 %5938  ;;  %v5929_v18 = vpop.permute.xlu0 %5928 }
0x10a4   :  { %v5941_v24 = vunpack.i.h.bf16 %v5939_v3  ;;  %v5940_v19 = vunpack.i.l.bf16 %v5939_v3  ;;  %v5931_v32 = vunpack.i.h.bf16 %v5929_v18  ;;  %v5930_v11 = vunpack.i.l.bf16 %v5929_v18  ;;  %5510 = vmatprep.subr.msk.bf16.mxu0 %vm9328_vm2, %v5148_v56  ;;  %vm9347_vm2 = vmmov %vm9346_vm0 }
0x10a5   :  { %5511 = vmatpush3.bf16.msk.msra.mxu0 %vm9329_vm14, %v5124_v60  ;;  %vm9348_vm14 = vnez %v9073_v26 }
0x10a6   :  { %v5127_v37 = vpack.c.bf16 %v5941_v24, %v5940_v19  ;;  %v5151_v54 = vpack.c.bf16 %v5931_v32, %v5930_v11 }
0x10a7   :  { %v5954_v46 = vpop.permute.xlu1 %5953  ;;  %v5944_v48 = vpop.permute.xlu0 %5943 }
0x10a8   :  { %v5956_v8 = vunpack.i.h.bf16 %v5954_v46  ;;  %v5955_v53 = vunpack.i.l.bf16 %v5954_v46  ;;  %v5946_v35 = vunpack.i.h.bf16 %v5944_v48  ;;  %v5945_v50 = vunpack.i.l.bf16 %v5944_v48  ;;  %5512 = vmatprep.subr.msk.bf16.mxu0 %vm9330_vm5, %v5151_v54 }
0x10a9   :  { %5513 = vmatpush3.bf16.msk.msra.mxu0 %vm9331_vm11, %v5127_v37 }
0x10aa   :  { %v5130_v31 = vpack.c.bf16 %v5956_v8, %v5955_v53  ;;  %v5154_v63 = vpack.c.bf16 %v5946_v35, %v5945_v50 }
0x10ab   :  { %v5959_v58 = vpop.permute.xlu1 %5958  ;;  %v5949_v14 = vpop.permute.xlu0 %5948 }
0x10ac   :  { %v5961_v20 = vunpack.i.h.bf16 %v5959_v58  ;;  %v5960_v17 = vunpack.i.l.bf16 %v5959_v58  ;;  %v5951_v51 = vunpack.i.h.bf16 %v5949_v14  ;;  %v5950_v40 = vunpack.i.l.bf16 %v5949_v14  ;;  %5514 = vmatprep.subr.msk.bf16.mxu0 %vm9330_vm5, %v5154_v63  ;;  %vm5249_vm5 = vmpackc.low %vm9348_vm14, %vm9348_vm14 }
0x10ad   :  { %5515 = vmatpush3.bf16.msk.msra.mxu0 %vm9331_vm11, %v5130_v31  ;;  %vm9349_vm11 = vmmov %vm9346_vm0 }
0x10ae   :  { %v5133_v29 = vpack.c.bf16 %v5961_v20, %v5960_v17  ;;  %v5157_v42 = vpack.c.bf16 %v5951_v51, %v5950_v40 }
0x10af   :  { %v5969_v62 = vpop.permute.xlu1 %5968  ;;  %v5964_v47 = vpop.permute.xlu0 %5963 }
0x10b0   :  { %v5971_v45 = vunpack.i.h.bf16 %v5969_v62  ;;  %v5970_v55 = vunpack.i.l.bf16 %v5969_v62  ;;  %v5966_v16 = vunpack.i.h.bf16 %v5964_v47  ;;  %v5965_v28 = vunpack.i.l.bf16 %v5964_v47  ;;  %5516 = vmatprep.subr.msk.bf16.mxu0 %vm9332_vm3, %v5157_v42  ;;  %v3415_v47 = vld [vmem:[%s9337_s10] sm:$0xff] }
0x10b1   :  { %5517 = vmatpush3.bf16.msk.msra.mxu0 %vm9333_vm13, %v5133_v29 }
0x10b2   :  { %v5136_v7 = vpack.c.bf16 %v5971_v45, %v5970_v55  ;;  %v5160_v13 = vpack.c.bf16 %v5966_v16, %v5965_v28  ;;  %v3423_v16 = vld [vmem:[%s9338_s4] sm:$0xff]  ;;  %v3416_v28 = vld [vmem:[%s9337_s10 + $0x8] sm:$0xff] }
0x10b3   :  { %v5979_v30 = vpop.permute.xlu1 %5978  ;;  %v5974_v49 = vpop.permute.xlu0 %5973 }
0x10b4   :  { %v5981_v0 = vunpack.i.h.bf16 %v5979_v30  ;;  %v5980_v34 = vunpack.i.l.bf16 %v5979_v30  ;;  %v5976_v1 = vunpack.i.h.bf16 %v5974_v49  ;;  %v5975_v33 = vunpack.i.l.bf16 %v5974_v49  ;;  %5518 = vmatprep.subr.msk.bf16.mxu0 %vm9332_vm3, %v5160_v13  ;;  %vm9350_vm3 = vmmov %vm9346_vm0 }
0x10b5   :  { %5519 = vmatpush3.bf16.msk.msra.mxu0 %vm9333_vm13, %v5136_v7  ;;  %vm9351_vm13 = vmmov %vm9346_vm0 }
0x10b6   :  { %v5163_v5 = vpack.c.bf16 %v5981_v0, %v5980_v34  ;;  %v5139_v2 = vpack.c.bf16 %v5976_v1, %v5975_v33  ;;  %5520 = vmatprep.subr.bf16.mxu0 %v3246_v38  ;;  %v6301_v38 = vld [vmem:[%s9326_s0 + $0x18] ss:$12 sps:$4 sm:$0xff]   ;;  %v3424_v0 = vld [vmem:[%s9338_s4 + $0x8] sm:$0xff] }
0x10b7   :  { %v5989_v41 = vpop.permute.xlu1 %5988  ;;  %v5984_v59 = vpop.permute.xlu0 %5983  ;;  %v3473_v1 = vld [vmem:[%s9339_s21] sm:$0xff] }
0x10b8   :  { %v5991_v36 = vunpack.i.h.bf16 %v5989_v41  ;;  %v5990_v44 = vunpack.i.l.bf16 %v5989_v41  ;;  %v5986_v39 = vunpack.i.h.bf16 %v5984_v59  ;;  %v5985_v60 = vunpack.i.l.bf16 %v5984_v59  ;;  %5718 = vmatprep.subr.msk.bf16.mxu1 %vm9334_vm15, %v5163_v5  ;;  %v6307_v41 = vld [vmem:[#allocation2 + $0xec] ss:$16 sps:$4 sm:$0xff]   ;;  %v6302_v59 = vld [vmem:[#allocation2 + $0xe0] ss:$16 sps:$4 sm:$0xff]  }
0x10b9   :  { %5521 = vmatpush3.bf16.msk.msra.mxu0 %vm9335_vm10, %v5139_v2  ;;  %5719 = vmatpush3.bf16.msk.msra.mxu1 %vm9334_vm15, %v5163_v5  ;;  %v3474_v5 = vld [vmem:[%s9339_s21 + $0x8] sm:$0xff]  ;;  %v6304_v2 = vld [vmem:[#allocation2 + $0xe4] ss:$16 sps:$4 sm:$0xff]  }
0x10ba   :  { %v5166_v57 = vpack.c.bf16 %v5991_v36, %v5990_v44  ;;  %v5142_v43 = vpack.c.bf16 %v5986_v39, %v5985_v60  ;;  %5522 = vmatprep.subr.bf16.mxu0 %v3245_v15  ;;  %v6305_v15 = vld [vmem:[#allocation2 + $0xe8] ss:$16 sps:$4 sm:$0xff]   ;;  %v6310_v36 = vld [vmem:[#allocation2 + $0xc4] ss:$16 sps:$4 sm:$0xff]   ;;  %v6313_v44 = vld [vmem:[#allocation2 + $0xcc] ss:$16 sps:$4 sm:$0xff]  }
0x10bb   :  { %v6308_v39 = vld [vmem:[#allocation2 + $0xc0] ss:$16 sps:$4 sm:$0xff]   ;;  %v6311_v60 = vld [vmem:[#allocation2 + $0xc8] ss:$16 sps:$4 sm:$0xff]  }
0x10bc   :  { %5720 = vmatprep.subr.msk.bf16.mxu1 %vm9334_vm15, %v5166_v57 }
0x10bd   :  { %5523 = vmatpush3.bf16.msk.msra.mxu0 %vm9335_vm10, %v5142_v43  ;;  %5721 = vmatpush3.bf16.msk.msra.mxu1 %vm9334_vm15, %v5166_v57  ;;  %v6316_v57 = vld [vmem:[#allocation2 + $0xa4] ss:$16 sps:$4 sm:$0xff]   ;;  %v6319_v43 = vld [vmem:[#allocation2 + $0xac] ss:$16 sps:$4 sm:$0xff]   ;;  %vm9352_vm15 = vmmov %vm9346_vm0  ;;  %vm9353_vm10 = vnez %v9068_v23 }
0x10be   :  { %3682 = vmatprep.subr.bf16.mxu1 %v6304_v2  ;;  %3725 = vmatprep.subr.bf16.mxu0 %v6307_v41 }
0x10c0   :  { %3332 = vmatmul.mubr.bf16.vlgmr.msra.gmra.mxu0 %v6294_v10  ;;  %5723 = vmatmul.mubr.msk.bf16.vlgmr.msra.gmra.mxu1 %vm9336_vm8, %v6298_v25  ;;  %v6314_v10 = vld [vmem:[#allocation2 + $0xa0] ss:$16 sps:$4 sm:$0xff]   ;;  %v6317_v25 = vld [vmem:[#allocation2 + $0xa8] ss:$16 sps:$4 sm:$0xff]   ;;  %vm5206_vm8 = vmpackc.low %vm9353_vm10, %vm9353_vm10 }
0x10c1   :  { %3339 = vmatprep.mubr.bf16.mxu0 %v6299_v4  ;;  %3714 = vmatprep.mubr.bf16.mxu1 %v9243_v6  ;;  %v6322_v4 = vld [vmem:[#allocation2 + $0x84] ss:$16 sps:$4 sm:$0xff]  }
0x10c2   :  { %3683 = vmatpush1.bf16.msra.mxu1 %v6302_v59  ;;  %3726 = vmatpush1.bf16.msra.mxu0 %v6305_v15 }
0x10c3   :  { %3684 = vmatprep.subr.bf16.mxu1 %v6310_v36  ;;  %3727 = vmatprep.subr.bf16.mxu0 %v6313_v44 }
0x10c6   :  { %3685 = vmatpush1.bf16.msra.mxu1 %v6308_v39  ;;  %3728 = vmatpush1.bf16.msra.mxu0 %v6311_v60 }
0x10c7   :  { %3686 = vmatprep.subr.bf16.mxu1 %v6316_v57  ;;  %3729 = vmatprep.subr.bf16.mxu0 %v6319_v43 }
0x10c8   :  { %3340 = vmatmul.mubr.bf16.gmra.mxu0 %v6301_v38  ;;  %v6325_v38 = vld [vmem:[#allocation2 + $0x8c] ss:$16 sps:$4 sm:$0xff]  }
0x10c9   :  { %3757 = vmatprep.mubr.bf16.mxu0 %v9243_v6 }
0x10ca   :  { %3687 = vmatpush1.bf16.msra.mxu1 %v6314_v10  ;;  %3730 = vmatpush1.bf16.msra.mxu0 %v6317_v25 }
0x10cb   :  { %3688 = vmatprep.subr.bf16.mxu1 %v6322_v4  ;;  %3731 = vmatprep.subr.bf16.mxu0 %v6325_v38 }
0x1180   :  { %v5524_v56 = vpop.f32.mrf.mxu0  ;;  %v8206_v3 = vpop.f32.mrf.mxu1 }
0x1182   :  { %v5525_v18 = vpop.f32.mrf.mxu0  ;;  %v3382_v27 = vpop.f32.mrf.mxu1 }
0x1183   :  { %v5526_v24 = vadd.f32 %v5525_v18, %v5524_v56  ;;  %v6320_v56 = vld [vmem:[#allocation2 + $0x80] ss:$16 sps:$4 sm:$0xff]   ;;  %v6323_v18 = vld [vmem:[#allocation2 + $0x88] ss:$16 sps:$4 sm:$0xff]  }
0x1184   :  { %v5527_v19 = vpop.f32.mrf.mxu0  ;;  %v8208_v21 = vpop.f32.mrf.mxu1  ;;  %3689 = vmatpush1.bf16.msra.mxu1 %v6320_v56  ;;  %3732 = vmatpush1.bf16.msra.mxu0 %v6323_v18 }
0x1185   :  { %v8210_v32 = vadd.f32 %v5526_v24, %v3382_v27  ;;  %v6328_v27 = vld [vmem:[#allocation2 + $0x64] ss:$16 sps:$4 sm:$0xff]   ;;  %v6331_v24 = vld [vmem:[#allocation2 + $0x6c] ss:$16 sps:$4 sm:$0xff]  }
0x1186   :  { %v5528_v11 = vpop.f32.mrf.mxu0  ;;  %v3385_v54 = vpop.f32.mrf.mxu1  ;;  %3690 = vmatprep.subr.bf16.mxu1 %v6328_v27  ;;  %3733 = vmatprep.subr.bf16.mxu0 %v6331_v24 }
0x1187   :  { %v5529_v37 = vadd.f32 %v5528_v11, %v5527_v19  ;;  %3397 = vadd.xlane.f32.xlu0 %v8210_v32  ;;  %v3403_v48 = vmul.f32 %v8210_v32, %v8210_v32  ;;  %v6326_v19 = vld [vmem:[#allocation2 + $0x60] ss:$16 sps:$4 sm:$0xff]   ;;  %v6329_v11 = vld [vmem:[#allocation2 + $0x68] ss:$16 sps:$4 sm:$0xff]  }
0x1188   :  { %3691 = vmatpush1.bf16.msra.mxu1 %v6326_v19  ;;  %3734 = vmatpush1.bf16.msra.mxu0 %v6329_v11 }
0x1189   :  { %v8213_v46 = vadd.f32 %v5529_v37, %v3385_v54  ;;  %v6334_v37 = vld [vmem:[#allocation2 + $0x44] ss:$16 sps:$4 sm:$0xff]   ;;  %v6337_v54 = vld [vmem:[#allocation2 + $0x4c] ss:$16 sps:$4 sm:$0xff]  }
0x118a   :  { %3692 = vmatprep.subr.bf16.mxu1 %v6334_v37  ;;  %3735 = vmatprep.subr.bf16.mxu0 %v6337_v54 }
0x118b   :  { %3399 = vadd.xlane.f32.xlu1 %v8213_v46  ;;  %3405 = vadd.xlane.f32.xlu0 %v3403_v48  ;;  %v3404_v8 = vmul.f32 %v8213_v46, %v8213_v46  ;;  %v6332_v48 = vld [vmem:[#allocation2 + $0x40] ss:$16 sps:$4 sm:$0xff]  }
0x118c   :  { %3693 = vmatpush1.bf16.msra.mxu1 %v6332_v48 }
0x118f   :  { %3407 = vadd.xlane.f32.xlu0 %v3404_v8  ;;  %v6335_v8 = vld [vmem:[#allocation2 + $0x48] ss:$16 sps:$4 sm:$0xff]  }
0x1190   :  { %3736 = vmatpush1.bf16.msra.mxu0 %v6335_v8 }
0x1210   :  { %v3398_v53 = vpop.xlane.xlu0 %3397 }
0x1211   :  { %v3401_v35 = vmul.f32 0.0078125, %v3398_v53  ;;  %v6340_v53 = vld [vmem:[#allocation2 + $0x24] ss:$16 sps:$4 sm:$0xff]  }
0x1212   :  { %3694 = vmatprep.subr.bf16.mxu1 %v6340_v53 }
0x1213   :  { %v3411_v63 = vmul.f32 %v3401_v35, %v3401_v35 }
0x1214   :  { %v3400_v50 = vpop.xlane.xlu1 %3399  ;;  %v3406_v31 = vpop.xlane.xlu0 %3405 }
0x1215   :  { %v3402_v58 = vmul.f32 0.0078125, %v3400_v50  ;;  %v3409_v14 = vmul.f32 0.0078125, %v3406_v31  ;;  %v6338_v50 = vld [vmem:[#allocation2 + $0x20] ss:$16 sps:$4 sm:$0xff]   ;;  %v6341_v31 = vld [vmem:[#allocation2 + $0x28] ss:$16 sps:$4 sm:$0xff]  }
0x1216   :  { %3695 = vmatpush1.bf16.msra.mxu1 %v6338_v50 }
0x1217   :  { %v3413_v20 = vsub.f32 %v3409_v14, %v3411_v63  ;;  %v3412_v51 = vmul.f32 %v3402_v58, %v3402_v58  ;;  %v6344_v63 = vld [vmem:[#allocation2] ss:$16 sps:$4 sm:$0xff]   ;;  %v6347_v14 = vld [vmem:[#allocation2 + $0x8] ss:$16 sps:$4 sm:$0xff]  }
0x1218   :  { %v3408_v17 = vpop.xlane.xlu0 %3407 }
0x1219   :  { %v3417_v40 = vadd.f32 1e-05, %v3413_v20  ;;  %v3410_v29 = vmul.f32 0.0078125, %v3408_v17  ;;  %v6349_v20 = vld [vmem:[#allocation2 + $0xc] ss:$16 sps:$4 sm:$0xff]  }
0x121b   :  { %6441 = vrsqrt.f32 %v3417_v40  ;;  %v3414_v42 = vsub.f32 %v3410_v29, %v3412_v51 }
0x121d   :  { %v3418_v62 = vadd.f32 1e-05, %v3414_v42 }
0x121f   :  { %6443 = vrsqrt.f32 %v3418_v62 }
0x1228   :  { %v6442_v45 = vpop.eup %6441 }
0x1229   :  { %v3421_v55 = vmul.f32 %v6442_v45, %v3415_v47 }
0x122b   :  { %3431 = vperm.xlu1 %5871, %v3421_v55   ;;  %v3425_v7 = vmul.f32 %v3421_v55, %v3401_v35  ;;  %v6343_v35 = vld [vmem:[#allocation2 + $0x2c] ss:$16 sps:$4 sm:$0xff]  }
0x122c   :  { %v6444_v13 = vpop.eup %6443  ;;  %3737 = vmatprep.subr.bf16.mxu0 %v6343_v35 }
0x122d   :  { %v3427_v30 = vsub.f32 %v3423_v16, %v3425_v7  ;;  %v3422_v49 = vmul.f32 %v6444_v13, %v3416_v28  ;;  %3738 = vmatpush1.bf16.msra.mxu0 %v6341_v31 }
0x122e   :  { %3739 = vmatprep.subr.bf16.mxu0 %v6349_v20 }
0x122f   :  { %3443 = vperm.xlu1 %5871, %v3427_v30   ;;  %3436 = vperm.xlu0 %5870, %v3422_v49   ;;  %v3426_v34 = vmul.f32 %v3422_v49, %v3402_v58  ;;  %v6346_v58 = vld [vmem:[#allocation2 + $0x4] ss:$16 sps:$4 sm:$0xff]  }
0x1230   :  { %3696 = vmatprep.subr.bf16.mxu1 %v6346_v58 }
0x1231   :  { %v3428_v33 = vsub.f32 %v3424_v0, %v3426_v34  ;;  %3697 = vmatpush1.bf16.msra.mxu1 %v6344_v63  ;;  %3740 = vmatpush1.bf16.msra.mxu0 %v6347_v14  ;;  %v5530_v34 = vpop.f32.mrf.mxu0 }
0x1233   :  { %3477 = vperm.xlu0 %5870, %v3473_v1   ;;  %3448 = vperm.xlu1 %5871, %v3428_v33  }
0x1237   :  { %3482 = vperm.xlu1 %5871, %v3474_v5   ;;  %v5531_v5 = vpop.f32.mrf.mxu0 }
0x1238   :  { %v5532_v15 = vadd.f32 %v5531_v5, %v5530_v34 }
0x123a   :  { %v3391_v10 = vadd.f32 %v8206_v3, %v5532_v15 }
0x12a6   :  { %v3432_v17 = vpop.permute.xlu1 %3431 }
0x12a7   :  { %v3439_v51 = vmul.f32 %v3432_v17, %v8210_v32 }
0x12aa   :  { %v3444_v40 = vpop.permute.xlu1 %3443  ;;  %v3437_v29 = vpop.permute.xlu0 %3436 }
0x12ab   :  { %v3451_v42 = vadd.f32 %v3444_v40, %v3439_v51  ;;  %v3440_v47 = vmul.f32 %v3437_v29, %v8213_v46  ;;  %v5533_v46 = vpop.f32.mrf.mxu0  ;;  %v6350_v51 = vld [vmem:[#allocation7 + $0x4] ss:$8 sps:$4 sm:$0xff]  }
0x12ad   :  { %v3453_v62 = vmin.f32 %v3451_v42, 20.0  ;;  %v5534_v41 = vpop.f32.mrf.mxu0 }
0x12ae   :  { %v3449_v45 = vpop.permute.xlu1 %3448  ;;  %v5535_v36 = vadd.f32 %v5534_v41, %v5533_v46  ;;  %v3478_v57 = vpop.permute.xlu0 %3477 }
0x12af   :  { %v3455_v55 = vmul.f32 1.442695, %v3453_v62  ;;  %v3452_v16 = vadd.f32 %v3449_v45, %v3440_v47  ;;  %v3485_v18 = vadd.f32 %v3478_v57, %v3391_v10 }
0x12b0   :  { %v3394_v38 = vadd.f32 %v8208_v21, %v5535_v36 }
0x12b1   :  { %6445 = vpow2.f32 %v3455_v55  ;;  %v3454_v28 = vmin.f32 %v3452_v16, 20.0 }
0x12b2   :  { %v3483_v43 = vpop.permute.xlu1 %3482 }
0x12b3   :  { %v3457_v7 = vmul.f32 1.442695, %v3454_v28  ;;  %v3486_v24 = vadd.f32 %v3483_v43, %v3394_v38 }
0x12b5   :  { %6447 = vpow2.f32 %v3457_v7 }
0x12be   :  { %v6446_v13 = vpop.eup %6445 }
0x12bf   :  { %v3459_v30 = vadd.f32 1.0, %v6446_v13 }
0x12c1   :  { %v3461_v49 = vmul.f32 %v3459_v30, %v3459_v30 }
0x12c2   :  { %v6448_v0 = vpop.eup %6447 }
0x12c3   :  { %v3467_v1 = vadd.f32 1.0, %v3461_v49  ;;  %v3460_v32 = vadd.f32 1.0, %v6448_v0  ;;  %v5170_v59 = vadd.f32 -1.0, %v3461_v49 }
0x12c5   :  { %6449 = vrcp.f32 %v3467_v1  ;;  %v3462_v33 = vmul.f32 %v3460_v32, %v3460_v32  ;;  %v3465_v60 = vmul.f32 %v5170_v59, %v3451_v42 }
0x12c7   :  { %v3468_v2 = vadd.f32 1.0, %v3462_v33  ;;  %v5171_v44 = vadd.f32 -1.0, %v3462_v33 }
0x12c9   :  { %6451 = vrcp.f32 %v3468_v2  ;;  %v3466_v4 = vmul.f32 %v5171_v44, %v3452_v16 }
0x12d2   :  { %v6450_v39 = vpop.eup %6449 }
0x12d3   :  { %v3471_v25 = vmul.f32 %v6450_v39, %v3465_v60 }
0x12d5   :  { %v3487_v19 = vadd.f32 %v3485_v18, %v3471_v25 }
0x12d6   :  { %v6452_v56 = vpop.eup %6451 }
0x12d7   :  { %v3472_v27 = vmul.f32 %v6452_v56, %v3466_v4 }
0x12d9   :  { %v3488_v11 = vadd.f32 %v3486_v24, %v3472_v27 }
0x12db   :  { %v3489_v37 = vpack.c.bf16 %v3488_v11, %v3487_v19 }
0x12dd   :  { %3715 = vmatmul.mubr.bf16.vlgmr.msra.gmra.mxu1 %v3489_v37  ;;  %3758 = vmatmul.mubr.bf16.vlgmr.msra.gmra.mxu0 %v3489_v37 }
0x12de   :  { %5248 = vmatprep.mubr.msk.bf16.mxu1 %vm9340_vm1, %v6350_v51  ;;  %5291 = vmatprep.mubr.msk.bf16.mxu0 %vm9341_vm6, %v6350_v51  ;;  %vm9354_vm1 = vmmov %vm9343_vm9 }
0x12df   :  { %vm9355_vm6 = vmmov %vm9354_vm1 }
0x139d   :  { %v8230_v54 = vpop.f32.mrf.mxu1  ;;  %v8232_v48 = vpop.f32.mrf.mxu0 }
0x139f   :  { %v8234_v8 = vpop.f32.mrf.mxu1  ;;  %v8236_v3 = vpop.f32.mrf.mxu0 }
0x13a1   :  { %v8238_v53 = vpop.f32.mrf.mxu1  ;;  %v8240_v21 = vpop.f32.mrf.mxu0 }
0x13a2   :  { %v5992_v35 = vpack.i.bf16 %v8240_v21, %v8232_v48  ;;  %v5997_v50 = vpack.i.bf16 %v8238_v53, %v8230_v54  ;;  %v4040_v31 = vpack.c.bf16 %v8238_v53, %v8230_v54  ;;  %v4042_v63 = vpack.c.bf16 %v8240_v21, %v8232_v48 }
0x13a3   :  { %v8258_v58 = vpop.f32.mrf.mxu1  ;;  %v8264_v20 = vpop.f32.mrf.mxu0 }
0x13a4   :  { %5993 = vrot.lane.b32.xlu1 %v5992_v35, %s6665_s27  ;;  %5998 = vrot.lane.b32.xlu0 %v5997_v50, %s6665_s27  ;;  %v6052_v14 = vpack.i.bf16 %v8258_v58, %v8234_v8  ;;  %v6057_v17 = vpack.i.bf16 %v8264_v20, %v8236_v3  ;;  %v4041_v34 = vpack.c.bf16 %v8258_v58, %v8234_v8  ;;  %v9389_v58 = vld [vmem:[#allocation34_spill] sm:$0xff] }
0x13a5   :  { %v4043_v5 = vpack.c.bf16 %v8264_v20, %v8236_v3 }
0x13a8   :  { %6028 = vrot.lane.b32.xlu1 %v5997_v50, %s6667_s1  ;;  %6003 = vrot.lane.b32.xlu0 %v5992_v35, %s6663_s24 }
0x13ac   :  { %6033 = vrot.lane.b32.xlu1 %v5992_v35, %s6668_s2  ;;  %6008 = vrot.lane.b32.xlu0 %v5997_v50, %s6663_s24 }
0x13b0   :  { %6038 = vrot.lane.b32.xlu1 %v5997_v50, %s6659_s15  ;;  %6013 = vrot.lane.b32.xlu0 %v5992_v35, %s6666_s5 }
0x13b4   :  { %6043 = vrot.lane.b32.xlu1 %v5992_v35, %s6667_s1  ;;  %6018 = vrot.lane.b32.xlu0 %v5997_v50, %s6666_s5 }
0x13b8   :  { %6023 = vrot.lane.b32.xlu0 %v5997_v50, %s6668_s2  ;;  %6053 = vrot.lane.b32.xlu1 %v6052_v14, %s6663_s24 }
0x13bc   :  { %6058 = vrot.lane.b32.xlu1 %v6057_v17, %s6665_s27  ;;  %6048 = vrot.lane.b32.xlu0 %v6052_v14, %s6665_s27 }
0x13c0   :  { %6063 = vrot.lane.b32.xlu1 %v6052_v14, %s6666_s5  ;;  %6103 = vrot.lane.b32.xlu0 %v6057_v17, %s6668_s2 }
0x13c4   :  { %6068 = vrot.lane.b32.xlu1 %v6057_v17, %s6663_s24  ;;  %6108 = vrot.lane.b32.xlu0 %v6052_v14, %s6667_s1 }
0x13c8   :  { %6073 = vrot.lane.b32.xlu1 %v6057_v17, %s6666_s5  ;;  %6113 = vrot.lane.b32.xlu0 %v6057_v17, %s6667_s1 }
0x13cc   :  { %6078 = vrot.lane.b32.xlu1 %v6052_v14, %s6668_s2  ;;  %6118 = vrot.lane.b32.xlu0 %v6052_v14, %s6659_s15 }
0x13d0   :  { %6083 = vrot.lane.b32.xlu1 %v5997_v50, %s6670_s7  ;;  %6123 = vrot.lane.b32.xlu0 %v6057_v17, %s6659_s15 }
0x13d4   :  { %6088 = vrot.lane.b32.xlu1 %v5992_v35, %s6659_s15  ;;  %6128 = vrot.lane.b32.xlu0 %v6052_v14, %s6670_s7 }
0x13d8   :  { %6093 = vrot.lane.b32.xlu1 %v5992_v35, %s6670_s7  ;;  %6133 = vrot.lane.b32.xlu0 %v6057_v17, %s6670_s7 }
0x13dc   :  { %6098 = vrot.lane.b32.xlu1 %v5992_v35, %s6664_s12  ;;  %6138 = vrot.lane.b32.xlu0 %v6052_v14, %s6664_s12 }
0x13e0   :  { %6148 = vrot.lane.b32.xlu1 %v6057_v17, %s6664_s12  ;;  %6143 = vrot.lane.b32.xlu0 %v5997_v50, %s6664_s12 }
0x1416   :  { %v5994_v40 = vpop.permute.xlu1 %5993  ;;  %v5999_v29 = vpop.permute.xlu0 %5998 }
0x1417   :  { %v5996_v1 = vunpack.i.h.bf16 %v5994_v40  ;;  %v5995_v32 = vunpack.i.l.bf16 %v5994_v40  ;;  %v6001_v33 = vunpack.i.h.bf16 %v5999_v29  ;;  %v6000_v2 = vunpack.i.l.bf16 %v5999_v29 }
0x141a   :  { %v8292_v42 = vpop.permute.xlu1 %6028  ;;  %v8294_v62 = vpop.permute.xlu0 %6003 }
0x141b   :  { %v6031_v46 = vunpack.i.h.bf16 %v8292_v42  ;;  %v6006_v41 = vunpack.i.h.bf16 %v8294_v62  ;;  %v6005_v59 = vunpack.i.l.bf16 %v8294_v62  ;;  %v6030_v29 = vunpack.i.l.bf16 %v8292_v42 }
0x141e   :  { %v8296_v47 = vpop.permute.xlu1 %6033  ;;  %v8298_v45 = vpop.permute.xlu0 %6008 }
0x141f   :  { %v6011_v43 = vunpack.i.h.bf16 %v8298_v45  ;;  %v6010_v10 = vunpack.i.l.bf16 %v8298_v45  ;;  %v6036_v62 = vunpack.i.h.bf16 %v8296_v47 }
0x1422   :  { %v8300_v55 = vpop.permute.xlu1 %6038  ;;  %v8302_v16 = vpop.permute.xlu0 %6013 }
0x1426   :  { %v8304_v28 = vpop.permute.xlu1 %6043  ;;  %v8306_v7 = vpop.permute.xlu0 %6018 }
0x142a   :  { %v8308_v13 = vpop.permute.xlu0 %6023  ;;  %v6054_v30 = vpop.permute.xlu1 %6053 }
0x142b   :  { %v6056_v49 = vunpack.i.h.bf16 %v6054_v30  ;;  %v6055_v0 = vunpack.i.l.bf16 %v6054_v30 }
0x142d   :  { %v3947_v25 = vsel %vm9342_vm12, %v6056_v49, %v6006_v41  ;;  %v3946_v4 = vsel %vm9343_vm9, %v6055_v0, %v6005_v59  ;;  %vm9356_vm12 = vnez %v9093_v52 }
0x142e   :  { %v6059_v15 = vpop.permute.xlu1 %6058  ;;  %v6049_v36 = vpop.permute.xlu0 %6048  ;;  %vm5209_vm9 = vmpackc.low %vm9356_vm12, %vm9356_vm12 }
0x142f   :  { %v6061_v44 = vunpack.i.h.bf16 %v6059_v15  ;;  %v6060_v39 = vunpack.i.l.bf16 %v6059_v15  ;;  %v6051_v60 = vunpack.i.h.bf16 %v6049_v36  ;;  %v6050_v57 = vunpack.i.l.bf16 %v6049_v36 }
0x1430   :  { %v6035_v15 = vunpack.i.l.bf16 %v8296_v47  ;;  %v6021_v36 = vunpack.i.h.bf16 %v8306_v7 }
0x1431   :  { %v3977_v38 = vsel %vm9344_vm4, %v5996_v1, %v6061_v44  ;;  %v3983_v56 = vsel %vm9345_vm7, %v6061_v44, %v6001_v33  ;;  %v3976_v18 = vsel %vm9346_vm0, %v5995_v32, %v6060_v39  ;;  %v3982_v27 = vsel %vm9347_vm2, %v6060_v39, %v6000_v2 }
0x1432   :  { %v4054_v24 = vpack.c.bf16 %v3977_v38, %v3976_v18  ;;  %v5250_v19 = vpack.c.bf16 %v3983_v56, %v3982_v27  ;;  %v3979_v11 = vsel %vm9349_vm11, %v6051_v60, %v5996_v1  ;;  %v3981_v37 = vsel %vm9350_vm3, %v6001_v33, %v6051_v60  ;;  %v6064_v35 = vpop.permute.xlu1 %6063  ;;  %v8338_v50 = vpop.permute.xlu0 %6103 }
0x1433   :  { %v3978_v14 = vsel %vm9351_vm13, %v6050_v57, %v5995_v32  ;;  %v3980_v17 = vsel %vm9352_vm15, %v6000_v2, %v6050_v57  ;;  %v6066_v51 = vunpack.i.h.bf16 %v6064_v35  ;;  %v6065_v40 = vunpack.i.l.bf16 %v6064_v35  ;;  %vm9365_vm15 = vmmov %vm9354_vm1 }
0x1434   :  { %v4052_v45 = vpack.c.bf16 %v3981_v37, %v3980_v17  ;;  %v5207_v30 = vpack.c.bf16 %v3979_v11, %v3978_v14  ;;  %5251 = vmatprep.subr.msk.bf16.mxu0 %vm5249_vm5, %v5250_v19  ;;  %v6016_v1 = vunpack.i.h.bf16 %v8302_v16  ;;  %v6015_v32 = vunpack.i.l.bf16 %v8302_v16 }
0x1435   :  { %v3949_v33 = vsel %vm9354_vm1, %v6011_v43, %v6056_v49  ;;  %v3948_v2 = vsel %vm9355_vm6, %v6010_v10, %v6055_v0  ;;  %4118 = vmatpush1.bf16.msra.mxu0 %v4054_v24  ;;  %v6020_v44 = vunpack.i.l.bf16 %v8306_v7  ;;  %v5210_v39 = vpack.c.bf16 %v3947_v25, %v3946_v4  ;;  %vm9367_vm6 = vmmov %vm9354_vm1 }
0x1436   :  { %5208 = vmatprep.subr.msk.bf16.mxu1 %vm5206_vm8, %v5207_v30  ;;  %v6069_v16 = vpop.permute.xlu1 %6068  ;;  %v8371_v49 = vpop.permute.xlu0 %6108  ;;  %vm9357_vm4 = vcmp.lt.s32.totalorder %v6907_v9, 127  ;;  %vm9359_vm0 = vcmp.ge.s32.totalorder %v6912_v12, 1  ;;  %v6041_v25 = vunpack.i.h.bf16 %v8300_v55  ;;  %v5213_v4 = vpack.c.bf16 %v3949_v33, %v3948_v2  ;;  %vm9366_vm8 = vmmov %vm9354_vm1 }
0x1437   :  { %v3915_v0 = vsel %vm9357_vm4, %v6066_v51, %v6016_v1  ;;  %vm9358_vm7 = vmmov %vm9357_vm4  ;;  %4075 = vmatpush1.bf16.msra.mxu1 %v4052_v45  ;;  %v6071_v57 = vunpack.i.h.bf16 %v6069_v16  ;;  %v6070_v38 = vunpack.i.l.bf16 %v6069_v16  ;;  %vm9364_vm3 = vnez %v9066_v22 }
0x1438   :  { %v3914_v60 = vsel %vm9358_vm7, %v6065_v40, %v6015_v32  ;;  %vm8380_vm2 = vmpackc.low %vm9359_vm0, %vm9359_vm0  ;;  %5211 = vmatprep.subr.msk.bf16.mxu1 %vm5209_vm9, %v5210_v39  ;;  %v6040_v37 = vunpack.i.l.bf16 %v8300_v55  ;;  %v6105_v33 = vunpack.i.l.bf16 %v8338_v50  ;;  %v6111_v2 = vunpack.i.h.bf16 %v8371_v49 }
0x1439   :  { %vm9362_vm5 = vmmov %vm9357_vm4  ;;  %v3945_v27 = vsel %vm9365_vm15, %v6006_v41, %v6071_v57  ;;  %v3951_v24 = vsel %vm9366_vm8, %v6071_v57, %v6011_v43  ;;  %v3944_v19 = vsel %vm9354_vm1, %v6005_v59, %v6070_v38  ;;  %v3950_v11 = vsel %vm9367_vm6, %v6070_v38, %v6010_v10  ;;  %v9378_v57 = vld [vmem:[#allocation33_spill] sm:$0xff] }
0x143a   :  { %v3917_v56 = vsel %vm9362_vm5, %v6021_v36, %v6066_v51  ;;  %vm9363_vm11 = vmmov %vm9357_vm4  ;;  %vm9368_vm4 = vnez %v9095_v61  ;;  %v5216_v35 = vpack.c.bf16 %v3915_v0, %v3914_v60  ;;  %v5253_v14 = vpack.c.bf16 %v3951_v24, %v3950_v11  ;;  %v6074_v51 = vpop.permute.xlu1 %6073  ;;  %v8409_v41 = vpop.permute.xlu0 %6113 }
0x143b   :  { %v3916_v18 = vsel %vm9363_vm11, %v6020_v44, %v6065_v40  ;;  %vm9039_vm13 = vmpackc.low %vm9364_vm3, %vm9364_vm3  ;;  %v5256_v17 = vpack.c.bf16 %v3945_v27, %v3944_v19  ;;  %v9369_v40 = vld [vmem:[#allocation38_spill] sm:$0xff]  ;;  %v6026_v59 = vunpack.i.h.bf16 %v8308_v13  ;;  %v6106_v43 = vunpack.i.h.bf16 %v8338_v50  ;;  %5214 = vmatpush1.bf16.msk.msra.mxu1 %vm8380_vm2, %v5213_v4 }
0x143c   :  { %vm5252_vm9 = vmpackc.low %vm9368_vm4, %vm9368_vm4  ;;  %vm9370_vm7 = vnez %v9369_v40  ;;  %v6076_v10 = vunpack.i.h.bf16 %v6074_v51  ;;  %v6075_v45 = vunpack.i.l.bf16 %v6074_v51  ;;  %v5219_v30 = vpack.c.bf16 %v3917_v56, %v3916_v18  ;;  %5217 = vmatprep.subr.msk.bf16.mxu1 %vm9039_vm13, %v5216_v35 }
0x143d   :  { %vm9038_vm0 = vmpackc.low %vm9370_vm7, %vm9370_vm7  ;;  %v6110_v39 = vunpack.i.l.bf16 %v8371_v49  ;;  %5254 = vmatprep.subr.msk.bf16.mxu0 %vm5252_vm9, %v5253_v14  ;;  %vm9371_vm5 = vcmp.lt.s32.totalorder %v6912_v12, 15  ;;  %vm9374_vm15 = vcmp.lt.s32.totalorder %v6907_v9, 127  ;;  %vm9379_vm9 = vnez %v9378_v57 }
0x143e   :  { %vm8434_vm11 = vmpackc.low %vm9371_vm5, %vm9371_vm5  ;;  %v3913_v16 = vsel %vm9374_vm15, %v6016_v1, %v6076_v10  ;;  %5257 = vmatpush1.bf16.msk.msra.mxu0 %vm9038_vm0, %v5256_v17  ;;  %v6046_v1 = vunpack.i.h.bf16 %v8304_v28  ;;  %v8456_v56 = vpop.permute.xlu0 %6118  ;;  %v6116_v14 = vunpack.i.h.bf16 %v8409_v41  ;;  %v6115_v51 = vunpack.i.l.bf16 %v8409_v41 }
0x143f   :  { %vm9375_vm8 = vmmov %vm9374_vm15  ;;  %5220 = vmatpush1.bf16.msk.msra.mxu1 %vm8434_vm11, %v5219_v30  ;;  %v6121_v41 = vunpack.i.h.bf16 %v8456_v56 }
0x1440   :  { %v3919_v49 = vsel %vm9375_vm8, %v6076_v10, %v6021_v36  ;;  %vm9376_vm1 = vmmov %vm9375_vm8  ;;  %v6025_v36 = vunpack.i.l.bf16 %v8308_v13  ;;  %4080 = vmatprep.subr.bf16.mxu1 %v4041_v34  ;;  %v6045_v34 = vunpack.i.l.bf16 %v8304_v28 }
0x1441   :  { %v3912_v0 = vsel %vm9376_vm1, %v6015_v32, %v6075_v45  ;;  %vm9377_vm6 = vmmov %vm9376_vm1  ;;  %v6079_v32 = vpop.permute.xlu1 %6078  ;;  %vm9382_vm1 = vcmp.lt.s32.totalorder %v6907_v9, 1 }
0x1442   :  { %v3918_v60 = vsel %vm9377_vm6, %v6075_v45, %v6020_v44  ;;  %vm9040_vm5 = vmpackc.low %vm9379_vm9, %vm9379_vm9  ;;  %v5262_v4 = vpack.c.bf16 %v3913_v16, %v3912_v0  ;;  %v9380_v44 = vld [vmem:[#allocation37_spill] sm:$0xff]  ;;  %v3881_v18 = vsel %vm9382_vm1, %v6036_v62, %v6106_v43  ;;  %v6081_v13 = vunpack.i.h.bf16 %v6079_v32  ;;  %v6124_v30 = vpop.permute.xlu0 %6123  ;;  %v9392_v0 = vld [vmem:[#allocation35_spill] sm:$0xff] }
0x1443   :  { %v5259_v38 = vpack.c.bf16 %v3919_v49, %v3918_v60  ;;  %vm9381_vm15 = vnez %v9380_v44  ;;  %vm9383_vm6 = vmmov %vm9382_vm1  ;;  %v6080_v24 = vunpack.i.l.bf16 %v6079_v32  ;;  %4081 = vmatpush1.bf16.msra.mxu1 %v4040_v31  ;;  %v6126_v31 = vunpack.i.h.bf16 %v6124_v30 }
0x1444   :  { %vm9041_vm8 = vmpackc.low %vm9381_vm15, %vm9381_vm15  ;;  %v3887_v27 = vsel %vm9383_vm6, %v6106_v43, %v6026_v59 }
0x1445   :  { %vm9384_vm0 = vmmov %vm9382_vm1  ;;  %vm9386_vm1 = vcmp.lt.s32.totalorder %v6907_v9, 15  ;;  %5260 = vmatprep.subr.msk.bf16.mxu0 %vm9040_vm5, %v5259_v38  ;;  %v8508_v45 = vpop.permute.xlu1 %6083  ;;  %vm9394_vm5 = vcmp.lt.s32.totalorder %v6907_v9, 15 }
0x1446   :  { %v3880_v19 = vsel %vm9384_vm0, %v6035_v15, %v6105_v33  ;;  %vm9385_vm13 = vmmov %vm9384_vm0  ;;  %v3853_v35 = vsel %vm9386_vm1, %v6031_v46, %v6111_v2  ;;  %v3885_v43 = vsel %vm9384_vm0, %v6026_v59, %v6081_v13  ;;  %5263 = vmatpush1.bf16.msk.msra.mxu0 %vm9041_vm8, %v5262_v4  ;;  %v6120_v59 = vunpack.i.l.bf16 %v8456_v56  ;;  %v6129_v60 = vpop.permute.xlu0 %6128 }
0x1447   :  { %v3886_v11 = vsel %vm9385_vm13, %v6105_v33, %v6025_v36  ;;  %vm9387_vm13 = vmmov %vm9386_vm1  ;;  %vm9390_vm1 = vnez %v9389_v58  ;;  %4123 = vmatprep.subr.bf16.mxu0 %v4043_v5  ;;  %v5265_v16 = vpack.c.bf16 %v3881_v18, %v3880_v19  ;;  %v3882_v28 = vsel %vm9384_vm0, %v6080_v24, %v6035_v15 }
0x1448   :  { %v3852_v17 = vsel %vm9387_vm13, %v6030_v29, %v6110_v39  ;;  %vm9388_vm6 = vmmov %vm9384_vm0  ;;  %v5225_v33 = vpack.c.bf16 %v3887_v27, %v3886_v11  ;;  %v3851_v3 = vsel %vm9394_vm5, %v6111_v2, %v6046_v1  ;;  %v6086_v4 = vunpack.i.h.bf16 %v8508_v45 }
0x1449   :  { %v3884_v8 = vsel %vm9388_vm6, %v6025_v36, %v6080_v24  ;;  %vm9391_vm13 = vmmov %vm9384_vm0  ;;  %vm9393_vm6 = vnez %v9392_v0  ;;  %v5228_v5 = vpack.c.bf16 %v3853_v35, %v3852_v17  ;;  %v6085_v32 = vunpack.i.l.bf16 %v8508_v45 }
0x144a   :  { %v5222_v10 = vpack.c.bf16 %v3885_v43, %v3884_v8  ;;  %v3883_v49 = vsel %vm9391_vm13, %v6081_v13, %v6036_v62  ;;  %vm9395_vm4 = vmmov %vm9394_vm5  ;;  %v6125_v62 = vunpack.i.l.bf16 %v6124_v30  ;;  %4124 = vmatpush1.bf16.msra.mxu0 %v4042_v63  ;;  %v9409_v13 = vld [vmem:[#allocation49_spill] sm:$0xff]  ;;  %v6134_v19 = vpop.permute.xlu0 %6133 }
0x144b   :  { %v3850_v20 = vsel %vm9395_vm4, %v6110_v39, %v6045_v34  ;;  %vm9396_vm13 = vmmov %vm9395_vm4  ;;  %v3854_v15 = vsel %vm9395_vm4, %v6115_v51, %v6030_v29  ;;  %v5268_v2 = vpack.c.bf16 %v3883_v49, %v3882_v28  ;;  %v6089_v39 = vpop.permute.xlu1 %6088  ;;  %v6130_v29 = vunpack.i.l.bf16 %v6129_v60 }
0x144c   :  { %v3849_v47 = vsel %vm9396_vm13, %v6046_v1, %v6116_v14  ;;  %vm9397_vm0 = vmpackc.low %vm9390_vm1, %vm9390_vm1  ;;  %vm9401_vm13 = vcmp.lt.s32.totalorder %v6907_v9, 16  ;;  %v6091_v63 = vunpack.i.h.bf16 %v6089_v39  ;;  %v6090_v42 = vunpack.i.l.bf16 %v6089_v39  ;;  %v9403_v1 = vld [vmem:[#allocation48_spill] sm:$0xff] }
0x144d   :  { %5223 = vmatprep.subr.msk.bf16.mxu1 %vm9397_vm0, %v5222_v10  ;;  %vm9398_vm8 = vmmov %vm9395_vm4  ;;  %v3820_v48 = vsel %vm9401_vm13, %v6040_v37, %v6120_v59  ;;  %v5274_v36 = vpack.c.bf16 %v3851_v3, %v3850_v20  ;;  %v6136_v17 = vunpack.i.h.bf16 %v6134_v19  ;;  %v9425_v3 = vld [vmem:[#allocation47_spill] sm:$0xff] }
0x144e   :  { %v3855_v54 = vsel %vm9398_vm8, %v6116_v14, %v6031_v46  ;;  %vm9399_vm5 = vmmov %vm9395_vm4  ;;  %5226 = vmatpush1.bf16.msk.msra.mxu1 %vm8380_vm2, %v5225_v33  ;;  %v6131_v46 = vunpack.i.h.bf16 %v6129_v60  ;;  %v6139_v28 = vpop.permute.xlu0 %6138 }
0x144f   :  { %v3848_v53 = vsel %vm9399_vm5, %v6045_v34, %v6115_v51  ;;  %vm9400_vm8 = vmpackc.low %vm9393_vm6, %vm9393_vm6  ;;  %vm9404_vm5 = vnez %v9403_v1  ;;  %v5231_v7 = vpack.c.bf16 %v3855_v54, %v3854_v15  ;;  %v6135_v51 = vunpack.i.l.bf16 %v6134_v19  ;;  %v9419_v34 = vld [vmem:[#allocation44_spill] sm:$0xff]  ;;  %v9445_v19 = vld [vmem:[#allocation39_spill] sm:$0xff] }
0x1450   :  { %5266 = vmatprep.subr.msk.bf16.mxu0 %vm9400_vm8, %v5265_v16  ;;  %vm9402_vm0 = vmmov %vm9401_vm13  ;;  %v5271_v38 = vpack.c.bf16 %v3849_v47, %v3848_v53  ;;  %v9427_v53 = vld [vmem:[#allocation52_spill] sm:$0xff]  ;;  %v6140_v15 = vunpack.i.l.bf16 %v6139_v28 }
0x1451   :  { %v3821_v21 = vsel %vm9402_vm0, %v6041_v25, %v6121_v41  ;;  %vm9405_vm8 = vmpackc.low %vm9364_vm3, %vm9364_vm3  ;;  %vm9411_vm3 = vcmp.lt.s32.totalorder %v6907_v9, 17 }
0x1452   :  { %5229 = vmatprep.subr.msk.bf16.mxu1 %vm9405_vm8, %v5228_v5  ;;  %vm9406_vm2 = vmmov %vm9402_vm0  ;;  %v4029_v27 = vpack.c.bf16 %v3821_v21, %v3820_v48  ;;  %vm9410_vm8 = vnez %v9409_v13  ;;  %v3789_v24 = vsel %vm9411_vm3, %v6086_v4, %v6131_v46 }
0x1453   :  { %v3823_v56 = vsel %vm9406_vm2, %v6126_v31, %v6041_v25  ;;  %vm9407_vm13 = vmmov %vm9402_vm0  ;;  %v6094_v25 = vpop.permute.xlu1 %6093 }
0x1454   :  { %v3822_v18 = vsel %vm9407_vm13, %v6125_v62, %v6040_v37  ;;  %vm9408_vm0 = vmpackc.low %vm9370_vm7, %vm9370_vm7  ;;  %v6096_v35 = vunpack.i.h.bf16 %v6094_v25  ;;  %v6095_v14 = vunpack.i.l.bf16 %v6094_v25 }
0x1455   :  { %5269 = vmatpush1.bf16.msk.msra.mxu0 %vm9408_vm0, %v5268_v2  ;;  %vm5273_vm4 = vmpackc.low %vm9410_vm8, %vm9410_vm8  ;;  %vm9414_vm0 = vcmp.lt.s32.totalorder %v6907_v9, 16  ;;  %v5234_v45 = vpack.c.bf16 %v3823_v56, %v3822_v18 }
0x1456   :  { %vm9412_vm2 = vmmov %vm9411_vm3  ;;  %v3816_v37 = vsel %vm9414_vm0, %v6090_v42, %v6125_v62  ;;  %v6141_v62 = vunpack.i.h.bf16 %v6139_v28 }
0x1457   :  { %v3788_v55 = vsel %vm9412_vm2, %v6085_v32, %v6130_v29  ;;  %vm9413_vm13 = vmpackc.low %vm9379_vm9, %vm9379_vm9  ;;  %v6099_v49 = vpop.permute.xlu1 %6098 }
0x1458   :  { %5272 = vmatprep.subr.msk.bf16.mxu0 %vm9413_vm13, %v5271_v38  ;;  %vm9415_vm7 = vmmov %vm9414_vm0  ;;  %v6101_v47 = vunpack.i.h.bf16 %v6099_v49  ;;  %v6100_v54 = vunpack.i.l.bf16 %v6099_v49 }
0x1459   :  { %v3817_v11 = vsel %vm9415_vm7, %v6091_v63, %v6126_v31  ;;  %vm9416_vm3 = vmpackc.low %vm9404_vm5, %vm9404_vm5  ;;  %vm9421_vm5 = vcmp.lt.s32.totalorder %v6907_v9, 17  ;;  %5275 = vmatpush1.bf16.msk.msra.mxu0 %vm5273_vm4, %v5274_v36  ;;  %vm9428_vm4 = vnez %v9427_v53 }
0x145a   :  { %5232 = vmatpush1.bf16.msk.msra.mxu1 %vm9416_vm3, %v5231_v7  ;;  %vm9417_vm2 = vmmov %vm9414_vm0  ;;  %v4031_v10 = vpack.c.bf16 %v3817_v11, %v3816_v37  ;;  %v3785_v30 = vsel %vm9421_vm5, %v6096_v35, %v6136_v17 }
0x145b   :  { %v3818_v43 = vsel %vm9417_vm2, %v6120_v59, %v6090_v42  ;;  %vm9418_vm13 = vmmov %vm9414_vm0  ;;  %4086 = vmatprep.subr.bf16.mxu1 %v4029_v27  ;;  %vm9420_vm0 = vnez %v9419_v34  ;;  %v6149_v21 = vpop.permute.xlu1 %6148  ;;  %v9434_v42 = vld [vmem:[#allocation36_spill] sm:$0xff] }
0x145c   :  { %v3819_v8 = vsel %vm9418_vm13, %v6121_v41, %v6091_v63  ;;  %vm5233_vm7 = vmpackc.low %vm9420_vm0, %vm9420_vm0  ;;  %v5237_v41 = vpack.c.bf16 %v3789_v24, %v3788_v55  ;;  %4129 = vmatprep.subr.bf16.mxu0 %v4031_v10  ;;  %v6144_v63 = vpop.permute.xlu0 %6143  ;;  %v6151_v1 = vunpack.i.h.bf16 %v6149_v21  ;;  %v6150_v36 = vunpack.i.l.bf16 %v6149_v21  ;;  %v4243_v21 = vld [vmem:[%s9450_s9] sm:$0xff] }
0x145d   :  { %vm9422_vm3 = vmmov %vm9421_vm5  ;;  %vm9426_vm5 = vnez %v9425_v3  ;;  %v5277_v20 = vpack.c.bf16 %v3819_v8, %v3818_v43  ;;  %v6146_v38 = vunpack.i.h.bf16 %v6144_v63 }
0x145e   :  { %v3791_v33 = vsel %vm9422_vm3, %v6136_v17, %v6086_v4  ;;  %vm9423_vm2 = vmmov %vm9422_vm3  ;;  %5235 = vmatpush1.bf16.msk.msra.mxu1 %vm5233_vm7, %v5234_v45 }
0x145f   :  { %v3784_v59 = vsel %vm9423_vm2, %v6095_v14, %v6135_v51  ;;  %vm9424_vm13 = vmmov %vm9423_vm2 }
0x1460   :  { %v3790_v16 = vsel %vm9424_vm13, %v6135_v51, %v6085_v32  ;;  %vm5276_vm3 = vmpackc.low %vm9426_vm5, %vm9426_vm5  ;;  %v5280_v31 = vpack.c.bf16 %v3785_v30, %v3784_v59  ;;  %v3786_v2 = vsel %vm9424_vm13, %v6130_v29, %v6095_v14  ;;  %vm9431_vm5 = vcmp.lt.s32.totalorder %v6907_v9, 111 }
0x1461   :  { %v5240_v5 = vpack.c.bf16 %v3791_v33, %v3790_v16  ;;  %vm9429_vm2 = vmpackc.low %vm9390_vm1, %vm9390_vm1  ;;  %5278 = vmatpush1.bf16.msk.msra.mxu0 %vm5276_vm3, %v5277_v20  ;;  %v4011_v60 = vsel %vm9431_vm5, %v6141_v62, %v6101_v47  ;;  %v6145_v32 = vunpack.i.l.bf16 %v6144_v63  ;;  %v4008_v7 = vsel %vm9431_vm5, %v6100_v54, %v6150_v36 }
0x1462   :  { %5238 = vmatprep.subr.msk.bf16.mxu1 %vm9429_vm2, %v5237_v41  ;;  %vm9430_vm7 = vmmov %vm9424_vm13  ;;  %vm9435_vm13 = vnez %v9434_v42 }
0x1463   :  { %v3787_v39 = vsel %vm9430_vm7, %v6131_v46, %v6096_v35  ;;  %vm9432_vm0 = vmmov %vm9431_vm5  ;;  %v9436_v46 = vld [vmem:[#allocation53_spill] sm:$0xff]  ;;  %v6352_v35 = vld [vmem:[#allocation7] ss:$8 sps:$4 sm:$0xff]  }
0x1464   :  { %v4010_v48 = vsel %vm9432_vm0, %v6140_v15, %v6100_v54  ;;  %vm9433_vm2 = vmpackc.low %vm9393_vm6, %vm9393_vm6  ;;  %vm9437_vm3 = vnez %v9436_v46  ;;  %v5283_v4 = vpack.c.bf16 %v3787_v39, %v3786_v2 }
0x1465   :  { %5281 = vmatprep.subr.msk.bf16.mxu0 %vm9433_vm2, %v5280_v31  ;;  %vm5242_vm8 = vmpackc.low %vm9435_vm13, %vm9435_vm13  ;;  %v5243_v29 = vpack.c.bf16 %v4011_v60, %v4010_v48  ;;  %v4182_v60 = vld [vmem:[%s9449_s28] sm:$0xff] }
0x1466   :  { %vm9438_vm0 = vmpackc.low %vm9428_vm4, %vm9428_vm4 }
0x1467   :  { %5241 = vmatpush1.bf16.msk.msra.mxu1 %vm9438_vm0, %v5240_v5  ;;  %vm9439_vm2 = vmmov %vm9431_vm5 }
0x1468   :  { %v4009_v56 = vsel %vm9439_vm2, %v6101_v47, %v6151_v1  ;;  %vm9440_vm7 = vmmov %vm9439_vm2  ;;  %5244 = vmatprep.subr.msk.bf16.mxu1 %vm5242_vm8, %v5243_v29  ;;  %vm9452_vm8 = vcmp.lt.s32.totalorder %v6912_v12, 15 }
0x1469   :  { %v4015_v18 = vsel %vm9440_vm7, %v6151_v1, %v6146_v38  ;;  %vm9441_vm9 = vmmov %vm9439_vm2  ;;  %v5289_v24 = vpack.c.bf16 %v4009_v56, %v4008_v7 }
0x146a   :  { %v4013_v27 = vsel %vm9441_vm9, %v6146_v38, %v6141_v62  ;;  %vm9442_vm0 = vmmov %vm9439_vm2  ;;  %vm9446_vm2 = vnez %v9445_v19 }
0x146b   :  { %v4012_v55 = vsel %vm9442_vm0, %v6145_v32, %v6140_v15  ;;  %vm9443_vm4 = vmmov %vm9442_vm0  ;;  %v4178_v15 = vld [vmem:[%s9448_s26] sm:$0xff] }
0x146c   :  { %v4014_v25 = vsel %vm9443_vm4, %v6150_v36, %v6145_v32  ;;  %vm9444_vm5 = vmpackc.low %vm9437_vm3, %vm9437_vm3  ;;  %v5246_v37 = vpack.c.bf16 %v4013_v27, %v4012_v55 }
0x146d   :  { %5284 = vmatpush1.bf16.msk.msra.mxu0 %vm9444_vm5, %v5283_v4  ;;  %vm5285_vm7 = vmpackc.low %vm9446_vm2, %vm9446_vm2  ;;  %v5286_v11 = vpack.c.bf16 %v4015_v18, %v4014_v25 }
0x146e   :  { %5247 = vmatpush2.bf16.msk.msra.mxu1 %vm8434_vm11, %v5246_v37  ;;  %vm9447_vm9 = vmpackc.low %vm9381_vm15, %vm9381_vm15 }
0x146f   :  { %5287 = vmatprep.subr.msk.bf16.mxu0 %vm5285_vm7, %v5286_v11  ;;  %vm9451_vm11 = vmmov %vm9442_vm0  ;;  %vm9455_vm7 = vcmp.lt.s32.totalorder %v6907_v9, 113 }
0x1470   :  { %vm9453_vm4 = vmmov %vm9442_vm0 }
0x1471   :  { %5290 = vmatpush2.bf16.msk.msra.mxu0 %vm9447_vm9, %v5289_v24  ;;  %4107 = vmatmul.mubr.bf16.vlgmr.msra.gmra.mxu1 %v6352_v35  ;;  %vm9454_vm5 = vmmov %vm9442_vm0  ;;  %vm9456_vm9 = vcmask 1043456  }
0x1472   :  { %4453 = vmatprep.mubr.bf16.mxu1 %v9243_v6 }
0x1474   :  { %4150 = vmatmul.mubr.bf16.vlgmr.msra.gmra.mxu0 %v6352_v35 }
0x1475   :  { %4494 = vmatprep.mubr.bf16.mxu0 %v9243_v6 }
0x1531   :  { %v4108_v14 = vpop.f32.mrf.mxu1 }
0x1532   :  { %v4166_v43 = vmul.f32 %v4108_v14, %v4108_v14 }
0x1533   :  { %v4110_v51 = vpop.f32.mrf.mxu1 }
0x1534   :  { %v4151_v17 = vpop.f32.mrf.mxu0  ;;  %v4160_v50 = vadd.f32 %v4110_v51, %v4108_v14  ;;  %v4167_v10 = vmul.f32 %v4110_v51, %v4110_v51 }
0x1535   :  { %v4168_v8 = vmul.f32 %v4151_v17, %v4151_v17 }
0x1536   :  { %v4153_v45 = vpop.f32.mrf.mxu0  ;;  %v4170_v30 = vadd.f32 %v4167_v10, %v4166_v43  ;;  %v4161_v33 = vadd.f32 %v4160_v50, %v4151_v17 }
0x1537   :  { %v4169_v59 = vmul.f32 %v4153_v45, %v4153_v45 }
0x1538   :  { %v4162_v41 = vadd.f32 %v4161_v33, %v4153_v45  ;;  %v4171_v16 = vadd.f32 %v4170_v30, %v4168_v8 }
0x153a   :  { %4163 = vadd.xlane.f32.xlu0 %v4162_v41  ;;  %v4172_v49 = vadd.f32 %v4171_v16, %v4169_v59 }
0x153c   :  { %4173 = vadd.xlane.f32.xlu1 %v4172_v49 }
0x15c3   :  { %v4164_v28 = vpop.xlane.xlu0 %4163 }
0x15c4   :  { %v4165_v20 = vmul.f32 0.001953125, %v4164_v28 }
0x15c5   :  { %v4174_v5 = vpop.xlane.xlu1 %4173 }
0x15c6   :  { %v4176_v47 = vmul.f32 %v4165_v20, %v4165_v20  ;;  %v4175_v54 = vmul.f32 0.001953125, %v4174_v5 }
0x15c8   :  { %v4177_v31 = vsub.f32 %v4175_v54, %v4176_v47 }
0x15ca   :  { %v4179_v62 = vadd.f32 1e-05, %v4177_v31 }
0x15cc   :  { %6453 = vrsqrt.f32 %v4179_v62  ;;  %v4112_v62 = vpop.f32.mrf.mxu1 }
0x15d9   :  { %v6454_v2 = vpop.eup %6453 }
0x15da   :  { %v4181_v39 = vmul.f32 %v6454_v2, %v4178_v15 }
0x15dc   :  { %4187 = vperm.xlu0 %5870, %v4181_v39   ;;  %v4183_v48 = vmul.f32 %v4181_v39, %v4165_v20 }
0x15de   :  { %v4184_v63 = vsub.f32 %v4182_v60, %v4183_v48  ;;  %v4155_v60 = vpop.f32.mrf.mxu0 }
0x15e0   :  { %4246 = vperm.xlu0 %5870, %v4243_v21   ;;  %4196 = vperm.xlu1 %5871, %v4184_v63  }
0x1657   :  { %v4188_v29 = vpop.permute.xlu0 %4187 }
0x1658   :  { %v4190_v1 = vmul.f32 %v4188_v29, %v4108_v14  ;;  %v4191_v36 = vmul.f32 %v4188_v29, %v4110_v51  ;;  %v4192_v38 = vmul.f32 %v4188_v29, %v4151_v17  ;;  %v4193_v4 = vmul.f32 %v4188_v29, %v4153_v45 }
0x165b   :  { %v4197_v32 = vpop.permute.xlu1 %4196  ;;  %v4247_v2 = vpop.permute.xlu0 %4246 }
0x165c   :  { %v4199_v7 = vadd.f32 %v4197_v32, %v4190_v1  ;;  %v4200_v56 = vadd.f32 %v4197_v32, %v4191_v36  ;;  %v4201_v18 = vadd.f32 %v4197_v32, %v4192_v38  ;;  %v4202_v27 = vadd.f32 %v4197_v32, %v4193_v4  ;;  %v4114_v1 = vpop.f32.mrf.mxu1 }
0x165d   :  { %v4249_v36 = vadd.f32 %v4247_v2, %v4112_v62 }
0x165e   :  { %v4203_v24 = vmin.f32 %v4199_v7, 20.0  ;;  %v4204_v55 = vmin.f32 %v4200_v56, 20.0  ;;  %v4205_v25 = vmin.f32 %v4201_v18, 20.0  ;;  %v4206_v37 = vmin.f32 %v4202_v27, 20.0 }
0x1660   :  { %v4207_v11 = vmul.f32 1.442695, %v4203_v24  ;;  %v4209_v35 = vmul.f32 1.442695, %v4204_v55  ;;  %v4211_v43 = vmul.f32 1.442695, %v4205_v25  ;;  %v4250_v24 = vadd.f32 %v4247_v2, %v4114_v1 }
0x1661   :  { %v4213_v8 = vmul.f32 1.442695, %v4206_v37 }
0x1662   :  { %6455 = vpow2.f32 %v4207_v11  ;;  %v4157_v11 = vpop.f32.mrf.mxu0 }
0x1663   :  { %6457 = vpow2.f32 %v4209_v35  ;;  %v4251_v35 = vadd.f32 %v4247_v2, %v4155_v60 }
0x1664   :  { %6459 = vpow2.f32 %v4211_v43 }
0x1665   :  { %6461 = vpow2.f32 %v4213_v8 }
0x166f   :  { %v6456_v14 = vpop.eup %6455 }
0x1670   :  { %v6458_v17 = vpop.eup %6457  ;;  %v4215_v51 = vadd.f32 1.0, %v6456_v14  ;;  %v4252_v14 = vadd.f32 %v4247_v2, %v4157_v11 }
0x1671   :  { %v6460_v50 = vpop.eup %6459  ;;  %v4216_v10 = vadd.f32 1.0, %v6458_v17 }
0x1672   :  { %v6462_v45 = vpop.eup %6461  ;;  %v4217_v30 = vadd.f32 1.0, %v6460_v50  ;;  %v4219_v33 = vmul.f32 %v4215_v51, %v4215_v51 }
0x1673   :  { %v4218_v41 = vadd.f32 1.0, %v6462_v45  ;;  %v4220_v59 = vmul.f32 %v4216_v10, %v4216_v10 }
0x1674   :  { %v4221_v16 = vmul.f32 %v4217_v30, %v4217_v30  ;;  %v4231_v49 = vadd.f32 1.0, %v4219_v33  ;;  %v5292_v54 = vadd.f32 -1.0, %v4219_v33 }
0x1675   :  { %v4222_v28 = vmul.f32 %v4218_v41, %v4218_v41  ;;  %v4232_v20 = vadd.f32 1.0, %v4220_v59  ;;  %v5293_v31 = vadd.f32 -1.0, %v4220_v59 }
0x1676   :  { %v4233_v5 = vadd.f32 1.0, %v4221_v16  ;;  %6463 = vrcp.f32 %v4231_v49  ;;  %v5294_v15 = vadd.f32 -1.0, %v4221_v16  ;;  %v4227_v48 = vmul.f32 %v5292_v54, %v4199_v7 }
0x1677   :  { %v4234_v47 = vadd.f32 1.0, %v4222_v28  ;;  %6465 = vrcp.f32 %v4232_v20  ;;  %v5295_v39 = vadd.f32 -1.0, %v4222_v28  ;;  %v4228_v63 = vmul.f32 %v5293_v31, %v4200_v56 }
0x1678   :  { %6467 = vrcp.f32 %v4233_v5  ;;  %v4229_v38 = vmul.f32 %v5294_v15, %v4201_v18 }
0x1679   :  { %6469 = vrcp.f32 %v4234_v47  ;;  %v4230_v55 = vmul.f32 %v5295_v39, %v4202_v27 }
0x1683   :  { %v6464_v21 = vpop.eup %6463 }
0x1684   :  { %v6466_v29 = vpop.eup %6465  ;;  %v4239_v4 = vmul.f32 %v6464_v21, %v4227_v48 }
0x1685   :  { %v6468_v32 = vpop.eup %6467  ;;  %v4240_v25 = vmul.f32 %v6466_v29, %v4228_v63 }
0x1686   :  { %v6470_v37 = vpop.eup %6469  ;;  %v4241_v43 = vmul.f32 %v6468_v32, %v4229_v38  ;;  %v8697_v8 = vadd.f32 %v4249_v36, %v4239_v4 }
0x1687   :  { %v4242_v17 = vmul.f32 %v6470_v37, %v4230_v55  ;;  %v8699_v7 = vadd.f32 %v4250_v24, %v4240_v25 }
0x1688   :  { %v8701_v56 = vadd.f32 %v4251_v35, %v4241_v43 }
0x1689   :  { %v8703_v51 = vadd.f32 %v4252_v14, %v4242_v17  ;;  %v6152_v18 = vpack.i.bf16 %v8699_v7, %v8697_v8 }
0x168a   :  { %v6162_v50 = vpack.i.bf16 %v8701_v56, %v8699_v7 }
0x168b   :  { %v6157_v27 = vpack.i.bf16 %v8703_v51, %v8701_v56  ;;  %6153 = vrot.lane.b32.xlu1 %v6152_v18, %s6664_s12  ;;  %v6172_v10 = vpack.i.bf16 %v8703_v51, %v8697_v8  ;;  %v6202_v45 = vpack.i.bf16 %v8701_v56, %v8703_v51 }
0x168d   :  { %6158 = vrot.lane.b32.xlu0 %v6157_v27, %s6664_s12 }
0x168f   :  { %6163 = vrot.lane.b32.xlu1 %v6162_v50, %s6663_s24 }
0x1691   :  { %6168 = vrot.lane.b32.xlu0 %v6162_v50, %s6665_s27 }
0x1693   :  { %6173 = vrot.lane.b32.xlu1 %v6172_v10, %s6663_s24 }
0x1695   :  { %6178 = vrot.lane.b32.xlu0 %v6172_v10, %s6665_s27 }
0x1697   :  { %6183 = vrot.lane.b32.xlu1 %v6162_v50, %s6666_s5 }
0x1699   :  { %6188 = vrot.lane.b32.xlu0 %v6172_v10, %s6666_s5 }
0x169b   :  { %6193 = vrot.lane.b32.xlu1 %v6152_v18, %s6667_s1 }
0x169d   :  { %6198 = vrot.lane.b32.xlu0 %v6152_v18, %s6668_s2 }
0x169f   :  { %6203 = vrot.lane.b32.xlu1 %v6202_v45, %s6667_s1 }
0x16a1   :  { %6208 = vrot.lane.b32.xlu0 %v6202_v45, %s6668_s2 }
0x16a3   :  { %6213 = vrot.lane.b32.xlu1 %v6152_v18, %s6670_s7 }
0x16a5   :  { %6218 = vrot.lane.b32.xlu0 %v6152_v18, %s6659_s15 }
0x16a7   :  { %6223 = vrot.lane.b32.xlu1 %v6202_v45, %s6670_s7 }
0x16a9   :  { %4279 = vrot.lane.b32.xlu0 %v8703_v51, %s6659_s15 }
0x16ab   :  { %4277 = vrot.lane.b32.xlu1 %v8701_v56, %s6659_s15  ;;  %s9522_s15 = sld [smem:[#allocation32_spill]] }
0x16fd   :  { %v6154_v30 = vpop.permute.xlu1 %6153 }
0x16fe   :  { %v6156_v33 = vunpack.i.h.bf16 %v6154_v30  ;;  %v6155_v41 = vunpack.i.l.bf16 %v6154_v30 }
0x16ff   :  { %v6159_v59 = vpop.permute.xlu0 %6158 }
0x1700   :  { %v6161_v16 = vunpack.i.h.bf16 %v6159_v59  ;;  %v6160_v49 = vunpack.i.l.bf16 %v6159_v59  ;;  %v4379_v28 = vsel %vm9451_vm11, %v6155_v41, %v6156_v33 }
0x1701   :  { %v6164_v20 = vpop.permute.xlu1 %6163  ;;  %v4381_v5 = vsel %vm9452_vm8, %v4379_v28, 0.0  ;;  %vm9460_vm8 = vmmov %vm9455_vm7 }
0x1702   :  { %v4377_v47 = vsel %vm9453_vm4, %v6160_v49, %v6161_v16  ;;  %v4378_v54 = vsel %vm9442_vm0, %v6156_v33, %v6160_v49  ;;  %v4380_v31 = vsel %vm9454_vm5, %v6161_v16, %v6155_v41  ;;  %v6166_v62 = vunpack.i.h.bf16 %v6164_v20  ;;  %vm9462_vm4 = vmmov %vm9455_vm7  ;;  %v9469_v49 = vld [vmem:[#allocation40_spill] sm:$0xff] }
0x1703   :  { %v4382_v15 = vsel %vm9435_vm13, %v4378_v54, 0.0  ;;  %v4384_v2 = vsel %vm9446_vm2, %v4380_v31, 0.0  ;;  %v6169_v39 = vpop.permute.xlu0 %6168  ;;  %v6165_v60 = vunpack.i.l.bf16 %v6164_v20  ;;  %v4401_v12 = vpack.c.bf16 %v4381_v5, %v4381_v5  ;;  %vm9458_vm2 = vmmov %vm9456_vm9  ;;  %v9476_v31 = vld [vmem:[#allocation42_spill] sm:$0xff] }
0x1704   :  { %v6171_v48 = vunpack.i.h.bf16 %v6169_v39  ;;  %v6170_v21 = vunpack.i.l.bf16 %v6169_v39  ;;  %v4402_v63 = vpack.c.bf16 %v4382_v15, %v4382_v15  ;;  %v4404_v29 = vpack.c.bf16 %v4384_v2, %v4384_v2  ;;  %vm9459_vm11 = vmmov %vm9458_vm2 }
0x1705   :  { %v4346_v1 = vsel %vm9455_vm7, %v6165_v60, %v6166_v62  ;;  %v6174_v36 = vpop.permute.xlu1 %6173  ;;  %v4410_v38 = vsel %vm9456_vm9, %v4401_v12, 0  ;;  %v4383_v42 = vsel %vm9381_vm15, %v4377_v47, 0.0  ;;  %vm9457_vm13 = vcmp.lt.s32.totalorder %v6907_v9, 112  ;;  %vm9461_vm15 = vmmov %vm9455_vm7 }
0x1706   :  { %v4362_v19 = vsel %vm9457_vm13, %v6170_v21, %v6171_v48  ;;  %5296 = vmatprep.subr.msk.bf16.mxu1 %vm9458_vm2, %v4402_v63  ;;  %5322 = vmatprep.subr.msk.bf16.mxu0 %vm9459_vm11, %v4404_v29  ;;  %v6176_v4 = vunpack.i.h.bf16 %v6174_v36  ;;  %v6175_v32 = vunpack.i.l.bf16 %v6174_v36  ;;  %v4403_v24 = vpack.c.bf16 %v4383_v42, %v4383_v42  ;;  %vm9463_vm0 = vmmov %vm9458_vm2 }
0x1707   :  { %v5298_v55 = vpack.c.bf16 %v4362_v19, %v4346_v1  ;;  %v6179_v25 = vpop.permute.xlu0 %6178  ;;  %4428 = vmatpush1.bf16.msra.mxu1 %v4410_v38  ;;  %vm9464_vm5 = vmpackc.low %vm9353_vm10, %vm9356_vm12  ;;  %vm9468_vm10 = vcmp.lt.s32.totalorder %v6907_v9, 127  ;;  %vm9470_vm12 = vnez %v9469_v49  ;;  %vm9471_vm2 = vnez %v9095_v61 }
0x1708   :  { %v6181_v37 = vunpack.i.h.bf16 %v6179_v25  ;;  %v6180_v11 = vunpack.i.l.bf16 %v6179_v25  ;;  %v4345_v35 = vsel %vm9460_vm8, %v6166_v62, %v6176_v4  ;;  %v4347_v44 = vsel %vm9461_vm15, %v6175_v32, %v6165_v60  ;;  %vm9465_vm7 = vmmov %vm9457_vm13 }
0x1709   :  { %v4348_v43 = vsel %vm9462_vm4, %v6176_v4, %v6175_v32  ;;  %v4416_v14 = vsel %vm9463_vm0, %v4403_v24, 0  ;;  %5299 = vmatprep.subr.msk.bf16.mxu1 %vm9464_vm5, %v5298_v55  ;;  %v6184_v17 = vpop.permute.xlu1 %6183  ;;  %vm9466_vm9 = vmmov %vm9465_vm7  ;;  %vm9477_vm0 = vnez %v9476_v31 }
0x170a   :  { %v4361_v18 = vsel %vm9465_vm7, %v6171_v48, %v6181_v37  ;;  %v4363_v27 = vsel %vm9466_vm9, %v6180_v11, %v6170_v21  ;;  %vm9467_vm13 = vmmov %vm9465_vm7  ;;  %4469 = vmatpush1.bf16.msra.mxu0 %v4416_v14  ;;  %v6186_v10 = vunpack.i.h.bf16 %v6184_v17  ;;  %v6185_v41 = vunpack.i.l.bf16 %v6184_v17  ;;  %v9478_v48 = vld [vmem:[#allocation41_spill] sm:$0xff]  ;;  %v9480_v21 = vld [vmem:[#allocation43_spill] sm:$0xff] }
0x170b   :  { %v4364_v50 = vsel %vm9467_vm13, %v6181_v37, %v6180_v11  ;;  %v5301_v45 = vpack.c.bf16 %v4363_v27, %v4347_v44  ;;  %v5327_v33 = vpack.c.bf16 %v4361_v18, %v4345_v35  ;;  %v6189_v23 = vpop.permute.xlu0 %6188  ;;  %vm9472_vm11 = vmpackc.low %vm9348_vm14, %vm9471_vm2  ;;  %vm9479_vm14 = vnez %v9478_v48 }
0x170c   :  { %v5324_v30 = vpack.c.bf16 %v4364_v50, %v4348_v43  ;;  %v6191_v52 = vunpack.i.h.bf16 %v6189_v23  ;;  %v6190_v59 = vunpack.i.l.bf16 %v6189_v23  ;;  %v4330_v16 = vsel %vm9468_vm10, %v6185_v41, %v6186_v10  ;;  %vm9473_vm8 = vmmov %vm9468_vm10  ;;  %v9497_v50 = vld [vmem:[#allocation50_spill] sm:$0xff] }
0x170d   :  { %5302 = vmatpush1.bf16.msk.msra.mxu1 %vm9470_vm12, %v5301_v45  ;;  %v6194_v28 = vpop.permute.xlu1 %6193  ;;  %vm9474_vm15 = vmmov %vm9473_vm8  ;;  %v5304_v54 = vpack.c.bf16 %v4330_v16, %v8699_v7  ;;  %vm9481_vm5 = vnez %v9480_v21  ;;  %v9482_v7 = vld [vmem:[#allocation45_spill] sm:$0xff]  ;;  %vm9484_vm9 = vcmp.lt.s32.totalorder %v6907_v9, 1  ;;  %vm9485_vm13 = vcmp.lt.s32.totalorder %v6907_v9, 15 }
0x170e   :  { %5325 = vmatprep.subr.msk.bf16.mxu0 %vm9472_vm11, %v5324_v30  ;;  %v4332_v20 = vsel %vm9473_vm8, %v6191_v52, %v6190_v59  ;;  %v4329_v5 = vsel %vm9474_vm15, %v6186_v10, %v6191_v52  ;;  %vm9475_vm4 = vmmov %vm9473_vm8  ;;  %v6196_v2 = vunpack.i.h.bf16 %v6194_v28  ;;  %v6195_v12 = vunpack.i.l.bf16 %v6194_v28 }
0x170f   :  { %v4331_v47 = vsel %vm9475_vm4, %v6190_v59, %v6185_v41  ;;  %5328 = vmatpush1.bf16.msk.msra.mxu0 %vm9477_vm0, %v5327_v33  ;;  %v5330_v26 = vpack.c.bf16 %v4332_v20, %v8703_v51  ;;  %v5333_v61 = vpack.c.bf16 %v4329_v5, %v8701_v56  ;;  %v6199_v15 = vpop.permute.xlu0 %6198  ;;  %5305 = vmatprep.subr.msk.bf16.mxu1 %vm9479_vm14, %v5304_v54  ;;  %v9486_v51 = vld [vmem:[#allocation46_spill] sm:$0xff]  ;;  %vm9488_vm12 = vmmov %vm9485_vm13  ;;  %v9507_v59 = vld [vmem:[#allocation51_spill] sm:$0xff] }
0x1710   :  { %v5307_v62 = vpack.c.bf16 %v4331_v47, %v8697_v8  ;;  %v6201_v39 = vunpack.i.h.bf16 %v6199_v15  ;;  %v6200_v60 = vunpack.i.l.bf16 %v6199_v15  ;;  %vm9483_vm7 = vnez %v9482_v7  ;;  %vm9489_vm2 = vmmov %vm9488_vm12  ;;  %v4405_v47 = vld [vmem:[#allocation9] sm:$0xf]  ;;  %v9516_v54 = vld [vmem:[#allocation54_spill] sm:$0xff] }
0x1711   :  { %5331 = vmatprep.subr.msk.bf16.mxu0 %vm9481_vm5, %v5330_v26  ;;  %v6204_v63 = vpop.permute.xlu1 %6203  ;;  %v4299_v8 = vsel %vm9485_vm13, %v6195_v12, %v6196_v2  ;;  %vm9487_vm10 = vnez %v9486_v51  ;;  %vm9490_vm11 = vmmov %vm9489_vm2  ;;  %vm9491_vm8 = vnez %v9066_v22  ;;  %vm9498_vm5 = vnez %v9497_v50 }
0x1712   :  { %5308 = vmatpush1.bf16.msk.msra.mxu1 %vm9483_vm7, %v5307_v62  ;;  %v4315_v56 = vsel %vm9484_vm9, %v6200_v60, %v6201_v39  ;;  %v6206_v29 = vunpack.i.h.bf16 %v6204_v63  ;;  %v6205_v1 = vunpack.i.l.bf16 %v6204_v63  ;;  %vm9492_vm15 = vmpackc.low %vm9390_vm1, %vm9491_vm8  ;;  %vm9496_vm1 = vcmp.lt.s32.totalorder %v6907_v9, 17 }
0x1713   :  { %5334 = vmatpush1.bf16.msk.msra.mxu0 %vm9487_vm10, %v5333_v61  ;;  %v5310_v36 = vpack.c.bf16 %v4315_v56, %v4299_v8  ;;  %v6209_v38 = vpop.permute.xlu0 %6208  ;;  %vm9493_vm4 = vmmov %vm9484_vm9  ;;  %vm9499_vm7 = vnez %v9378_v57  ;;  %vm9501_vm13 = vcmp.lt.s32.totalorder %v6907_v9, 16  ;;  %vm9502_vm10 = vnez %v9369_v40 }
0x1714   :  { %v6211_v42 = vunpack.i.h.bf16 %v6209_v38  ;;  %v6210_v19 = vunpack.i.l.bf16 %v6209_v38  ;;  %v4297_v4 = vsel %vm9488_vm12, %v6206_v29, %v6205_v1  ;;  %v4298_v32 = vsel %vm9489_vm2, %v6196_v2, %v6206_v29  ;;  %vm9494_vm0 = vmmov %vm9493_vm4 }
0x1715   :  { %v4300_v24 = vsel %vm9490_vm11, %v6205_v1, %v6195_v12  ;;  %5311 = vmatprep.subr.msk.bf16.mxu1 %vm9492_vm15, %v5310_v36  ;;  %v6214_v55 = vpop.permute.xlu1 %6213  ;;  %vm9495_vm14 = vmmov %vm9494_vm0  ;;  %vm9503_vm12 = vnez %v9409_v13  ;;  %vm9508_vm8 = vnez %v9507_v59 }
0x1716   :  { %v4313_v25 = vsel %vm9493_vm4, %v6211_v42, %v6210_v19  ;;  %v4314_v37 = vsel %vm9494_vm0, %v6201_v39, %v6211_v42  ;;  %v4316_v11 = vsel %vm9495_vm14, %v6210_v19, %v6200_v60  ;;  %v6216_v35 = vunpack.i.h.bf16 %v6214_v55  ;;  %vm9500_vm9 = vmpackc.low %vm9393_vm6, %vm9499_vm7  ;;  %v4521_v42 = vld [vmem:[%s9522_s15] sm:$0xff] }
0x1717   :  { %v5313_v44 = vpack.c.bf16 %v4316_v11, %v4300_v24  ;;  %v5336_v43 = vpack.c.bf16 %v4313_v25, %v4297_v4  ;;  %v5339_v14 = vpack.c.bf16 %v4314_v37, %v4298_v32  ;;  %v6219_v17 = vpop.permute.xlu0 %6218  ;;  %v6215_v58 = vunpack.i.l.bf16 %v6214_v55  ;;  %vm9504_vm2 = vmpackc.low %vm9502_vm10, %vm9503_vm12  ;;  %v4525_v32 = vld [vmem:[%s6843_s20] sm:$0xff] }
0x1718   :  { %v6221_v18 = vunpack.i.h.bf16 %v6219_v17  ;;  %v6220_v22 = vunpack.i.l.bf16 %v6219_v17  ;;  %vm9505_vm11 = vmmov %vm9501_vm13  ;;  %vm9519_vm10 = vnez %v9425_v3  ;;  %v4591_v55 = vld [vmem:[%s6853_s13] sm:$0x7] }
0x1719   :  { %v4267_v27 = vsel %vm9496_vm1, %v6215_v58, %v6216_v35  ;;  %5314 = vmatpush1.bf16.msk.msra.mxu1 %vm9498_vm5, %v5313_v44  ;;  %5337 = vmatprep.subr.msk.bf16.mxu0 %vm9500_vm9, %v5336_v43  ;;  %v6224_v10 = vpop.permute.xlu1 %6223  ;;  %vm9506_vm6 = vmmov %vm9496_vm1  ;;  %vm9514_vm5 = vnez %v9427_v53  ;;  %vm9517_vm9 = vnez %v9516_v54 }
0x171a   :  { %v4283_v45 = vsel %vm9501_vm13, %v6220_v22, %v6221_v18  ;;  %5340 = vmatpush1.bf16.msk.msra.mxu0 %vm9504_vm2, %v5339_v14  ;;  %v6226_v30 = vunpack.i.h.bf16 %v6224_v10  ;;  %v6225_v33 = vunpack.i.l.bf16 %v6224_v10  ;;  %vm9509_vm15 = vmmov %vm9496_vm1  ;;  %vm9518_vm13 = vcmask 588800  }
0x171b   :  { %v5316_v23 = vpack.c.bf16 %v4283_v45, %v4267_v27  ;;  %v4280_v41 = vpop.permute.xlu0 %4279  ;;  %vm9510_vm4 = vmmov %vm9496_vm1  ;;  %vm9513_vm1 = vnez %v9419_v34 }
0x171c   :  { %v4284_v0 = vsel %vm9505_vm11, %v4280_v41, %v6220_v22  ;;  %v4268_v57 = vsel %vm9506_vm6, %v6225_v33, %v6215_v58  ;;  %v4265_v40 = vsel %vm9509_vm15, %v6226_v30, %v6225_v33  ;;  %v4266_v13 = vsel %vm9510_vm4, %v6216_v35, %v6226_v30  ;;  %vm9511_vm0 = vmmov %vm9505_vm11 }
0x171d   :  { %v5319_v52 = vpack.c.bf16 %v4284_v0, %v4268_v57  ;;  %5317 = vmatprep.subr.msk.bf16.mxu1 %vm9508_vm8, %v5316_v23  ;;  %v4278_v16 = vpop.permute.xlu1 %4277  ;;  %vm9512_vm14 = vmmov %vm9511_vm0  ;;  %vm4597_vm6 = vcmask 64512  }
0x171e   :  { %v4281_v49 = vsel %vm9511_vm0, %v4278_v16, %v4280_v41  ;;  %v4282_v28 = vsel %vm9512_vm14, %v6221_v18, %v4278_v16  ;;  %vm9515_vm7 = vmpackc.low %vm9513_vm1, %vm9514_vm5 }
0x171f   :  { %v5342_v20 = vpack.c.bf16 %v4281_v49, %v4265_v40  ;;  %v5345_v5 = vpack.c.bf16 %v4282_v28, %v4266_v13  ;;  %5320 = vmatpush1.bf16.msk.msra.mxu1 %vm9515_vm7, %v5319_v52  ;;  %vm9520_vm12 = vmpackc.low %vm9519_vm10, %vm9437_vm3  ;;  %vm9523_vm3 = vcmask 1043456  }
0x1720   :  { %vm9521_vm2 = vmmov %vm9518_vm13 }
0x1721   :  { %5343 = vmatprep.subr.msk.bf16.mxu0 %vm9517_vm9, %v5342_v20  ;;  %vm9524_vm11 = vmmov %vm9523_vm3 }
0x1722   :  { %5321 = vmatmul.mubr.msk.bf16.vlgmr.msra.gmra.mxu1 %vm9518_vm13, %v4405_v47  ;;  %5346 = vmatpush1.bf16.msk.msra.mxu0 %vm9520_vm12, %v5345_v5  ;;  %vm9525_vm8 = vmmov %vm9523_vm3 }
0x1723   :  { %4645 = vmatprep.mubr.bf16.mxu1 %v9243_v6  ;;  %vm9526_vm15 = vmmov %vm9523_vm3 }
0x1725   :  { %5347 = vmatmul.mubr.msk.bf16.vlgmr.msra.gmra.mxu0 %vm9521_vm2, %v4405_v47 }
0x17e2   :  { %v4455_v9 = vpop.f32.mrf.mxu1 }
0x17e3   :  { %v4509_v53 = vmul.f32 %v4455_v9, %v4455_v9 }
0x17e4   :  { %v4457_v34 = vpop.f32.mrf.mxu1 }
0x17e5   :  { %v4503_v31 = vadd.f32 %v4457_v34, %v4455_v9  ;;  %v4510_v26 = vmul.f32 %v4457_v34, %v4457_v34  ;;  %v4496_v61 = vpop.f32.mrf.mxu0 }
0x17e6   :  { %v4511_v62 = vmul.f32 %v4496_v61, %v4496_v61  ;;  %v4459_v15 = vpop.f32.mrf.mxu1 }
0x17e7   :  { %v4513_v2 = vadd.f32 %v4510_v26, %v4509_v53  ;;  %v4504_v39 = vadd.f32 %v4503_v31, %v4496_v61  ;;  %v4498_v60 = vpop.f32.mrf.mxu0 }
0x17e8   :  { %v4512_v3 = vmul.f32 %v4498_v60, %v4498_v60  ;;  %v4460_v12 = vpop.f32.mrf.mxu1 }
0x17e9   :  { %v4514_v46 = vadd.f32 %v4513_v2, %v4511_v62  ;;  %v4505_v48 = vadd.f32 %v4504_v39, %v4498_v60  ;;  %v4500_v21 = vpop.f32.mrf.mxu0 }
0x17eb   :  { %v4501_v7 = vpop.f32.mrf.mxu0  ;;  %4506 = vadd.xlane.f32.xlu0 %v4505_v48  ;;  %v4515_v63 = vadd.f32 %v4514_v46, %v4512_v3 }
0x17ed   :  { %4516 = vadd.xlane.f32.xlu1 %v4515_v63 }
0x1874   :  { %v4507_v56 = vpop.xlane.xlu0 %4506 }
0x1875   :  { %v4508_v8 = vmul.f32 0.001953125, %v4507_v56 }
0x1876   :  { %v4517_v51 = vpop.xlane.xlu1 %4516 }
0x1877   :  { %v4519_v29 = vmul.f32 %v4508_v8, %v4508_v8  ;;  %v4518_v1 = vmul.f32 0.001953125, %v4517_v51 }
0x1879   :  { %v4520_v36 = vsub.f32 %v4518_v1, %v4519_v29 }
0x187b   :  { %v4522_v38 = vadd.f32 1e-05, %v4520_v36 }
0x187d   :  { %6471 = vrsqrt.f32 %v4522_v38  ;;  %v4586_v38 = vld [vmem:[#allocation10] sm:$0x3] }
0x188a   :  { %v6472_v19 = vpop.eup %6471 }
0x188b   :  { %v4524_v4 = vmul.f32 %v6472_v19, %v4521_v42 }
0x188d   :  { %4530 = vperm.xlu0 %5870, %v4524_v4   ;;  %v4526_v24 = vmul.f32 %v4524_v4, %v4508_v8 }
0x188f   :  { %v4527_v25 = vsub.f32 %v4525_v32, %v4526_v24 }
0x1891   :  { %4594 = vperm.xlu0 %5870, %v4591_v55   ;;  %4539 = vperm.xlu1 %5871, %v4527_v25  }
0x1908   :  { %v4531_v37 = vpop.permute.xlu0 %4530 }
0x1909   :  { %v4533_v11 = vmul.f32 %v4531_v37, %v4455_v9  ;;  %v4534_v35 = vmul.f32 %v4531_v37, %v4457_v34  ;;  %v4535_v44 = vmul.f32 %v4531_v37, %v4496_v61  ;;  %v4536_v43 = vmul.f32 %v4531_v37, %v4498_v60 }
0x190c   :  { %v4540_v14 = vpop.permute.xlu1 %4539  ;;  %v4595_v4 = vpop.permute.xlu0 %4594 }
0x190d   :  { %v4542_v17 = vadd.f32 %v4540_v14, %v4533_v11  ;;  %v4543_v58 = vadd.f32 %v4540_v14, %v4534_v35  ;;  %v4544_v18 = vadd.f32 %v4540_v14, %v4535_v44  ;;  %v4545_v22 = vadd.f32 %v4540_v14, %v4536_v43 }
0x190f   :  { %v4546_v27 = vmin.f32 %v4542_v17, 20.0  ;;  %v4547_v50 = vmin.f32 %v4543_v58, 20.0  ;;  %v4548_v10 = vmin.f32 %v4544_v18, 20.0  ;;  %v4549_v45 = vmin.f32 %v4545_v22, 20.0 }
0x1911   :  { %v4550_v30 = vmul.f32 1.442695, %v4546_v27  ;;  %v4552_v33 = vmul.f32 1.442695, %v4547_v50  ;;  %v4554_v23 = vmul.f32 1.442695, %v4548_v10 }
0x1912   :  { %v4556_v41 = vmul.f32 1.442695, %v4549_v45 }
0x1913   :  { %6473 = vpow2.f32 %v4550_v30 }
0x1914   :  { %6475 = vpow2.f32 %v4552_v33 }
0x1915   :  { %6477 = vpow2.f32 %v4554_v23 }
0x1916   :  { %6479 = vpow2.f32 %v4556_v41 }
0x1920   :  { %v6474_v0 = vpop.eup %6473 }
0x1921   :  { %v6476_v57 = vpop.eup %6475  ;;  %v4558_v52 = vadd.f32 1.0, %v6474_v0 }
0x1922   :  { %v6478_v59 = vpop.eup %6477  ;;  %v4559_v16 = vadd.f32 1.0, %v6476_v57 }
0x1923   :  { %v6480_v40 = vpop.eup %6479  ;;  %v4560_v13 = vadd.f32 1.0, %v6478_v59  ;;  %v4562_v49 = vmul.f32 %v4558_v52, %v4558_v52 }
0x1924   :  { %v4561_v28 = vadd.f32 1.0, %v6480_v40  ;;  %v4563_v20 = vmul.f32 %v4559_v16, %v4559_v16 }
0x1925   :  { %v4564_v5 = vmul.f32 %v4560_v13, %v4560_v13  ;;  %v4574_v47 = vadd.f32 1.0, %v4562_v49  ;;  %v5348_v31 = vadd.f32 -1.0, %v4562_v49 }
0x1926   :  { %v4565_v54 = vmul.f32 %v4561_v28, %v4561_v28  ;;  %v4575_v9 = vadd.f32 1.0, %v4563_v20  ;;  %v5349_v26 = vadd.f32 -1.0, %v4563_v20 }
0x1927   :  { %v4576_v34 = vadd.f32 1.0, %v4564_v5  ;;  %6481 = vrcp.f32 %v4574_v47  ;;  %v5350_v61 = vadd.f32 -1.0, %v4564_v5  ;;  %v4570_v15 = vmul.f32 %v5348_v31, %v4542_v17 }
0x1928   :  { %v4577_v53 = vadd.f32 1.0, %v4565_v54  ;;  %6483 = vrcp.f32 %v4575_v9  ;;  %v5351_v62 = vadd.f32 -1.0, %v4565_v54  ;;  %v4571_v39 = vmul.f32 %v5349_v26, %v4543_v58 }
0x1929   :  { %6485 = vrcp.f32 %v4576_v34  ;;  %v4572_v3 = vmul.f32 %v5350_v61, %v4544_v18 }
0x192a   :  { %6487 = vrcp.f32 %v4577_v53  ;;  %v4573_v48 = vmul.f32 %v5351_v62, %v4545_v22 }
0x1934   :  { %v6482_v2 = vpop.eup %6481 }
0x1935   :  { %v6484_v60 = vpop.eup %6483  ;;  %v4582_v12 = vmul.f32 %v6482_v2, %v4570_v15 }
0x1936   :  { %v6486_v46 = vpop.eup %6485  ;;  %v4583_v21 = vmul.f32 %v6484_v60, %v4571_v39 }
0x1937   :  { %v6488_v7 = vpop.eup %6487  ;;  %v4587_v63 = vpack.c.bf16 %v4582_v12, %v4582_v12  ;;  %v4584_v56 = vmul.f32 %v6486_v46, %v4572_v3 }
0x1938   :  { %v4585_v8 = vmul.f32 %v6488_v7, %v4573_v48  ;;  %v4588_v51 = vpack.c.bf16 %v4583_v21, %v4583_v21 }
0x1939   :  { %v4602_v29 = vsel %vm9523_vm3, %v4587_v63, 0  ;;  %v4589_v36 = vpack.c.bf16 %v4584_v56, %v4584_v56 }
0x193a   :  { %5352 = vmatprep.subr.msk.bf16.mxu1 %vm9524_vm11, %v4588_v51  ;;  %v4590_v1 = vpack.c.bf16 %v4585_v8, %v4585_v8 }
0x193b   :  { %4628 = vmatpush1.bf16.msra.mxu1 %v4602_v29  ;;  %v4608_v42 = vsel %vm9526_vm15, %v4589_v36, 0 }
0x193c   :  { %5354 = vmatprep.subr.msk.bf16.mxu1 %vm9525_vm8, %v4590_v1 }
0x193e   :  { %5353 = vmatmul.mubr.msk.bf16.vlgmr.msra.gmra.mxu1 %vm4597_vm6, %v4586_v38 }
0x193f   :  { %4669 = vmatpush1.bf16.msra.mxu1 %v4608_v42  ;;  %4686 = vmatprep.mubr.bf16.mxu1 %v9243_v6 }
0x1946   :  { %5355 = vmatmul.mubr.msk.bf16.vlgmr.msra.gmra.mxu1 %vm4597_vm6, %v4586_v38 }
0x19fe   :  { %v4647_v19 = vpop.f32.mrf.mxu1 }
0x19ff   :  { %v4648_v24 = vadd.f32 %v4647_v19, %v4595_v4 }
0x1a00   :  { %v4649_v32 = vpop.f32.mrf.mxu1 }
0x1a01   :  { %v4650_v55 = vadd.f32 %v4649_v32, %v4595_v4 }
0x1a02   :  { %v4651_v25 = vpop.f32.mrf.mxu1 }
0x1a03   :  { %v4699_v37 = vcombine.low %v4648_v24, %v4650_v55 }
0x1a04   :  { %v4652_v11 = vpop.f32.mrf.mxu1 }
0x1a05   :  { %4703 = vst [vmem:[%s6858_s17] sm:$0x77] %v4699_v37 }
0x1a06   :  { %v4688_v35 = vpop.f32.mrf.mxu1 }
0x1a07   :  { %v4689_v43 = vadd.f32 %v4688_v35, %v4595_v4 }
0x1a08   :  { %v4690_v44 = vpop.f32.mrf.mxu1 }
0x1a09   :  { %v4691_v14 = vadd.f32 %v4690_v44, %v4595_v4 }
0x1a0a   :  { %v4692_v17 = vpop.f32.mrf.mxu1 }
0x1a0b   :  { %v4700_v58 = vcombine.low %v4689_v43, %v4691_v14 }
0x1a0c   :  { %v4693_v18 = vpop.f32.mrf.mxu1 }
0x1a0d   :  { %4704 = vst [vmem:[%s6858_s17 + $0x8] sm:$0x77] %v4700_v58 }
0x1a0e   :  { %4709 = vsyncpa [#allocation3], 1 }
0x1a0f   :  { %4710 = vsyncpa [#allocation5], 1 }
0x1a10   :  { %4711 = vsyncpa [#allocation8], 1 }
0x1a11   :  { %4712 = vsyncpa [#allocation11], 1 }

</bundles_post_ra>
